<compile_context>
chip_gen: v5e
topology: v5e:2x2
jax: 0.10.0
libtpu: 0.0.40
codegen_flags: <defaults>
</compile_context>

<pallas_src>
import math
from functools import partial

import jax
import jax.numpy as jnp
from jax.experimental import pallas as pl
from jax.experimental.pallas import tpu as pltpu


# ---------------------------------------------------------------------------
# helpers shared by the kernel and the pure-JAX reference
# ---------------------------------------------------------------------------
def _gelu_tanh(x):
    # nn.GELU(approximate='tanh')
    c = math.sqrt(2.0 / math.pi)
    return 0.5 * x * (1.0 + jnp.tanh(c * (x + 0.044715 * x * x * x)))


def _layernorm(x, eps=1e-6):
    # nn.LayerNorm(elementwise_affine=False, eps=1e-6): biased variance over last dim
    mu = jnp.mean(x, axis=-1, keepdims=True)
    var = jnp.mean((x - mu) ** 2, axis=-1, keepdims=True)
    return (x - mu) * jax.lax.rsqrt(var + eps)


def sinusoidal_embedding(positions, dim):
    # SinusoidalEmbedding(d_model) applied to arange(horizon)
    half = dim // 2
    scale = math.log(10000.0) / (half - 1)
    freqs = jnp.exp(-scale * jnp.arange(half, dtype=jnp.float32))
    args = positions.astype(jnp.float32)[:, None] * freqs[None, :]
    return jnp.concatenate([jnp.sin(args), jnp.cos(args)], axis=-1)


# ---------------------------------------------------------------------------
# fused Pallas kernel: x_proj + pos emb -> in-kernel layer loop -> final linear
# ---------------------------------------------------------------------------
def critic_kernel(x_ref, wproj_ref, bproj_ref, pos_ref,
                  wqkv_ref, bqkv_ref, wo_ref, bo_ref,
                  w1_ref, b1_ref, w2_ref, b2_ref,
                  wf_ref, bf_ref,
                  y_ref,
                  h_ref,
                  *, n_heads, approx_recip):
    block_b, seq_len, in_dim = x_ref.shape
    depth, d_model, _ = wqkv_ref.shape
    dh = d_model // n_heads
    m = block_b * seq_len                          # rows fed to every MXU matmul
    scale = 1.0 / math.sqrt(dh)
    mm = wqkv_ref.dtype                            # MXU input dtype (bf16 fast / f32)

    # ---- input projection + sinusoidal positional embedding (once per batch block) --
    x_in = x_ref[...].reshape(m, in_dim)
    h = jnp.dot(x_in.astype(mm), wproj_ref[...],
                preferred_element_type=jnp.float32) + bproj_ref[...]
    h = (h.reshape(block_b, seq_len, d_model) + pos_ref[...][None]).reshape(m, d_model)
    h_ref[...] = h                                 # f32 residual stream lives in VMEM

    # ---- `depth` transformer blocks; all weights VMEM-resident, indexed per layer ---
    @pl.loop(0, depth)
    def _(layer):
        x = h_ref[...]                             # (m, d_model) f32
        xm = x.astype(mm)

        # fused lane-dense QKV: one (m, D) x (D, 3D) matmul + one (1, 3D) bias add
        qkv = jnp.dot(xm, wqkv_ref[layer],
                      preferred_element_type=jnp.float32) + bqkv_ref[layer]

        # per-head scaled-dot-product attention (tiny T x T / T x dh einsums;
        # TODO(synk): lane-dense batched-head softmax if T grows beyond toy sizes)
        heads = []
        for hd in range(n_heads):                  # static unroll, n_heads is small
            lo = hd * dh
            q = qkv[:, lo:lo + dh].reshape(block_b, seq_len, dh)
            k = qkv[:, d_model + lo:d_model + lo + dh].reshape(block_b, seq_len, dh)
            v = qkv[:, 2 * d_model + lo:2 * d_model + lo + dh].reshape(block_b, seq_len, dh)

            s = jnp.einsum("bqd,bkd->bqk", q.astype(mm), k.astype(mm),
                           preferred_element_type=jnp.float32) * scale
            s = s - jnp.max(s, axis=-1, keepdims=True)
            p = jnp.exp(s)
            denom = jnp.sum(p, axis=-1, keepdims=True)
            if approx_recip:
                p = p * pl.reciprocal(denom, approx=True)   # EUP slot (bf16 path only)
            else:
                p = p / denom

            o = jnp.einsum("bqk,bkd->bqd", p.astype(mm), v.astype(mm),
                           preferred_element_type=jnp.float32)
            heads.append(o.reshape(m, dh))

        # merge heads back into a lane-dense (m, D) buffer -> single K=D out-projection
        o_merged = jnp.concatenate(heads, axis=-1)
        attn = jnp.dot(o_merged.astype(mm), wo_ref[layer],
                       preferred_element_type=jnp.float32) + bo_ref[layer]

        # post-norm residual 1: x = norm1(x + attn(x, x, x))
        x = _layernorm(x + attn)

        # MLP: Linear(D, 4D) -> GELU(tanh) -> Linear(4D, D)
        h1 = jnp.dot(x.astype(mm), w1_ref[layer],
                     preferred_element_type=jnp.float32) + b1_ref[layer]
        h1 = _gelu_tanh(h1)
        h2 = jnp.dot(h1.astype(mm), w2_ref[layer],
                     preferred_element_type=jnp.float32) + b2_ref[layer]

        # post-norm residual 2: x = norm2(x + mlp(x))
        h_ref[...] = _layernorm(x + h2)

    # ---- final Linear(d_model -> 1) applied to token 0 only ----
    x0 = h_ref[...].reshape(block_b, seq_len, d_model)[:, 0, :]
    y = jnp.dot(x0.astype(mm), wf_ref[...],
                preferred_element_type=jnp.float32) + bf_ref[...]
    y_ref[...] = y.astype(y_ref.dtype)


# ---------------------------------------------------------------------------
# pallas_call wrapper
# ---------------------------------------------------------------------------
def _pick_block_b(batch, seq_len, *, target_rows=512, max_rows=1024):
    """block_b so m = block_b*T lands near [target_rows, max_rows]; prefer >= 2 blocks
    (v7x has 2 TensorCores) and keep block_b sublane-aligned (mult of 8 or == batch)."""
    def ok(d):
        return batch % d == 0 and (d == batch or d % 8 == 0)
    divisors = [d for d in range(1, batch + 1) if ok(d)]
    # smallest block that meets the row target while leaving >= 2 grid steps
    for d in divisors:
        if d < batch and target_rows <= d * seq_len <= max_rows:
            return d
    under = [d for d in divisors if d * seq_len <= max_rows]
    best = max(under) if under else min(divisors)
    # small batches: still keep two blocks so the second v7x TensorCore isn't idle
    # (weights are fetched once regardless, so the extra grid step is nearly free).
    if best == batch and batch % 2 == 0 and (batch // 2) in divisors:
        best = batch // 2
    return best


def dv_horizon_critic_forward(x, params, n_heads, *, block_b=None):
    """y = final_layer(blocks(x_proj(x) + pos_emb))[:, 0, :]  -> shape (B, 1)."""
    B, T, in_dim = x.shape
    D = params["x_proj_w"].shape[1]
    depth = params["wqkv"].shape[0]
    H4 = params["w1"].shape[2]                     # 4 * d_model
    assert D % n_heads == 0

    if block_b is None:
        block_b = _pick_block_b(B, T)
    assert B % block_b == 0, (B, block_b)
    m = block_b * T

    pos = sinusoidal_embedding(jnp.arange(T), D).astype(jnp.float32)
    approx_recip = bool(params["wqkv"].dtype == jnp.bfloat16)

    # VMEM budget: weights (x2 for pipeline buffers) + activation scratch + the
    # (m, 4D) GELU intermediate + x/out blocks + headroom, clamped to 3/4 of physical.
    weight_keys = ("x_proj_w", "x_proj_b", "wqkv", "bqkv", "wo", "bo",
                   "w1", "b1", "w2", "b2", "final_w", "final_b")
    weight_bytes = sum(int(params[k].size) * params[k].dtype.itemsize for k in weight_keys)
    weight_bytes += int(pos.size) * 4
    act_bytes = m * D * 4 + m * H4 * 4 + block_b * T * in_dim * 4
    need = 2 * weight_bytes + 3 * act_bytes + (8 << 20)
    try:
        cap = int(pltpu.get_tpu_info().vmem_capacity_bytes)
    except Exception:
        cap = 64 << 20                             # assume the smallest (v7x per-TC)
    vmem_limit = int(min(max(need, 32 << 20), max(cap * 3 // 4, 32 << 20)))

    const2 = lambda i: (0, 0)
    const3 = lambda i: (0, 0, 0)

    grid_spec = pltpu.PrefetchScalarGridSpec(
        num_scalar_prefetch=0,
        grid=(B // block_b,),                      # batch blocks only; layers in-kernel
        in_specs=[
            pl.BlockSpec((block_b, T, in_dim), lambda i: (i, 0, 0)),   # x
            pl.BlockSpec((in_dim, D), const2),        # x_proj weight
            pl.BlockSpec((1, D), const2),             # x_proj bias
            pl.BlockSpec((T, D), const2),             # positional embedding
            pl.BlockSpec((depth, D, 3 * D), const3),  # fused QKV weights (lane-dense)
            pl.BlockSpec((depth, 1, 3 * D), const3),  # fused QKV bias
            pl.BlockSpec((depth, D, D), const3),      # attention out-proj weight
            pl.BlockSpec((depth, 1, D), const3),      # attention out-proj bias
            pl.BlockSpec((depth, D, H4), const3),     # mlp w1
            pl.BlockSpec((depth, 1, H4), const3),     # mlp b1
            pl.BlockSpec((depth, H4, D), const3),     # mlp w2
            pl.BlockSpec((depth, 1, D), const3),      # mlp b2
            pl.BlockSpec((D, 1), const2),             # final weight
            pl.BlockSpec((1, 1), const2),             # final bias
        ],
        out_specs=pl.BlockSpec((block_b, 1), lambda i: (i, 0)),
        scratch_shapes=[pltpu.VMEM((m, D), jnp.float32)],   # resident f32 activation
    )

    return pl.pallas_call(
        partial(critic_kernel, n_heads=n_heads, approx_recip=approx_recip),
        out_shape=jax.ShapeDtypeStruct((B, 1), jnp.float32),
        grid_spec=grid_spec,
        compiler_params=pltpu.CompilerParams(
            dimension_semantics=("parallel",),     # batch blocks shard across TCs
            vmem_limit_bytes=vmem_limit,
        ),
    )(x, params["x_proj_w"], params["x_proj_b"], pos,
      params["wqkv"], params["bqkv"], params["wo"], params["bo"],
      params["w1"], params["b1"], params["w2"], params["b2"],
      params["final_w"], params["final_b"])


# ---------------------------------------------------------------------------
# parameter init (xavier-uniform weights, zero biases; QKV fused lane-dense)
# ---------------------------------------------------------------------------
def xavier_uniform(key, fan_in, fan_out):
    bound = math.sqrt(6.0 / (fan_in + fan_out))
    return jax.random.uniform(key, (fan_in, fan_out), jnp.float32, -bound, bound)


def init_params(key, in_dim, d_model, n_heads, depth, param_dtype=jnp.float32):
    assert d_model % n_heads == 0
    keys = jax.random.split(key, 2 + 6 * depth)
    params = {
        "x_proj_w": xavier_uniform(keys[0], in_dim, d_model).astype(param_dtype),
        "x_proj_b": jnp.zeros((1, d_model), jnp.float32),
        "final_w": xavier_uniform(keys[1], d_model, 1).astype(param_dtype),
        "final_b": jnp.zeros((1, 1), jnp.float32),
    }
    wqkv, wo, w1, w2 = [], [], [], []
    for l in range(depth):
        kq, kk, kv, ko, k1, k2 = keys[2 + 6 * l: 8 + 6 * l]
        wq = xavier_uniform(kq, d_model, d_model)
        wk = xavier_uniform(kk, d_model, d_model)
        wv = xavier_uniform(kv, d_model, d_model)
        wqkv.append(jnp.concatenate([wq, wk, wv], axis=1))   # (D, 3D) lane-dense
        wo.append(xavier_uniform(ko, d_model, d_model))
        w1.append(xavier_uniform(k1, d_model, 4 * d_model))
        w2.append(xavier_uniform(k2, 4 * d_model, d_model))
    params.update({
        "wqkv": jnp.stack(wqkv).astype(param_dtype),
        "wo": jnp.stack(wo).astype(param_dtype),
        "w1": jnp.stack(w1).astype(param_dtype),
        "w2": jnp.stack(w2).astype(param_dtype),
        "bqkv": jnp.zeros((depth, 1, 3 * d_model), jnp.float32),
        "bo": jnp.zeros((depth, 1, d_model), jnp.float32),
        "b1": jnp.zeros((depth, 1, 4 * d_model), jnp.float32),
        "b2": jnp.zeros((depth, 1, d_model), jnp.float32),
    })
    return params


# ---------------------------------------------------------------------------
# pure-JAX reference (for self-check)
# ---------------------------------------------------------------------------
def reference_forward(x, params, n_heads):
    f32 = lambda a: a.astype(jnp.float32)
    hp = jax.lax.Precision.HIGHEST
    B, T, _ = x.shape
    D = params["x_proj_w"].shape[1]
    dh = D // n_heads
    pos = sinusoidal_embedding(jnp.arange(T), D)

    h = jnp.einsum("btc,cd->btd", x, f32(params["x_proj_w"]), precision=hp)
    h = h + params["x_proj_b"] + pos[None]
    depth = params["wqkv"].shape[0]
    for l in range(depth):
        qkv = jnp.einsum("btd,de->bte", h, f32(params["wqkv"][l]), precision=hp) \
              + params["bqkv"][l][None]
        q, k, v = jnp.split(qkv, 3, axis=-1)
        split = lambda a: a.reshape(B, T, n_heads, dh).transpose(0, 2, 1, 3)
        qh, kh, vh = split(q), split(k), split(v)
        s = jnp.einsum("bhqd,bhkd->bhqk", qh, kh, precision=hp) / math.sqrt(dh)
        a = jax.nn.softmax(s, axis=-1)
        o = jnp.einsum("bhqk,bhkd->bhqd", a, vh, precision=hp)
        o = o.transpose(0, 2, 1, 3).reshape(B, T, D)
        attn = jnp.einsum("btd,de->bte", o, f32(params["wo"][l]), precision=hp) \
               + params["bo"][l][None]
        h = _layernorm(h + attn)
        m1 = jnp.einsum("btd,df->btf", h, f32(params["w1"][l]), precision=hp) \
             + params["b1"][l][None]
        m1 = _gelu_tanh(m1)
        m2 = jnp.einsum("btf,fd->btd", m1, f32(params["w2"][l]), precision=hp) \
             + params["b2"][l][None]
        h = _layernorm(h + m2)
    y = jnp.einsum("bd,do->bo", h[:, 0, :], f32(params["final_w"]), precision=hp) \
        + params["final_b"]
    return y


# ---------------------------------------------------------------------------
if __name__ == "__main__":
    # small, module-consistent shapes: x (b, horizon, in_dim); lane-dense d_model
    B, T, IN_DIM = 16, 8, 4
    D_MODEL, N_HEADS, DEPTH = 128, 4, 2

    key = jax.random.PRNGKey(0)
    k_x, k_p = jax.random.split(key)
    x = jax.random.normal(k_x, (B, T, IN_DIM), jnp.float32)

    # precise path (f32 params), checked against the pure-JAX reference
    params_f32 = init_params(k_p, IN_DIM, D_MODEL, N_HEADS, DEPTH, param_dtype=jnp.float32)
    y_f32 = jax.block_until_ready(dv_horizon_critic_forward(x, params_f32, N_HEADS))
    y_ref = jax.block_until_ready(reference_forward(x, params_f32, N_HEADS))
    assert y_f32.shape == (B, 1), y_f32.shape
    err_f32 = float(jnp.max(jnp.abs(y_f32 - y_ref)))
    assert err_f32 < 2e-2, f"f32 kernel mismatch: {err_f32}"

    # fast path: bf16-fed MXU matmuls, f32 accumulation + f32 residual stream in-kernel
    params_bf16 = init_params(k_p, IN_DIM, D_MODEL, N_HEADS, DEPTH, param_dtype=jnp.bfloat16)
    y_bf16 = jax.block_until_ready(dv_horizon_critic_forward(x, params_bf16, N_HEADS))
    assert y_bf16.shape == (B, 1), y_bf16.shape
    err_bf16 = float(jnp.max(jnp.abs(y_bf16 - y_ref)))
    assert err_bf16 < 2e-1, f"bf16 kernel mismatch: {err_bf16}"

    print("KERNEL_OK")
</pallas_src>

<mosaic_0001>
module attributes {stable_mosaic.version = 11 : i64} {
  func.func @critic_kernel(%arg0: i32, %arg1: memref<8x8x4xf32, #tpu.memory_space<vmem>>, %arg2: memref<4x128xf32, #tpu.memory_space<vmem>>, %arg3: memref<1x128xf32, #tpu.memory_space<vmem>>, %arg4: memref<8x128xf32, #tpu.memory_space<vmem>>, %arg5: memref<2x128x384xf32, #tpu.memory_space<vmem>>, %arg6: memref<2x1x384xf32, #tpu.memory_space<vmem>>, %arg7: memref<2x128x128xf32, #tpu.memory_space<vmem>>, %arg8: memref<2x1x128xf32, #tpu.memory_space<vmem>>, %arg9: memref<2x128x512xf32, #tpu.memory_space<vmem>>, %arg10: memref<2x1x512xf32, #tpu.memory_space<vmem>>, %arg11: memref<2x512x128xf32, #tpu.memory_space<vmem>>, %arg12: memref<2x1x128xf32, #tpu.memory_space<vmem>>, %arg13: memref<128x1xf32, #tpu.memory_space<vmem>>, %arg14: memref<1x1xf32, #tpu.memory_space<vmem>>, %arg15: memref<8x1xf32, #tpu.memory_space<vmem>>, %arg16: memref<64x128xf32, #tpu.memory_space<vmem>>) attributes {dimension_semantics = [#tpu.dimension_semantics<parallel>], iteration_bounds = array<i64: 2>, scalar_prefetch = 0 : i64, scratch_operands = 1 : i64, tpu.core_type = #tpu.core_type<tc>, window_params = [{transform_indices = @transform_0, window_bounds = array<i64: 8, 8, 4>}, {pipeline_mode = #tpu.pipeline_mode<synchronous>, transform_indices = @transform_1, window_bounds = array<i64: 4, 128>}, {pipeline_mode = #tpu.pipeline_mode<synchronous>, transform_indices = @transform_2, window_bounds = array<i64: 1, 128>}, {pipeline_mode = #tpu.pipeline_mode<synchronous>, transform_indices = @transform_3, window_bounds = array<i64: 8, 128>}, {pipeline_mode = #tpu.pipeline_mode<synchronous>, transform_indices = @transform_4, window_bounds = array<i64: 2, 128, 384>}, {pipeline_mode = #tpu.pipeline_mode<synchronous>, transform_indices = @transform_5, window_bounds = array<i64: 2, 1, 384>}, {pipeline_mode = #tpu.pipeline_mode<synchronous>, transform_indices = @transform_6, window_bounds = array<i64: 2, 128, 128>}, {pipeline_mode = #tpu.pipeline_mode<synchronous>, transform_indices = @transform_7, window_bounds = array<i64: 2, 1, 128>}, {pipeline_mode = #tpu.pipeline_mode<synchronous>, transform_indices = @transform_8, window_bounds = array<i64: 2, 128, 512>}, {pipeline_mode = #tpu.pipeline_mode<synchronous>, transform_indices = @transform_9, window_bounds = array<i64: 2, 1, 512>}, {pipeline_mode = #tpu.pipeline_mode<synchronous>, transform_indices = @transform_10, window_bounds = array<i64: 2, 512, 128>}, {pipeline_mode = #tpu.pipeline_mode<synchronous>, transform_indices = @transform_11, window_bounds = array<i64: 2, 1, 128>}, {pipeline_mode = #tpu.pipeline_mode<synchronous>, transform_indices = @transform_12, window_bounds = array<i64: 128, 1>}, {pipeline_mode = #tpu.pipeline_mode<synchronous>, transform_indices = @transform_13, window_bounds = array<i64: 1, 1>}, {transform_indices = @transform_14, window_bounds = array<i64: 8, 1>}]} {
    %c0 = arith.constant 0 : index
    %c0_0 = arith.constant 0 : index
    %c0_1 = arith.constant 0 : index
    %0 = vector.load %arg1[%c0, %c0_0, %c0_1] : memref<8x8x4xf32, #tpu.memory_space<vmem>>, vector<8x8x4xf32>
    %1 = vector.shape_cast %0 : vector<8x8x4xf32> to vector<64x4xf32>
    %c0_2 = arith.constant 0 : index
    %c0_3 = arith.constant 0 : index
    %2 = vector.load %arg2[%c0_2, %c0_3] : memref<4x128xf32, #tpu.memory_space<vmem>>, vector<4x128xf32>
    %cst = arith.constant dense<0.000000e+00> : vector<64x128xf32>
    %3 = tpu.matmul %1, %2, %cst {dimension_numbers = #tpu.dot_dimension_numbers<[1], [0], [0], [1], [0, 0, 1, 1], [], []>} : vector<64x4xf32>, vector<4x128xf32>, vector<64x128xf32> -> vector<64x128xf32>
    %c0_4 = arith.constant 0 : index
    %c0_5 = arith.constant 0 : index
    %4 = vector.load %arg3[%c0_4, %c0_5] : memref<1x128xf32, #tpu.memory_space<vmem>>, vector<1x128xf32>
    %5 = vector.broadcast %4 : vector<1x128xf32> to vector<64x128xf32>
    %6 = arith.addf %3, %5 : vector<64x128xf32>
    %7 = vector.shape_cast %6 : vector<64x128xf32> to vector<8x8x128xf32>
    %c0_6 = arith.constant 0 : index
    %c0_7 = arith.constant 0 : index
    %8 = vector.load %arg4[%c0_6, %c0_7] : memref<8x128xf32, #tpu.memory_space<vmem>>, vector<8x128xf32>
    %9 = vector.shape_cast %8 : vector<8x128xf32> to vector<1x8x128xf32>
    %10 = vector.broadcast %9 : vector<1x8x128xf32> to vector<8x8x128xf32>
    %11 = arith.addf %7, %10 : vector<8x8x128xf32>
    %12 = vector.shape_cast %11 : vector<8x8x128xf32> to vector<64x128xf32>
    %c0_8 = arith.constant 0 : index
    %c0_9 = arith.constant 0 : index
    %13 = vector.load %arg16[%c0_8, %c0_9] : memref<64x128xf32, #tpu.memory_space<vmem>>, vector<64x128xf32>
    tpu.vector_store %arg16[%c0_8, %c0_9], %12 {strides = array<i32>} : memref<64x128xf32, #tpu.memory_space<vmem>>, vector<64x128xf32>,
    %c0_i32 = arith.constant 0 : i32
    %c2_i32 = arith.constant 2 : i32
    %14 = arith.addi %c0_i32, %c2_i32 : i32
    %c1_i32 = arith.constant 1 : i32
    scf.for %arg17 = %c0_i32 to %14 step %c1_i32  : i32 {
      %c1_i32_20 = arith.constant 1 : i32
      %25 = arith.muli %arg17, %c1_i32_20 : i32
      %c0_i32_21 = arith.constant 0 : i32
      %26 = arith.addi %c0_i32_21, %25 : i32
      %c0_22 = arith.constant 0 : index
      %c0_23 = arith.constant 0 : index
      %27 = vector.load %arg16[%c0_22, %c0_23] : memref<64x128xf32, #tpu.memory_space<vmem>>, vector<64x128xf32>
      %28 = arith.index_cast %26 : i32 to index
      %c0_24 = arith.constant 0 : index
      %c0_25 = arith.constant 0 : index
      %29 = vector.load %arg5[%28, %c0_24, %c0_25] : memref<2x128x384xf32, #tpu.memory_space<vmem>>, vector<1x128x384xf32>
      %30 = vector.shape_cast %29 : vector<1x128x384xf32> to vector<128x384xf32>
      %cst_26 = arith.constant dense<0.000000e+00> : vector<64x384xf32>
      %31 = tpu.matmul %27, %30, %cst_26 {dimension_numbers = #tpu.dot_dimension_numbers<[1], [0], [0], [1], [0, 0, 1, 1], [], []>} : vector<64x128xf32>, vector<128x384xf32>, vector<64x384xf32> -> vector<64x384xf32>
      %32 = arith.index_cast %26 : i32 to index
      %c0_27 = arith.constant 0 : index
      %c0_28 = arith.constant 0 : index
      %33 = vector.load %arg6[%32, %c0_27, %c0_28] : memref<2x1x384xf32, #tpu.memory_space<vmem>>, vector<1x1x384xf32>
      %34 = vector.shape_cast %33 : vector<1x1x384xf32> to vector<1x384xf32>
      %35 = vector.broadcast %34 : vector<1x384xf32> to vector<64x384xf32>
      %36 = arith.addf %31, %35 : vector<64x384xf32>
      %37 = vector.extract_strided_slice %36 {offsets = [0, 0], sizes = [64, 32], strides = [1, 1]} : vector<64x384xf32> to vector<64x32xf32>
      %38 = vector.shape_cast %37 : vector<64x32xf32> to vector<8x8x32xf32>
      %39 = vector.extract_strided_slice %36 {offsets = [0, 128], sizes = [64, 32], strides = [1, 1]} : vector<64x384xf32> to vector<64x32xf32>
      %40 = vector.shape_cast %39 : vector<64x32xf32> to vector<8x8x32xf32>
      %41 = vector.extract_strided_slice %36 {offsets = [0, 256], sizes = [64, 32], strides = [1, 1]} : vector<64x384xf32> to vector<64x32xf32>
      %42 = vector.shape_cast %41 : vector<64x32xf32> to vector<8x8x32xf32>
      "tpu.trace_start"() <{level = 10 : i32, message = "bqd,bkd->bqk"}> : () -> ()
      %cst_29 = arith.constant dense<0.000000e+00> : vector<8x8x8xf32>
      %43 = tpu.matmul %38, %40, %cst_29 {dimension_numbers = #tpu.dot_dimension_numbers<[2], [2], [1], [1], [0, 0, 0, 1, 1, 1], [0], [0]>} : vector<8x8x32xf32>, vector<8x8x32xf32>, vector<8x8x8xf32> -> vector<8x8x8xf32>
      "tpu.trace_stop"() : () -> ()
      %cst_30 = arith.constant 0.176776692 : f32
      %44 = vector.broadcast %cst_30 : f32 to vector<8x8x8xf32>
      %45 = arith.mulf %43, %44 : vector<8x8x8xf32>
      %cst_31 = arith.constant dense<0xFF800000> : vector<8x8xf32>
      %46 = vector.multi_reduction <maximumf>, %45, %cst_31 [2] : vector<8x8x8xf32> to vector<8x8xf32>
      %47 = vector.shape_cast %46 : vector<8x8xf32> to vector<8x8x1xf32>
      %48 = vector.broadcast %47 : vector<8x8x1xf32> to vector<8x8x8xf32>
      %49 = arith.subf %45, %48 : vector<8x8x8xf32>
      %50 = math.exp %49 : vector<8x8x8xf32>
      %cst_32 = arith.constant dense<0.000000e+00> : vector<8x8xf32>
      %51 = vector.multi_reduction <add>, %50, %cst_32 [2] : vector<8x8x8xf32> to vector<8x8xf32>
      %52 = vector.shape_cast %51 : vector<8x8xf32> to vector<8x8x1xf32>
      %53 = vector.broadcast %52 : vector<8x8x1xf32> to vector<8x8x8xf32>
      %54 = arith.divf %50, %53 : vector<8x8x8xf32>
      "tpu.trace_start"() <{level = 10 : i32, message = "bqk,bkd->bqd"}> : () -> ()
      %cst_33 = arith.constant dense<0.000000e+00> : vector<8x8x32xf32>
      %55 = tpu.matmul %54, %42, %cst_33 {dimension_numbers = #tpu.dot_dimension_numbers<[2], [1], [1], [2], [0, 0, 0, 1, 1, 2], [0], [0]>} : vector<8x8x8xf32>, vector<8x8x32xf32>, vector<8x8x32xf32> -> vector<8x8x32xf32>
      "tpu.trace_stop"() : () -> ()
      %56 = vector.shape_cast %55 : vector<8x8x32xf32> to vector<64x32xf32>
      %57 = vector.extract_strided_slice %36 {offsets = [0, 32], sizes = [64, 32], strides = [1, 1]} : vector<64x384xf32> to vector<64x32xf32>
      %58 = vector.shape_cast %57 : vector<64x32xf32> to vector<8x8x32xf32>
      %59 = vector.extract_strided_slice %36 {offsets = [0, 160], sizes = [64, 32], strides = [1, 1]} : vector<64x384xf32> to vector<64x32xf32>
      %60 = vector.shape_cast %59 : vector<64x32xf32> to vector<8x8x32xf32>
      %61 = vector.extract_strided_slice %36 {offsets = [0, 288], sizes = [64, 32], strides = [1, 1]} : vector<64x384xf32> to vector<64x32xf32>
      %62 = vector.shape_cast %61 : vector<64x32xf32> to vector<8x8x32xf32>
      "tpu.trace_start"() <{level = 10 : i32, message = "bqd,bkd->bqk"}> : () -> ()
      %cst_34 = arith.constant dense<0.000000e+00> : vector<8x8x8xf32>
      %63 = tpu.matmul %58, %60, %cst_34 {dimension_numbers = #tpu.dot_dimension_numbers<[2], [2], [1], [1], [0, 0, 0, 1, 1, 1], [0], [0]>} : vector<8x8x32xf32>, vector<8x8x32xf32>, vector<8x8x8xf32> -> vector<8x8x8xf32>
      "tpu.trace_stop"() : () -> ()
      %cst_35 = arith.constant 0.176776692 : f32
      %64 = vector.broadcast %cst_35 : f32 to vector<8x8x8xf32>
      %65 = arith.mulf %63, %64 : vector<8x8x8xf32>
      %cst_36 = arith.constant dense<0xFF800000> : vector<8x8xf32>
      %66 = vector.multi_reduction <maximumf>, %65, %cst_36 [2] : vector<8x8x8xf32> to vector<8x8xf32>
      %67 = vector.shape_cast %66 : vector<8x8xf32> to vector<8x8x1xf32>
      %68 = vector.broadcast %67 : vector<8x8x1xf32> to vector<8x8x8xf32>
      %69 = arith.subf %65, %68 : vector<8x8x8xf32>
      %70 = math.exp %69 : vector<8x8x8xf32>
      %cst_37 = arith.constant dense<0.000000e+00> : vector<8x8xf32>
      %71 = vector.multi_reduction <add>, %70, %cst_37 [2] : vector<8x8x8xf32> to vector<8x8xf32>
      %72 = vector.shape_cast %71 : vector<8x8xf32> to vector<8x8x1xf32>
      %73 = vector.broadcast %72 : vector<8x8x1xf32> to vector<8x8x8xf32>
      %74 = arith.divf %70, %73 : vector<8x8x8xf32>
      "tpu.trace_start"() <{level = 10 : i32, message = "bqk,bkd->bqd"}> : () -> ()
      %cst_38 = arith.constant dense<0.000000e+00> : vector<8x8x32xf32>
      %75 = tpu.matmul %74, %62, %cst_38 {dimension_numbers = #tpu.dot_dimension_numbers<[2], [1], [1], [2], [0, 0, 0, 1, 1, 2], [0], [0]>} : vector<8x8x8xf32>, vector<8x8x32xf32>, vector<8x8x32xf32> -> vector<8x8x32xf32>
      "tpu.trace_stop"() : () -> ()
      %76 = vector.shape_cast %75 : vector<8x8x32xf32> to vector<64x32xf32>
      %77 = vector.extract_strided_slice %36 {offsets = [0, 64], sizes = [64, 32], strides = [1, 1]} : vector<64x384xf32> to vector<64x32xf32>
      %78 = vector.shape_cast %77 : vector<64x32xf32> to vector<8x8x32xf32>
      %79 = vector.extract_strided_slice %36 {offsets = [0, 192], sizes = [64, 32], strides = [1, 1]} : vector<64x384xf32> to vector<64x32xf32>
      %80 = vector.shape_cast %79 : vector<64x32xf32> to vector<8x8x32xf32>
      %81 = vector.extract_strided_slice %36 {offsets = [0, 320], sizes = [64, 32], strides = [1, 1]} : vector<64x384xf32> to vector<64x32xf32>
      %82 = vector.shape_cast %81 : vector<64x32xf32> to vector<8x8x32xf32>
      "tpu.trace_start"() <{level = 10 : i32, message = "bqd,bkd->bqk"}> : () -> ()
      %cst_39 = arith.constant dense<0.000000e+00> : vector<8x8x8xf32>
      %83 = tpu.matmul %78, %80, %cst_39 {dimension_numbers = #tpu.dot_dimension_numbers<[2], [2], [1], [1], [0, 0, 0, 1, 1, 1], [0], [0]>} : vector<8x8x32xf32>, vector<8x8x32xf32>, vector<8x8x8xf32> -> vector<8x8x8xf32>
      "tpu.trace_stop"() : () -> ()
      %cst_40 = arith.constant 0.176776692 : f32
      %84 = vector.broadcast %cst_40 : f32 to vector<8x8x8xf32>
      %85 = arith.mulf %83, %84 : vector<8x8x8xf32>
      %cst_41 = arith.constant dense<0xFF800000> : vector<8x8xf32>
      %86 = vector.multi_reduction <maximumf>, %85, %cst_41 [2] : vector<8x8x8xf32> to vector<8x8xf32>
      %87 = vector.shape_cast %86 : vector<8x8xf32> to vector<8x8x1xf32>
      %88 = vector.broadcast %87 : vector<8x8x1xf32> to vector<8x8x8xf32>
      %89 = arith.subf %85, %88 : vector<8x8x8xf32>
      %90 = math.exp %89 : vector<8x8x8xf32>
      %cst_42 = arith.constant dense<0.000000e+00> : vector<8x8xf32>
      %91 = vector.multi_reduction <add>, %90, %cst_42 [2] : vector<8x8x8xf32> to vector<8x8xf32>
      %92 = vector.shape_cast %91 : vector<8x8xf32> to vector<8x8x1xf32>
      %93 = vector.broadcast %92 : vector<8x8x1xf32> to vector<8x8x8xf32>
      %94 = arith.divf %90, %93 : vector<8x8x8xf32>
      "tpu.trace_start"() <{level = 10 : i32, message = "bqk,bkd->bqd"}> : () -> ()
      %cst_43 = arith.constant dense<0.000000e+00> : vector<8x8x32xf32>
      %95 = tpu.matmul %94, %82, %cst_43 {dimension_numbers = #tpu.dot_dimension_numbers<[2], [1], [1], [2], [0, 0, 0, 1, 1, 2], [0], [0]>} : vector<8x8x8xf32>, vector<8x8x32xf32>, vector<8x8x32xf32> -> vector<8x8x32xf32>
      "tpu.trace_stop"() : () -> ()
      %96 = vector.shape_cast %95 : vector<8x8x32xf32> to vector<64x32xf32>
      %97 = vector.extract_strided_slice %36 {offsets = [0, 96], sizes = [64, 32], strides = [1, 1]} : vector<64x384xf32> to vector<64x32xf32>
      %98 = vector.shape_cast %97 : vector<64x32xf32> to vector<8x8x32xf32>
      %99 = vector.extract_strided_slice %36 {offsets = [0, 224], sizes = [64, 32], strides = [1, 1]} : vector<64x384xf32> to vector<64x32xf32>
      %100 = vector.shape_cast %99 : vector<64x32xf32> to vector<8x8x32xf32>
      %101 = vector.extract_strided_slice %36 {offsets = [0, 352], sizes = [64, 32], strides = [1, 1]} : vector<64x384xf32> to vector<64x32xf32>
      %102 = vector.shape_cast %101 : vector<64x32xf32> to vector<8x8x32xf32>
      "tpu.trace_start"() <{level = 10 : i32, message = "bqd,bkd->bqk"}> : () -> ()
      %cst_44 = arith.constant dense<0.000000e+00> : vector<8x8x8xf32>
      %103 = tpu.matmul %98, %100, %cst_44 {dimension_numbers = #tpu.dot_dimension_numbers<[2], [2], [1], [1], [0, 0, 0, 1, 1, 1], [0], [0]>} : vector<8x8x32xf32>, vector<8x8x32xf32>, vector<8x8x8xf32> -> vector<8x8x8xf32>
      "tpu.trace_stop"() : () -> ()
      %cst_45 = arith.constant 0.176776692 : f32
      %104 = vector.broadcast %cst_45 : f32 to vector<8x8x8xf32>
      %105 = arith.mulf %103, %104 : vector<8x8x8xf32>
      %cst_46 = arith.constant dense<0xFF800000> : vector<8x8xf32>
      %106 = vector.multi_reduction <maximumf>, %105, %cst_46 [2] : vector<8x8x8xf32> to vector<8x8xf32>
      %107 = vector.shape_cast %106 : vector<8x8xf32> to vector<8x8x1xf32>
      %108 = vector.broadcast %107 : vector<8x8x1xf32> to vector<8x8x8xf32>
      %109 = arith.subf %105, %108 : vector<8x8x8xf32>
      %110 = math.exp %109 : vector<8x8x8xf32>
      %cst_47 = arith.constant dense<0.000000e+00> : vector<8x8xf32>
      %111 = vector.multi_reduction <add>, %110, %cst_47 [2] : vector<8x8x8xf32> to vector<8x8xf32>
      %112 = vector.shape_cast %111 : vector<8x8xf32> to vector<8x8x1xf32>
      %113 = vector.broadcast %112 : vector<8x8x1xf32> to vector<8x8x8xf32>
      %114 = arith.divf %110, %113 : vector<8x8x8xf32>
      "tpu.trace_start"() <{level = 10 : i32, message = "bqk,bkd->bqd"}> : () -> ()
      %cst_48 = arith.constant dense<0.000000e+00> : vector<8x8x32xf32>
      %115 = tpu.matmul %114, %102, %cst_48 {dimension_numbers = #tpu.dot_dimension_numbers<[2], [1], [1], [2], [0, 0, 0, 1, 1, 2], [0], [0]>} : vector<8x8x8xf32>, vector<8x8x32xf32>, vector<8x8x32xf32> -> vector<8x8x32xf32>
      "tpu.trace_stop"() : () -> ()
      %116 = vector.shape_cast %115 : vector<8x8x32xf32> to vector<64x32xf32>
      %117 = tpu.concatenate %56, %76, %96, %116 in 1 : vector<64x32xf32>, vector<64x32xf32>, vector<64x32xf32>, vector<64x32xf32> -> vector<64x128xf32>
      %118 = arith.index_cast %26 : i32 to index
      %c0_49 = arith.constant 0 : index
      %c0_50 = arith.constant 0 : index
      %119 = vector.load %arg7[%118, %c0_49, %c0_50] : memref<2x128x128xf32, #tpu.memory_space<vmem>>, vector<1x128x128xf32>
      %120 = vector.shape_cast %119 : vector<1x128x128xf32> to vector<128x128xf32>
      %cst_51 = arith.constant dense<0.000000e+00> : vector<64x128xf32>
      %121 = tpu.matmul %117, %120, %cst_51 {dimension_numbers = #tpu.dot_dimension_numbers<[1], [0], [0], [1], [0, 0, 1, 1], [], []>} : vector<64x128xf32>, vector<128x128xf32>, vector<64x128xf32> -> vector<64x128xf32>
      %122 = arith.index_cast %26 : i32 to index
      %c0_52 = arith.constant 0 : index
      %c0_53 = arith.constant 0 : index
      %123 = vector.load %arg8[%122, %c0_52, %c0_53] : memref<2x1x128xf32, #tpu.memory_space<vmem>>, vector<1x1x128xf32>
      %124 = vector.shape_cast %123 : vector<1x1x128xf32> to vector<1x128xf32>
      %125 = vector.broadcast %124 : vector<1x128xf32> to vector<64x128xf32>
      %126 = arith.addf %121, %125 : vector<64x128xf32>
      %127 = arith.addf %27, %126 : vector<64x128xf32>
      %cst_54 = arith.constant dense<0.000000e+00> : vector<64xf32>
      %128 = vector.multi_reduction <add>, %127, %cst_54 [1] : vector<64x128xf32> to vector<64xf32>
      %129 = vector.shape_cast %128 : vector<64xf32> to vector<64x1xf32>
      %cst_55 = arith.constant 1.280000e+02 : f32
      %130 = vector.broadcast %cst_55 : f32 to vector<64x1xf32>
      %131 = arith.divf %129, %130 : vector<64x1xf32>
      %132 = vector.broadcast %131 : vector<64x1xf32> to vector<64x128xf32>
      %133 = arith.subf %127, %132 : vector<64x128xf32>
      %134 = arith.mulf %133, %133 : vector<64x128xf32>
      %cst_56 = arith.constant dense<0.000000e+00> : vector<64xf32>
      %135 = vector.multi_reduction <add>, %134, %cst_56 [1] : vector<64x128xf32> to vector<64xf32>
      %136 = vector.shape_cast %135 : vector<64xf32> to vector<64x1xf32>
      %cst_57 = arith.constant 1.280000e+02 : f32
      %137 = vector.broadcast %cst_57 : f32 to vector<64x1xf32>
      %138 = arith.divf %136, %137 : vector<64x1xf32>
      %139 = vector.broadcast %131 : vector<64x1xf32> to vector<64x128xf32>
      %140 = arith.subf %127, %139 : vector<64x128xf32>
      %cst_58 = arith.constant 9.99999997E-7 : f32
      %141 = vector.broadcast %cst_58 : f32 to vector<64x1xf32>
      %142 = arith.addf %138, %141 : vector<64x1xf32>
      %143 = math.rsqrt %142 : vector<64x1xf32>
      %144 = vector.broadcast %143 : vector<64x1xf32> to vector<64x128xf32>
      %145 = arith.mulf %140, %144 : vector<64x128xf32>
      %146 = arith.index_cast %26 : i32 to index
      %c0_59 = arith.constant 0 : index
      %c0_60 = arith.constant 0 : index
      %147 = vector.load %arg9[%146, %c0_59, %c0_60] : memref<2x128x512xf32, #tpu.memory_space<vmem>>, vector<1x128x512xf32>
      %148 = vector.shape_cast %147 : vector<1x128x512xf32> to vector<128x512xf32>
      %cst_61 = arith.constant dense<0.000000e+00> : vector<64x512xf32>
      %149 = tpu.matmul %145, %148, %cst_61 {dimension_numbers = #tpu.dot_dimension_numbers<[1], [0], [0], [1], [0, 0, 1, 1], [], []>} : vector<64x128xf32>, vector<128x512xf32>, vector<64x512xf32> -> vector<64x512xf32>
      %150 = arith.index_cast %26 : i32 to index
      %c0_62 = arith.constant 0 : index
      %c0_63 = arith.constant 0 : index
      %151 = vector.load %arg10[%150, %c0_62, %c0_63] : memref<2x1x512xf32, #tpu.memory_space<vmem>>, vector<1x1x512xf32>
      %152 = vector.shape_cast %151 : vector<1x1x512xf32> to vector<1x512xf32>
      %153 = vector.broadcast %152 : vector<1x512xf32> to vector<64x512xf32>
      %154 = arith.addf %149, %153 : vector<64x512xf32>
      %cst_64 = arith.constant 5.000000e-01 : f32
      %155 = vector.broadcast %cst_64 : f32 to vector<64x512xf32>
      %156 = arith.mulf %155, %154 : vector<64x512xf32>
      %cst_65 = arith.constant 4.471500e-02 : f32
      %157 = vector.broadcast %cst_65 : f32 to vector<64x512xf32>
      %158 = arith.mulf %157, %154 : vector<64x512xf32>
      %159 = arith.mulf %158, %154 : vector<64x512xf32>
      %160 = arith.mulf %159, %154 : vector<64x512xf32>
      %161 = arith.addf %154, %160 : vector<64x512xf32>
      %cst_66 = arith.constant 0.797884583 : f32
      %162 = vector.broadcast %cst_66 : f32 to vector<64x512xf32>
      %163 = arith.mulf %162, %161 : vector<64x512xf32>
      %164 = math.tanh %163 : vector<64x512xf32>
      %cst_67 = arith.constant 1.000000e+00 : f32
      %165 = vector.broadcast %cst_67 : f32 to vector<64x512xf32>
      %166 = arith.addf %165, %164 : vector<64x512xf32>
      %167 = arith.mulf %156, %166 : vector<64x512xf32>
      %168 = arith.index_cast %26 : i32 to index
      %c0_68 = arith.constant 0 : index
      %c0_69 = arith.constant 0 : index
      %169 = vector.load %arg11[%168, %c0_68, %c0_69] : memref<2x512x128xf32, #tpu.memory_space<vmem>>, vector<1x512x128xf32>
      %170 = vector.shape_cast %169 : vector<1x512x128xf32> to vector<512x128xf32>
      %cst_70 = arith.constant dense<0.000000e+00> : vector<64x128xf32>
      %171 = tpu.matmul %167, %170, %cst_70 {dimension_numbers = #tpu.dot_dimension_numbers<[1], [0], [0], [1], [0, 0, 1, 1], [], []>} : vector<64x512xf32>, vector<512x128xf32>, vector<64x128xf32> -> vector<64x128xf32>
      %172 = arith.index_cast %26 : i32 to index
      %c0_71 = arith.constant 0 : index
      %c0_72 = arith.constant 0 : index
      %173 = vector.load %arg12[%172, %c0_71, %c0_72] : memref<2x1x128xf32, #tpu.memory_space<vmem>>, vector<1x1x128xf32>
      %174 = vector.shape_cast %173 : vector<1x1x128xf32> to vector<1x128xf32>
      %175 = vector.broadcast %174 : vector<1x128xf32> to vector<64x128xf32>
      %176 = arith.addf %171, %175 : vector<64x128xf32>
      %177 = arith.addf %145, %176 : vector<64x128xf32>
      %cst_73 = arith.constant dense<0.000000e+00> : vector<64xf32>
      %178 = vector.multi_reduction <add>, %177, %cst_73 [1] : vector<64x128xf32> to vector<64xf32>
      %179 = vector.shape_cast %178 : vector<64xf32> to vector<64x1xf32>
      %cst_74 = arith.constant 1.280000e+02 : f32
      %180 = vector.broadcast %cst_74 : f32 to vector<64x1xf32>
      %181 = arith.divf %179, %180 : vector<64x1xf32>
      %182 = vector.broadcast %181 : vector<64x1xf32> to vector<64x128xf32>
      %183 = arith.subf %177, %182 : vector<64x128xf32>
      %184 = arith.mulf %183, %183 : vector<64x128xf32>
      %cst_75 = arith.constant dense<0.000000e+00> : vector<64xf32>
      %185 = vector.multi_reduction <add>, %184, %cst_75 [1] : vector<64x128xf32> to vector<64xf32>
      %186 = vector.shape_cast %185 : vector<64xf32> to vector<64x1xf32>
      %cst_76 = arith.constant 1.280000e+02 : f32
      %187 = vector.broadcast %cst_76 : f32 to vector<64x1xf32>
      %188 = arith.divf %186, %187 : vector<64x1xf32>
      %189 = vector.broadcast %181 : vector<64x1xf32> to vector<64x128xf32>
      %190 = arith.subf %177, %189 : vector<64x128xf32>
      %cst_77 = arith.constant 9.99999997E-7 : f32
      %191 = vector.broadcast %cst_77 : f32 to vector<64x1xf32>
      %192 = arith.addf %188, %191 : vector<64x1xf32>
      %193 = math.rsqrt %192 : vector<64x1xf32>
      %194 = vector.broadcast %193 : vector<64x1xf32> to vector<64x128xf32>
      %195 = arith.mulf %190, %194 : vector<64x128xf32>
      %c0_78 = arith.constant 0 : index
      %c0_79 = arith.constant 0 : index
      %196 = vector.load %arg16[%c0_78, %c0_79] : memref<64x128xf32, #tpu.memory_space<vmem>>, vector<64x128xf32>
      tpu.vector_store %arg16[%c0_78, %c0_79], %195 {strides = array<i32>} : memref<64x128xf32, #tpu.memory_space<vmem>>, vector<64x128xf32>,
    }
    %c2_i32_10 = arith.constant 2 : i32
    %c0_11 = arith.constant 0 : index
    %c0_12 = arith.constant 0 : index
    %15 = vector.load %arg16[%c0_11, %c0_12] : memref<64x128xf32, #tpu.memory_space<vmem>>, vector<64x128xf32>
    %16 = vector.shape_cast %15 : vector<64x128xf32> to vector<8x8x128xf32>
    %17 = vector.extract_strided_slice %16 {offsets = [0, 0, 0], sizes = [8, 1, 128], strides = [1, 1, 1]} : vector<8x8x128xf32> to vector<8x1x128xf32>
    %18 = vector.shape_cast %17 : vector<8x1x128xf32> to vector<8x128xf32>
    %c0_13 = arith.constant 0 : index
    %c0_14 = arith.constant 0 : index
    %19 = vector.load %arg13[%c0_13, %c0_14] : memref<128x1xf32, #tpu.memory_space<vmem>>, vector<128x1xf32>
    %cst_15 = arith.constant dense<0.000000e+00> : vector<8x1xf32>
    %20 = tpu.matmul %18, %19, %cst_15 {dimension_numbers = #tpu.dot_dimension_numbers<[1], [0], [0], [1], [0, 0, 1, 1], [], []>} : vector<8x128xf32>, vector<128x1xf32>, vector<8x1xf32> -> vector<8x1xf32>
    %c0_16 = arith.constant 0 : index
    %c0_17 = arith.constant 0 : index
    %21 = vector.load %arg14[%c0_16, %c0_17] : memref<1x1xf32, #tpu.memory_space<vmem>>, vector<1x1xf32>
    %22 = vector.broadcast %21 : vector<1x1xf32> to vector<8x1xf32>
    %23 = arith.addf %20, %22 : vector<8x1xf32>
    %c0_18 = arith.constant 0 : index
    %c0_19 = arith.constant 0 : index
    %24 = vector.load %arg15[%c0_18, %c0_19] : memref<8x1xf32, #tpu.memory_space<vmem>>, vector<8x1xf32>
    tpu.vector_store %arg15[%c0_18, %c0_19], %23 {strides = array<i32>} : memref<8x1xf32, #tpu.memory_space<vmem>>, vector<8x1xf32>,
    return
  }
  func.func @transform_0(%arg0: i32) -> (i32, i32, i32) {
    %c0_i32 = arith.constant 0 : i32
    %c0_i32_0 = arith.constant 0 : i32
    %c0_i32_1 = arith.constant 0 : i32
    return %arg0, %c0_i32, %c0_i32_0 : i32, i32, i32
  }
  func.func @transform_1(%arg0: i32) -> (i32, i32) {
    %c0_i32 = arith.constant 0 : i32
    %c0_i32_0 = arith.constant 0 : i32
    %c0_i32_1 = arith.constant 0 : i32
    return %c0_i32, %c0_i32_0 : i32, i32
  }
  func.func @transform_2(%arg0: i32) -> (i32, i32) {
    %c0_i32 = arith.constant 0 : i32
    %c0_i32_0 = arith.constant 0 : i32
    %c0_i32_1 = arith.constant 0 : i32
    return %c0_i32, %c0_i32_0 : i32, i32
  }
  func.func @transform_3(%arg0: i32) -> (i32, i32) {
    %c0_i32 = arith.constant 0 : i32
    %c0_i32_0 = arith.constant 0 : i32
    %c0_i32_1 = arith.constant 0 : i32
    return %c0_i32, %c0_i32_0 : i32, i32
  }
  func.func @transform_4(%arg0: i32) -> (i32, i32, i32) {
    %c0_i32 = arith.constant 0 : i32
    %c0_i32_0 = arith.constant 0 : i32
    %c0_i32_1 = arith.constant 0 : i32
    %c0_i32_2 = arith.constant 0 : i32
    return %c0_i32, %c0_i32_0, %c0_i32_1 : i32, i32, i32
  }
  func.func @transform_5(%arg0: i32) -> (i32, i32, i32) {
    %c0_i32 = arith.constant 0 : i32
    %c0_i32_0 = arith.constant 0 : i32
    %c0_i32_1 = arith.constant 0 : i32
    %c0_i32_2 = arith.constant 0 : i32
    return %c0_i32, %c0_i32_0, %c0_i32_1 : i32, i32, i32
  }
  func.func @transform_6(%arg0: i32) -> (i32, i32, i32) {
    %c0_i32 = arith.constant 0 : i32
    %c0_i32_0 = arith.constant 0 : i32
    %c0_i32_1 = arith.constant 0 : i32
    %c0_i32_2 = arith.constant 0 : i32
    return %c0_i32, %c0_i32_0, %c0_i32_1 : i32, i32, i32
  }
  func.func @transform_7(%arg0: i32) -> (i32, i32, i32) {
    %c0_i32 = arith.constant 0 : i32
    %c0_i32_0 = arith.constant 0 : i32
    %c0_i32_1 = arith.constant 0 : i32
    %c0_i32_2 = arith.constant 0 : i32
    return %c0_i32, %c0_i32_0, %c0_i32_1 : i32, i32, i32
  }
  func.func @transform_8(%arg0: i32) -> (i32, i32, i32) {
    %c0_i32 = arith.constant 0 : i32
    %c0_i32_0 = arith.constant 0 : i32
    %c0_i32_1 = arith.constant 0 : i32
    %c0_i32_2 = arith.constant 0 : i32
    return %c0_i32, %c0_i32_0, %c0_i32_1 : i32, i32, i32
  }
  func.func @transform_9(%arg0: i32) -> (i32, i32, i32) {
    %c0_i32 = arith.constant 0 : i32
    %c0_i32_0 = arith.constant 0 : i32
    %c0_i32_1 = arith.constant 0 : i32
    %c0_i32_2 = arith.constant 0 : i32
    return %c0_i32, %c0_i32_0, %c0_i32_1 : i32, i32, i32
  }
  func.func @transform_10(%arg0: i32) -> (i32, i32, i32) {
    %c0_i32 = arith.constant 0 : i32
    %c0_i32_0 = arith.constant 0 : i32
    %c0_i32_1 = arith.constant 0 : i32
    %c0_i32_2 = arith.constant 0 : i32
    return %c0_i32, %c0_i32_0, %c0_i32_1 : i32, i32, i32
  }
  func.func @transform_11(%arg0: i32) -> (i32, i32, i32) {
    %c0_i32 = arith.constant 0 : i32
    %c0_i32_0 = arith.constant 0 : i32
    %c0_i32_1 = arith.constant 0 : i32
    %c0_i32_2 = arith.constant 0 : i32
    return %c0_i32, %c0_i32_0, %c0_i32_1 : i32, i32, i32
  }
  func.func @transform_12(%arg0: i32) -> (i32, i32) {
    %c0_i32 = arith.constant 0 : i32
    %c0_i32_0 = arith.constant 0 : i32
    %c0_i32_1 = arith.constant 0 : i32
    return %c0_i32, %c0_i32_0 : i32, i32
  }
  func.func @transform_13(%arg0: i32) -> (i32, i32) {
    %c0_i32 = arith.constant 0 : i32
    %c0_i32_0 = arith.constant 0 : i32
    %c0_i32_1 = arith.constant 0 : i32
    return %c0_i32, %c0_i32_0 : i32, i32
  }
  func.func @transform_14(%arg0: i32) -> (i32, i32) {
    %c0_i32 = arith.constant 0 : i32
    %c0_i32_0 = arith.constant 0 : i32
    return %arg0, %c0_i32 : i32, i32
  }
}

</mosaic_0001>

<bundles_post_ra>
// kernel: tpu_custom_call.1
= control target key start
LH: loop header
LB: loop body
LE: loop exit
PB: predicated region body
PF: predicated region fallthrough
CT: control target
= control target key end

     0   :  { %s7140_s0 = inlined_call_operand.vmem [shape: f32[16,8,4], index: 0, kind: input, shape index: {}]   ;;  %s7141_s1 = inlined_call_operand.vmem [shape: f32[4,128], index: 1, kind: input, shape index: {}]   ;;  %s7142_s2 = inlined_call_operand.vmem [shape: f32[1,128], index: 2, kind: input, shape index: {}]   ;;  %s7143_s3 = inlined_call_operand.vmem [shape: f32[8,128], index: 3, kind: input, shape index: {}]   ;;  %s7144_s4 = inlined_call_operand.hbm [shape: f32[2,128,384], index: 4, kind: input, shape index: {}]   ;;  %s7145_s5 = inlined_call_operand.vmem [shape: f32[2,1,384], index: 5, kind: input, shape index: {}]   ;;  %s7146_s6 = inlined_call_operand.vmem [shape: f32[2,128,128], index: 6, kind: input, shape index: {}]   ;;  %s7147_s7 = inlined_call_operand.vmem [shape: f32[2,1,128], index: 7, kind: input, shape index: {}]   ;;  %s7148_s8 = inlined_call_operand.hbm [shape: f32[2,128,512], index: 8, kind: input, shape index: {}]   ;;  %s7149_s9 = inlined_call_operand.vmem [shape: f32[2,1,512], index: 9, kind: input, shape index: {}]   ;;  %s7150_s10 = inlined_call_operand.hbm [shape: f32[2,512,128], index: 10, kind: input, shape index: {}]   ;;  %s7151_s11 = inlined_call_operand.vmem [shape: f32[2,1,128], index: 11, kind: input, shape index: {}]   ;;  %s7152_s12 = inlined_call_operand.vmem [shape: f32[128,1], index: 12, kind: input, shape index: {}]   ;;  %s7153_s13 = inlined_call_operand.<no memory space> [shape: f32[1,1], index: 13, kind: input, shape index: {}]   ;;  %s7154_s14 = inlined_call_operand.vmem [shape: f32[16,1], index: 14, kind: output, shape index: {}]  }
   0x1   :  { %7156 = sst [smem:[#allocation17_spill]] %s7144_s4  ;;  %v19_v0 = vstv %s7153_s13 }
   0x2   :  { %7157 = sst [smem:[#allocation18_spill]] %s7148_s8  ;;  %20 = vst [vmem:[#allocation3] sm:$0x1] %v19_v0 }
   0x3   :  { %21 = vsyncpa [#allocation5], 0 }
   0x4   :  { %22 = vsyncpa [#allocation7], 0  ;;  %s5535_s15 = smov 0  }
   0x5 LB: > { %7158 = sst [smem:[#allocation11_spill]] %s5438_s15  ;;  %s5544_s19 = sadd.s32 4294967295, %s5438_s15   ;;  %s5438_s15 = sphi %s5535_s15, %s28_s15  }
   0x6   : > { %s7159_s8 = sld [smem:[#allocation18_spill]]  ;;  %p4804_p0 = scmp.ge.s32.totalorder %s5438_s15, 1 }
   0x7   : > { %p358_p1 = scmp.lt.s32.totalorder %s5438_s15, 3  ;;  %p4972_p2 = scmp.eq.s32.totalorder %s5544_s19, 0 }
   0x8   : > { %s5444_s20 = smov [#allocation6]   ;;  %s7161_s4 = sld [smem:[#allocation17_spill]] }
   0x9   : > { %p5549_p3 = pnand %p4804_p0, %p358_p1  ;;  %s403_s21 = sshll.u32 %s5444_s20, 4  ;;  %s404_s21 = int_to_ptr.vmem [resolvable:$true] %s403_s21 }
   0xa   : > { %s5445_s26 = smov [#allocation4]   ;;  %s5446_s28 = smov 512  }
   0xb   : > { %p4962_p4 = pneg %p5549_p3  ;;  %s380_s27 = sshll.u32 %s5445_s26, 4  ;;  %s381_s27 = int_to_ptr.vmem [resolvable:$true] %s380_s27 }
   0xc   : > { %s401_s18 = sshll.u32 %s7159_s8, 4  ;;  %s5447_s29 = smov 32   ;;  %s402_s18 = int_to_ptr.hbm [resolvable:$true] %s401_s18 }
   0xd   : > { %p5560_p5 = pnand %p4972_p2, %p4962_p4  ;;  %s418_s17 = sshll.u32 %s7150_s10, 4  ;;  %s419_s17 = int_to_ptr.hbm [resolvable:$true] %s418_s17 }
   0xe   : > { %s378_s24 = sshll.u32 %s7161_s4, 4  ;;  %s5448_s20 = smov 384   ;;  %s379_s24 = int_to_ptr.hbm [resolvable:$true] %s378_s24 }
   0xf   : > { %4968 = dma.hbm_to_vmem [thread:$0]  (!%p5560_p5), %s402_s18, 16384, %s404_s21, [#allocation7], %s5446_s28, %s5446_s28, %s5447_s29  }
  0x10   : > { %s5449_s22 = smov 24   ;;  %s5450_s23 = smov [#allocation8]  }
  0x11   : > { %4965 = dma.hbm_to_vmem [thread:$0]  (!%p5560_p5), %s379_s24, 12288, %s381_s27, [#allocation5], %s5448_s20, %s5448_s20, %s5449_s22  }
  0x12   : > { %s420_s4 = sshll.u32 %s5450_s23, 4  ;;  %s5451_s8 = smov 128   ;;  %s421_s4 = int_to_ptr.vmem [resolvable:$true] %s420_s4 }
  0x13   : > { %s5452_s15 = smov 8   ;;  %454 = sbr.rel (%p5549_p3) target bundleno = 3749 (0xea5), region = 76 }
  0x14   : > { %4971 = dma.hbm_to_vmem [thread:$0]  (!%p5560_p5), %s419_s17, 16384, %s421_s4, [#allocation7], %s5451_s8, %s5451_s8, %s5452_s15  }
  0x18   : > { %5429 = dma.done.wait (%p4972_p2), [#allocation5], 12288  }
  0x19   : > { %5431 = vsyncadd (%p4972_p2), [#allocation5], 4294955008 }
  0x1a   : > { %5433 = dma.done.wait (%p4972_p2), [#allocation7], 32768  }
  0x1b   : > { %5435 = vsyncadd (%p4972_p2), [#allocation7], 4294934528  ;;  %s4813_s18 = sshll.u32 %s5544_s19, 3  ;;  %p516_p6 = scmp.lt.s32.totalorder %s5544_s19, 1  ;;  %vm558_vm0 = vcmask 1043456   ;;  %vm533_vm1 = vcmask 31744  }
  0x1c   : > { %p511_p7 = scmp.lt.s32.totalorder %s4813_s18, 15  ;;  %v528_v1 = vld [vmem:[%s7141_s1] sm:$0xf]  ;;  %s5611_s17 = smov 0  }
  0x1d   : > { %s7179_s19 = smov (!%p516_p6, %s5544_s19), 1  ;;  %4932 = vmatpush.msk.msra.mxu2 %vm558_vm0, %v528_v1  ;;  %4933 = vmatpush.msk.msra.mxu3 %vm558_vm0, %v528_v1  ;;  %v5007_v10 = vld [vmem:[%s7142_s2] ss:$0 sm:$0xff] }
  0x1e   : > { %s7181_s18 = smov (!%p511_p7, %s4813_s18), 15  ;;  %s4815_s4 = sshll.u32 %s7179_s19, 3  ;;  %4816 = vmatpush.msk.msra.mxu0 %vm558_vm0, %v528_v1  ;;  %4931 = vmatpush.msk.msra.mxu1 %vm558_vm0, %v528_v1  ;;  %v603_v12 = vld [vmem:[%s7143_s3] sm:$0xff] }
  0x1f   : > { %s4814_s8 = sshll.u32 %s7181_s18, 3  ;;  %s5589_s21 = scalar_lea.vmem %s7154_s14, %s4815_s4 }
  0x20   : > { %s514_s26 = scalar_lea.vmem %s7140_s0, %s4814_s8 }
  0x21   : > { %v524_v2 = vld [vmem:[%s514_s26 + $0x20] sm:$0xff]  ;;  %v526_v3 = vld [vmem:[%s514_s26 + $0x30] sm:$0xff]  ;;  %v525_v6 = vld [vmem:[%s514_s26 + $0x28] sm:$0xff] }
  0x22   : > { %v520_v4 = vld [vmem:[%s514_s26] sm:$0xff]  ;;  %v522_v5 = vld [vmem:[%s514_s26 + $0x10] sm:$0xff]  ;;  %4821 = vmatmul.msk.f32.vlgmr.msra.gmra.mxu2 %vm533_vm1, %v524_v2  ;;  %4823 = vmatmul.msk.f32.vlgmr.msra.gmra.mxu3 %vm533_vm1, %v526_v3  ;;  %v527_v7 = vld [vmem:[%s514_s26 + $0x38] sm:$0xff] }
  0x23   : > { %4817 = vmatmul.msk.f32.vlgmr.msra.gmra.mxu0 %vm533_vm1, %v520_v4  ;;  %4819 = vmatmul.msk.f32.vlgmr.msra.gmra.mxu1 %vm533_vm1, %v522_v5  ;;  %v521_v8 = vld [vmem:[%s514_s26 + $0x8] sm:$0xff]  ;;  %v523_v9 = vld [vmem:[%s514_s26 + $0x18] sm:$0xff] }
  0x2a   : > { %4822 = vmatmul.msk.f32.gmra.mxu2 %vm533_vm1, %v525_v6  ;;  %4824 = vmatmul.msk.f32.gmra.mxu3 %vm533_vm1, %v527_v7 }
  0x2b   : > { %4818 = vmatmul.msk.f32.gmra.mxu0 %vm533_vm1, %v521_v8  ;;  %4820 = vmatmul.msk.f32.gmra.mxu1 %vm533_vm1, %v523_v9 }
  0xa0   : > { %v579_v11 = vpop.f32.mrf.mxu0  ;;  %v585_v13 = vpop.f32.mrf.mxu1 }
  0xa1   : > { %v580_v14 = vadd.f32 %v5007_v10, %v579_v11  ;;  %v586_v15 = vadd.f32 %v5007_v10, %v585_v13 }
  0xa3   : > { %v604_v16 = vadd.f32 %v603_v12, %v580_v14  ;;  %v606_v17 = vadd.f32 %v603_v12, %v586_v15 }
  0xa5   : > { %v591_v18 = vpop.f32.mrf.mxu2  ;;  %v597_v19 = vpop.f32.mrf.mxu3  ;;  %612 = vst [vmem:[#allocation2 + $0x30] sm:$0xff] %v604_v16 }
  0xa6   : > { %v592_v20 = vadd.f32 %v5007_v10, %v591_v18  ;;  %v598_v21 = vadd.f32 %v5007_v10, %v597_v19  ;;  %614 = vst [vmem:[#allocation2 + $0x18] sm:$0xff] %v606_v17 }
  0xa8   : > { %v608_v22 = vadd.f32 %v603_v12, %v592_v20  ;;  %v610_v23 = vadd.f32 %v603_v12, %v598_v21  ;;  %v582_v24 = vpop.f32.mrf.mxu0  ;;  %v588_v25 = vpop.f32.mrf.mxu1 }
  0xa9   : > { %v583_v26 = vadd.f32 %v5007_v10, %v582_v24  ;;  %v589_v27 = vadd.f32 %v5007_v10, %v588_v25 }
  0xaa   : > { %616 = vst [vmem:[#allocation2 + $0x8] sm:$0xff] %v608_v22 }
  0xab   : > { %618 = vst [vmem:[#allocation2 + $0x28] sm:$0xff] %v610_v23  ;;  %v605_v28 = vadd.f32 %v603_v12, %v583_v26  ;;  %v607_v29 = vadd.f32 %v603_v12, %v589_v27 }
  0xad   : > { %v594_v30 = vpop.f32.mrf.mxu2  ;;  %v600_v31 = vpop.f32.mrf.mxu3  ;;  %613 = vst [vmem:[#allocation2] sm:$0xff] %v605_v28 }
  0xae   : > { %v595_v32 = vadd.f32 %v5007_v10, %v594_v30  ;;  %v601_v33 = vadd.f32 %v5007_v10, %v600_v31  ;;  %615 = vst [vmem:[#allocation2 + $0x10] sm:$0xff] %v607_v29 }
  0xb0   : > { %v609_v34 = vadd.f32 %v603_v12, %v595_v32  ;;  %v611_v35 = vadd.f32 %v603_v12, %v601_v33 }
  0xb2   : > { %617 = vst [vmem:[#allocation2 + $0x20] sm:$0xff] %v609_v34 }
  0xb3   : > { %619 = vst [vmem:[#allocation2 + $0x38] sm:$0xff] %v611_v35 }
  0xb4 LB: >> { %s4929_s20 = smul.u32 384, %s5442_s17  ;;  %v5651_v4 = vld [vmem:[#allocation2 + $0x30] sm:$0xff]  ;;  %v5655_v5 = vld [vmem:[#allocation2] sm:$0xff]  ;;  %v5659_v6 = vld [vmem:[#allocation2 + $0x18] sm:$0xff]  ;;  %vm818_vm2 = vcmask 261120   ;;  %s5453_s15 = smov 96   ;;  %s5442_s17 = sphi %s5611_s17, %s625_s17  }
  0xb5   : >> { %v5663_v7 = vld [vmem:[#allocation2 + $0x10] sm:$0xff]  ;;  %v5667_v8 = vld [vmem:[#allocation2 + $0x8] sm:$0xff]  ;;  %s685_s23 = smul.u32 3, %s5442_s17  ;;  %vm1035_vm3 = vcmask 64512   ;;  %s5454_s13 = smov 64  }
  0xb6   : >> { %s5617_s22 = scalar_lea.vmem [#allocation4], %s4929_s20  ;;  %v5675_v10 = vld [vmem:[#allocation2 + $0x28] sm:$0xff]  ;;  %s5455_s24 = smov 32  }
  0xb7   : >> { %v683_v36 = vld [vmem:[%s5617_s22 + $0x170] sm:$0xff]  ;;  %v680_v37 = vld [vmem:[%s5617_s22 + $0x158] sm:$0xff]  ;;  %v682_v38 = vld [vmem:[%s5617_s22 + $0x168] sm:$0xff]  ;;  %s686_s8 = scalar_lea.vmem %s7145_s5, %s685_s23  ;;  %s4922_s25 = sshll.u32 %s5442_s17, 7 }
  0xb8   : >> { %736 = vmatpush.msra.mxu1 %v683_v36  ;;  %695 = vmatpush.msra.mxu0 %v682_v38  ;;  %v679_v39 = vld [vmem:[%s5617_s22 + $0x150] sm:$0xff]  ;;  %v677_v40 = vld [vmem:[%s5617_s22 + $0x140] sm:$0xff]  ;;  %v676_v41 = vld [vmem:[%s5617_s22 + $0x138] sm:$0xff]  ;;  %s6462_s28 = scalar_lea.vmem %s7146_s6, %s4922_s25  ;;  %s3456_s30 = scalar_lea.vmem %s7147_s7, %s5442_s17 }
  0xb9   : >> { %v674_v42 = vld [vmem:[%s5617_s22 + $0x128] sm:$0xff]  ;;  %v673_v43 = vld [vmem:[%s5617_s22 + $0x120] sm:$0xff]  ;;  %v671_v44 = vld [vmem:[%s5617_s22 + $0x110] sm:$0xff]  ;;  %s4925_s4 = sshll.u32 %s5442_s17, 2  ;;  %s4274_s26 = scalar_lea.vmem %s7151_s11, %s5442_s17 }
  0xba   : >> { %737 = vmatpush.msra.mxu1 %v680_v37  ;;  %696 = vmatpush.msra.mxu0 %v679_v39  ;;  %v670_v45 = vld [vmem:[%s5617_s22 + $0x108] sm:$0xff]  ;;  %v668_v46 = vld [vmem:[%s5617_s22 + $0xf8] sm:$0xff]  ;;  %v667_v47 = vld [vmem:[%s5617_s22 + $0xf0] sm:$0xff] }
  0xbb   : >> { %v665_v48 = vld [vmem:[%s5617_s22 + $0xe0] sm:$0xff]  ;;  %v664_v49 = vld [vmem:[%s5617_s22 + $0xd8] sm:$0xff]  ;;  %v662_v50 = vld [vmem:[%s5617_s22 + $0xc8] sm:$0xff] }
  0xbc   : >> { %738 = vmatpush.msra.mxu1 %v677_v40  ;;  %697 = vmatpush.msra.mxu0 %v676_v41  ;;  %v661_v51 = vld [vmem:[%s5617_s22 + $0xc0] sm:$0xff]  ;;  %v659_v52 = vld [vmem:[%s5617_s22 + $0xb0] sm:$0xff]  ;;  %v658_v53 = vld [vmem:[%s5617_s22 + $0xa8] sm:$0xff] }
  0xbd   : >> { %v656_v54 = vld [vmem:[%s5617_s22 + $0x98] sm:$0xff]  ;;  %v655_v55 = vld [vmem:[%s5617_s22 + $0x90] sm:$0xff]  ;;  %v653_v56 = vld [vmem:[%s5617_s22 + $0x80] sm:$0xff] }
  0xbe   : >> { %739 = vmatpush.msra.mxu1 %v674_v42  ;;  %698 = vmatpush.msra.mxu0 %v673_v43  ;;  %v652_v57 = vld [vmem:[%s5617_s22 + $0x78] sm:$0xff]  ;;  %v650_v58 = vld [vmem:[%s5617_s22 + $0x68] sm:$0xff]  ;;  %v649_v59 = vld [vmem:[%s5617_s22 + $0x60] sm:$0xff] }
  0xbf   : >> { %v647_v60 = vld [vmem:[%s5617_s22 + $0x50] sm:$0xff]  ;;  %v646_v61 = vld [vmem:[%s5617_s22 + $0x48] sm:$0xff]  ;;  %v644_v62 = vld [vmem:[%s5617_s22 + $0x38] sm:$0xff] }
  0xc0   : >> { %740 = vmatpush.msra.mxu1 %v671_v44  ;;  %699 = vmatpush.msra.mxu0 %v670_v45  ;;  %v643_v63 = vld [vmem:[%s5617_s22 + $0x30] sm:$0xff]  ;;  %v641_v0 = vld [vmem:[%s5617_s22 + $0x20] sm:$0xff]  ;;  %v640_v1 = vld [vmem:[%s5617_s22 + $0x18] sm:$0xff] }
  0xc1   : >> { %v638_v2 = vld [vmem:[%s5617_s22 + $0x8] sm:$0xff]  ;;  %v637_v3 = vld [vmem:[%s5617_s22] sm:$0xff]  ;;  %v5679_v11 = vld [vmem:[#allocation2 + $0x38] sm:$0xff] }
  0xc2   : >> { %741 = vmatpush.msra.mxu1 %v668_v46  ;;  %700 = vmatpush.msra.mxu0 %v667_v47  ;;  %v5671_v9 = vld [vmem:[#allocation2 + $0x20] sm:$0xff] }
  0xc3   : >> { %v5687_v12 = vld [vmem:[%s686_s8] sm:$0x7] }
  0xc4   : >> { %742 = vmatpush.msra.mxu1 %v665_v48  ;;  %701 = vmatpush.msra.mxu0 %v664_v49  ;;  %v690_v13 = vperm.slane %v5687_v12, 1  ;;  %v689_v14 = vperm.slane %v5687_v12, 0 }
  0xc6   : >> { %743 = vmatpush.msra.mxu1 %v662_v50  ;;  %702 = vmatpush.msra.mxu0 %v661_v51 }
  0xc8   : >> { %744 = vmatpush.msra.mxu1 %v659_v52  ;;  %703 = vmatpush.msra.mxu0 %v658_v53 }
  0xca   : >> { %745 = vmatpush.msra.mxu1 %v656_v54  ;;  %704 = vmatpush.msra.mxu0 %v655_v55 }
  0xcc   : >> { %746 = vmatpush.msra.mxu1 %v653_v56  ;;  %705 = vmatpush.msra.mxu0 %v652_v57 }
  0xce   : >> { %747 = vmatpush.msra.mxu1 %v650_v58  ;;  %706 = vmatpush.msra.mxu0 %v649_v59  ;;  %v684_v59 = vld [vmem:[%s5617_s22 + $0x178] sm:$0xff] }
  0xcf   : >> { %777 = vmatpush.msra.mxu2 %v684_v59 }
  0xd0   : >> { %748 = vmatpush.msra.mxu1 %v647_v60  ;;  %707 = vmatpush.msra.mxu0 %v646_v61  ;;  %v681_v60 = vld [vmem:[%s5617_s22 + $0x160] sm:$0xff]  ;;  %v678_v61 = vld [vmem:[%s5617_s22 + $0x148] sm:$0xff] }
  0xd1   : >> { %778 = vmatpush.msra.mxu2 %v681_v60 }
  0xd2   : >> { %749 = vmatpush.msra.mxu1 %v644_v62  ;;  %708 = vmatpush.msra.mxu0 %v643_v63  ;;  %v675_v63 = vld [vmem:[%s5617_s22 + $0x130] sm:$0xff] }
  0xd3   : >> { %779 = vmatpush.msra.mxu2 %v678_v61 }
  0xd4   : >> { %750 = vmatpush.msra.mxu1 %v641_v0  ;;  %709 = vmatpush.msra.mxu0 %v640_v1  ;;  %v672_v1 = vld [vmem:[%s5617_s22 + $0x118] sm:$0xff] }
  0xd5   : >> { %780 = vmatpush.msra.mxu2 %v675_v63 }
  0xd6   : >> { %751 = vmatpush.msra.mxu1 %v638_v2  ;;  %710 = vmatpush.msra.mxu0 %v637_v3  ;;  %v669_v3 = vld [vmem:[%s5617_s22 + $0x100] sm:$0xff] }
  0xd7   : >> { %752 = vmatmul.f32.vlgmr.msra.gmra.mxu1 %v5651_v4  ;;  %711 = vmatmul.f32.vlgmr.msra.gmra.mxu0 %v5651_v4 }
  0xd8   : >> { %781 = vmatpush.msra.mxu2 %v672_v1 }
  0xda   : >> { %782 = vmatpush.msra.mxu2 %v669_v3  ;;  %v5851_v3 = vperm.slane %v5687_v12, 2 }
  0xdf   : >> { %755 = vmatmul.f32.gmra.mxu1 %v5655_v5  ;;  %714 = vmatmul.f32.gmra.mxu0 %v5655_v5 }
  0xe7   : >> { %758 = vmatmul.f32.gmra.mxu1 %v5659_v6  ;;  %717 = vmatmul.f32.gmra.mxu0 %v5659_v6 }
  0xef   : >> { %761 = vmatmul.f32.gmra.mxu1 %v5663_v7  ;;  %720 = vmatmul.f32.gmra.mxu0 %v5663_v7 }
  0xf7   : >> { %764 = vmatmul.f32.gmra.mxu1 %v5667_v8  ;;  %723 = vmatmul.f32.gmra.mxu0 %v5667_v8 }
  0xff   : >> { %767 = vmatmul.f32.gmra.mxu1 %v5671_v9  ;;  %726 = vmatmul.f32.gmra.mxu0 %v5671_v9 }
 0x107   : >> { %770 = vmatmul.f32.gmra.mxu1 %v5675_v10  ;;  %729 = vmatmul.f32.gmra.mxu0 %v5675_v10 }
 0x10f   : >> { %773 = vmatmul.f32.gmra.mxu1 %v5679_v11  ;;  %732 = vmatmul.f32.gmra.mxu0 %v5679_v11 }
 0x154   : >> { %v753_v15 = vpop.f32.mrf.mxu1  ;;  %v712_v16 = vpop.f32.mrf.mxu0 }
 0x155   : >> { %v5691_v17 = vadd.f32 %v753_v15, %v690_v13  ;;  %v5693_v18 = vadd.f32 %v712_v16, %v689_v14  ;;  %v663_v15 = vld [vmem:[%s5617_s22 + $0xd0] sm:$0xff] }
 0x157   : >> { %1414 = vrot.lane.b32.xlu1 %v5691_v17, %s5453_s15  ;;  %4826 = vmatpush.xpose.msk.msra.mxu3 %vm818_vm2, %v5691_v17 }
 0x158   : >> { %1412 = vrot.lane.b32.xlu2 %v5693_v18, %s5453_s15 }
 0x15a   : >> { %4827 = vmatmul.msk.f32.vlgmr.msra.gmra.mxu3 %vm818_vm2, %v5693_v18 }
 0x15c   : >> { %v756_v19 = vpop.f32.mrf.mxu1  ;;  %v715_v20 = vpop.f32.mrf.mxu0 }
 0x15d   : >> { %v5703_v21 = vadd.f32 %v756_v19, %v690_v13  ;;  %v5705_v22 = vadd.f32 %v715_v20, %v689_v14  ;;  %v660_v19 = vld [vmem:[%s5617_s22 + $0xb8] sm:$0xff] }
 0x15f   : >> { %1442 = vrot.lane.b32.xlu0 %v5703_v21, %s5453_s15  ;;  %4828 = vmatpush.xpose.msk.msrb.mxu3 %vm818_vm2, %v5703_v21 }
 0x162   : >> { %4829 = vmatmul.msk.f32.vlgmr.msrb.gmra.mxu3 %vm818_vm2, %v5705_v22 }
 0x164   : >> { %v759_v23 = vpop.f32.mrf.mxu1  ;;  %v718_v24 = vpop.f32.mrf.mxu0 }
 0x165   : >> { %v5713_v25 = vadd.f32 %v759_v23, %v690_v13  ;;  %v5715_v26 = vadd.f32 %v718_v24, %v689_v14  ;;  %v657_v23 = vld [vmem:[%s5617_s22 + $0xa0] sm:$0xff]  ;;  %v654_v24 = vld [vmem:[%s5617_s22 + $0x88] sm:$0xff] }
 0x167   : >> { %4830 = vmatpush.xpose.msk.msra.mxu3 %vm818_vm2, %v5713_v25  ;;  %1470 = vrot.lane.b32.xlu2 %v5713_v25, %s5453_s15 }
 0x16a   : >> { %4831 = vmatmul.msk.f32.vlgmr.msra.gmra.mxu3 %vm818_vm2, %v5715_v26 }
 0x16c   : >> { %v762_v27 = vpop.f32.mrf.mxu1  ;;  %v721_v28 = vpop.f32.mrf.mxu0 }
 0x16d   : >> { %v5723_v29 = vadd.f32 %v762_v27, %v690_v13  ;;  %v5725_v30 = vadd.f32 %v721_v28, %v689_v14  ;;  %v651_v28 = vld [vmem:[%s5617_s22 + $0x70] sm:$0xff] }
 0x16f   : >> { %4832 = vmatpush.xpose.msk.msrb.mxu3 %vm818_vm2, %v5723_v29 }
 0x172   : >> { %4833 = vmatmul.msk.f32.vlgmr.msrb.gmra.mxu3 %vm818_vm2, %v5725_v30 }
 0x174   : >> { %v765_v31 = vpop.f32.mrf.mxu1  ;;  %v724_v32 = vpop.f32.mrf.mxu0 }
 0x175   : >> { %v5731_v33 = vadd.f32 %v765_v31, %v690_v13  ;;  %v5733_v34 = vadd.f32 %v724_v32, %v689_v14  ;;  %v648_v32 = vld [vmem:[%s5617_s22 + $0x58] sm:$0xff] }
 0x177   : >> { %4834 = vmatpush.xpose.msk.msra.mxu3 %vm818_vm2, %v5731_v33 }
 0x17a   : >> { %4835 = vmatmul.msk.f32.vlgmr.msra.gmra.mxu3 %vm818_vm2, %v5733_v34 }
 0x17c   : >> { %v768_v35 = vpop.f32.mrf.mxu1  ;;  %v727_v36 = vpop.f32.mrf.mxu0 }
 0x17d   : >> { %v5739_v37 = vadd.f32 %v768_v35, %v690_v13  ;;  %v5741_v38 = vadd.f32 %v727_v36, %v689_v14  ;;  %v645_v36 = vld [vmem:[%s5617_s22 + $0x40] sm:$0xff] }
 0x17f   : >> { %4836 = vmatpush.xpose.msk.msrb.mxu3 %vm818_vm2, %v5739_v37 }
 0x182   : >> { %4837 = vmatmul.msk.f32.vlgmr.msrb.gmra.mxu3 %vm818_vm2, %v5741_v38 }
 0x184   : >> { %v771_v39 = vpop.f32.mrf.mxu1  ;;  %v730_v40 = vpop.f32.mrf.mxu0 }
 0x185   : >> { %v5747_v41 = vadd.f32 %v771_v39, %v690_v13  ;;  %v5749_v42 = vadd.f32 %v730_v40, %v689_v14  ;;  %v642_v39 = vld [vmem:[%s5617_s22 + $0x28] sm:$0xff] }
 0x187   : >> { %4838 = vmatpush.xpose.msk.msra.mxu3 %vm818_vm2, %v5747_v41 }
 0x18a   : >> { %4839 = vmatmul.msk.f32.vlgmr.msra.gmra.mxu3 %vm818_vm2, %v5749_v42 }
 0x18c   : >> { %v774_v43 = vpop.f32.mrf.mxu1  ;;  %v733_v44 = vpop.f32.mrf.mxu0 }
 0x18d   : >> { %v5755_v45 = vadd.f32 %v774_v43, %v690_v13  ;;  %v5757_v46 = vadd.f32 %v733_v44, %v689_v14  ;;  %v666_v13 = vld [vmem:[%s5617_s22 + $0xe8] sm:$0xff]  ;;  %v639_v43 = vld [vmem:[%s5617_s22 + $0x10] sm:$0xff]  ;;  %s4930_s22 = sshll.u32 %s5442_s17, 9  ;;  %s625_s17 = sadd.s32 1, %s5442_s17  }
 0x18e   : >> { %783 = vmatpush.msra.mxu2 %v666_v13  ;;  %s6573_s23 = scalar_lea.vmem [#allocation6], %s4930_s22  ;;  %s6727_s18 = scalar_lea.vmem [#allocation8], %s4930_s22 }
 0x18f   : >> { %4840 = vmatpush.xpose.msk.msrb.mxu3 %vm818_vm2, %v5755_v45  ;;  %p622_p8 = scmp.ge.s32.totalorder %s625_s17, 2  }
 0x190   : >> { %784 = vmatpush.msra.mxu2 %v663_v15 }
 0x192   : >> { %4841 = vmatmul.msk.f32.vlgmr.msrb.gmra.mxu3 %vm818_vm2, %v5757_v46  ;;  %785 = vmatpush.msra.mxu2 %v660_v19 }
 0x194   : >> { %786 = vmatpush.msra.mxu2 %v657_v23 }
 0x196   : >> { %787 = vmatpush.msra.mxu2 %v654_v24 }
 0x198   : >> { %788 = vmatpush.msra.mxu2 %v651_v28 }
 0x19a   : >> { %789 = vmatpush.msra.mxu2 %v648_v32 }
 0x19c   : >> { %790 = vmatpush.msra.mxu2 %v645_v36 }
 0x19e   : >> { %791 = vmatpush.msra.mxu2 %v642_v39 }
 0x1a0   : >> { %792 = vmatpush.msra.mxu2 %v639_v43 }
 0x1a1   : >> { %793 = vmatmul.f32.vlgmr.msra.gmra.mxu2 %v5651_v4 }
 0x1a9   : >> { %796 = vmatmul.f32.gmra.mxu2 %v5655_v5 }
 0x1b1   : >> { %799 = vmatmul.f32.gmra.mxu2 %v5659_v6 }
 0x1b9   : >> { %802 = vmatmul.f32.gmra.mxu2 %v5663_v7 }
 0x1c1   : >> { %805 = vmatmul.f32.gmra.mxu2 %v5667_v8 }
 0x1c9   : >> { %808 = vmatmul.f32.gmra.mxu2 %v5671_v9  ;;  %v5822_v5 = vpop.permute.xlu1 %1414 }
 0x1d1   : >> { %811 = vmatmul.f32.gmra.mxu2 %v5675_v10 }
 0x1d9   : >> { %814 = vmatmul.f32.gmra.mxu2 %v5679_v11 }
 0x1dd   : >> { %v842_v47 = vpop.f32.mrf.mxu3 }
 0x1de   : >> { %v5763_v48 = vmul.f32 0.17677669, %v842_v47 }
 0x1e0   : >> { %v1036_v49 = vsel %vm1035_vm3, %v5763_v48, -inf }
 0x1e1   : >> { %1037 = vmax.xlane.f32.xlu0 %v1036_v49  ;;  %v5818_v49 = vpop.permute.xlu0 %1442 }
 0x1e5   : >> { %v868_v50 = vpop.f32.mrf.mxu3 }
 0x1e6   : >> { %v5767_v51 = vmul.f32 0.17677669, %v868_v50 }
 0x1e8   : >> { %v1039_v52 = vsel %vm1035_vm3, %v5767_v51, -inf }
 0x1e9   : >> { %1040 = vmax.xlane.f32.xlu0 %v1039_v52 }
 0x1ed   : >> { %v894_v53 = vpop.f32.mrf.mxu3 }
 0x1ee   : >> { %v5771_v54 = vmul.f32 0.17677669, %v894_v53 }
 0x1f0   : >> { %v1042_v55 = vsel %vm1035_vm3, %v5771_v54, -inf }
 0x1f1   : >> { %1043 = vmax.xlane.f32.xlu1 %v1042_v55 }
 0x1f5   : >> { %v920_v56 = vpop.f32.mrf.mxu3 }
 0x1f6   : >> { %v5775_v57 = vmul.f32 0.17677669, %v920_v56 }
 0x1f8   : >> { %v1045_v58 = vsel %vm1035_vm3, %v5775_v57, -inf }
 0x1f9   : >> { %1046 = vmax.xlane.f32.xlu1 %v1045_v58 }
 0x1fd   : >> { %v946_v62 = vpop.f32.mrf.mxu3 }
 0x1fe   : >> { %v5783_v0 = vmul.f32 0.17677669, %v946_v62 }
 0x200   : >> { %v1048_v2 = vsel %vm1035_vm3, %v5783_v0, -inf }
 0x201   : >> { %1049 = vmax.xlane.f32.xlu2 %v1048_v2 }
 0x205   : >> { %v972_v14 = vpop.f32.mrf.mxu3 }
 0x206   : >> { %v5791_v16 = vmul.f32 0.17677669, %v972_v14 }
 0x208   : >> { %v1051_v20 = vsel %vm1035_vm3, %v5791_v16, -inf }
 0x209   : >> { %1052 = vmax.xlane.f32.xlu2 %v1051_v20 }
 0x20d   : >> { %v998_v27 = vpop.f32.mrf.mxu3 }
 0x20e   : >> { %v5799_v31 = vmul.f32 0.17677669, %v998_v27 }
 0x210   : >> { %v1054_v35 = vsel %vm1035_vm3, %v5799_v31, -inf }
 0x211   : >> { %1055 = vmax.xlane.f32.xlu0 %v1054_v35 }
 0x215   : >> { %v1024_v40 = vpop.f32.mrf.mxu3 }
 0x216   : >> { %v5807_v44 = vmul.f32 0.17677669, %v1024_v40 }
 0x218   : >> { %v1057_v47 = vsel %vm1035_vm3, %v5807_v44, -inf }
 0x219   : >> { %1058 = vmax.xlane.f32.xlu1 %v1057_v47 }
 0x224   : >> { %v794_v13 = vpop.f32.mrf.mxu2 }
 0x225   : >> { %v5854_v14 = vadd.f32 %v794_v13, %v5851_v3 }
 0x227   : >> { %1246 = vmatpush.msra.mxu3 %v5854_v14 }
 0x22c   : >> { %v797_v12 = vpop.f32.mrf.mxu2 }
 0x22d   : >> { %v5865_v23 = vadd.f32 %v797_v12, %v5851_v3 }
 0x22f   : >> { %1269 = vmatpush.msrb.mxu3 %v5865_v23 }
 0x234   : >> { %v800_v28 = vpop.f32.mrf.mxu2 }
 0x23c   : >> { %v5874_v35 = vpop.f32.mrf.mxu2 }
 0x244   : >> { %v806_v36 = vpop.f32.mrf.mxu2 }
 0x245   : >> { %v5881_v39 = vadd.f32 %v806_v36, %v5851_v3 }
 0x247   : >> { %1338 = vmatpush.msrb.mxu2 %v5881_v39 }
 0x254   : >> { %v1038_v50 = vpop.xlane.xlu0 %1037 }
 0x255   : >> { %v1060_v52 = vsub.f32 %v5763_v48, %v1038_v50 }
 0x257   : >> { %v1068_v4 = vmul.f32 1.442695, %v1060_v52 }
 0x259   : >> { %5095 = vpow2.f32 %v1068_v4 }
 0x25c   : >> { %v1041_v6 = vpop.xlane.xlu0 %1040 }
 0x25d   : >> { %v1061_v7 = vsub.f32 %v5767_v51, %v1041_v6 }
 0x25f   : >> { %v5825_v53 = vpop.eup %5095  ;;  %v1070_v8 = vmul.f32 1.442695, %v1061_v7 }
 0x260   : >> { %v1084_v9 = vsel %vm1035_vm3, %v5825_v53, 0.0 }
 0x261   : >> { %5097 = vpow2.f32 %v1070_v8  ;;  %1085 = vadd.xlane.f32.xlu2 %v1084_v9 }
 0x264   : >> { %v1044_v10 = vpop.xlane.xlu1 %1043 }
 0x265   : >> { %v1062_v11 = vsub.f32 %v5771_v54, %v1044_v10  ;;  %v5842_v54 = vpop.permute.xlu2 %1412 }
 0x267   : >> { %v5830_v55 = vpop.eup %5097  ;;  %v1072_v48 = vmul.f32 1.442695, %v1062_v11 }
 0x268   : >> { %v1087_v56 = vsel %vm1035_vm3, %v5830_v55, 0.0 }
 0x269   : >> { %5099 = vpow2.f32 %v1072_v48  ;;  %1088 = vadd.xlane.f32.xlu0 %v1087_v56 }
 0x26c   : >> { %v1047_v60 = vpop.xlane.xlu1 %1046 }
 0x26d   : >> { %v5844_v59 = vpop.permute.xlu2 %1470  ;;  %v1063_v61 = vsub.f32 %v5775_v57, %v1047_v60 }
 0x26f   : >> { %v5834_v51 = vpop.eup %5099  ;;  %v1074_v63 = vmul.f32 1.442695, %v1063_v61 }
 0x270   : >> { %v1090_v58 = vsel %vm1035_vm3, %v5834_v51, 0.0 }
 0x271   : >> { %1091 = vadd.xlane.f32.xlu1 %v1090_v58  ;;  %5101 = vpow2.f32 %v1074_v63  ;;  %v5898_v58 = vpack.i.bf16 %v5881_v39, %v5865_v23 }
 0x275   : >> { %v1050_v62 = vpop.xlane.xlu2 %1049 }
 0x276   : >> { %v1064_v1 = vsub.f32 %v5783_v0, %v1050_v62 }
 0x277   : >> { %v5856_v15 = vpop.eup %5101 }
 0x278   : >> { %v1076_v2 = vmul.f32 1.442695, %v1064_v1  ;;  %v1093_v57 = vsel %vm1035_vm3, %v5856_v15, 0.0 }
 0x279   : >> { %1498 = vrot.lane.b32.xlu2 %v5723_v29, %s5453_s15 }
 0x27a   : >> { %5103 = vpow2.f32 %v1076_v2 }
 0x27d   : >> { %1468 = vrot.lane.b32.xlu0 %v5715_v26, %s5453_s15  ;;  %v1053_v19 = vpop.xlane.xlu2 %1052 }
 0x27e   : >> { %v1065_v0 = vsub.f32 %v5791_v16, %v1053_v19 }
 0x280   : >> { %v5862_v20 = vpop.eup %5103  ;;  %v1078_v24 = vmul.f32 1.442695, %v1065_v0 }
 0x281   : >> { %v1096_v27 = vsel %vm1035_vm3, %v5862_v20, 0.0 }
 0x282   : >> { %5105 = vpow2.f32 %v1078_v24 }
 0x284   : >> { %v1056_v40 = vpop.xlane.xlu0 %1055 }
 0x285   : >> { %v1066_v47 = vsub.f32 %v5799_v31, %v1056_v40 }
 0x287   : >> { %v1080_v4 = vmul.f32 1.442695, %v1066_v47 }
 0x288   : >> { %v5870_v32 = vpop.eup %5105 }
 0x289   : >> { %v1099_v16 = vsel %vm1035_vm3, %v5870_v32, 0.0 }
 0x28a   : >> { %1440 = vrot.lane.b32.xlu1 %v5705_v22, %s5453_s15 }
 0x28c   : >> { %v1059_v43 = vpop.xlane.xlu1 %1058 }
 0x28d   : >> { %v1067_v50 = vsub.f32 %v5807_v44, %v1059_v43 }
 0x28f   : >> { %v1082_v6 = vmul.f32 1.442695, %v1067_v50 }
 0x2a2   : >> { %1094 = vadd.xlane.f32.xlu2 %v1093_v57  ;;  %v5907_v57 = vadd.f32 %v800_v28, %v5851_v3 }
 0x2a7   : >> { %1097 = vadd.xlane.f32.xlu0 %v1096_v27 }
 0x2b4   : >> { %1100 = vadd.xlane.f32.xlu1 %v1099_v16 }
 0x2ba   : >> { %1580 = vrot.lane.b32.xlu2 %v5749_v42, %s5453_s15 }
 0x2bb   : >> { %1496 = vrot.lane.b32.xlu0 %v5725_v30, %s5453_s15 }
 0x2cd   : >> { %1582 = vrot.lane.b32.xlu1 %v5747_v41, %s5453_s15 }
 0x2d4   : >> { %v1086_v52 = vpop.xlane.xlu2 %1085 }
 0x2d5   : >> { %5107 = vrcp.f32 %v1086_v52  ;;  %1526 = vrot.lane.b32.xlu1 %v5731_v33, %s5453_s15  ;;  %v1119_v11 = vand.u32 2147483648, %v1086_v52  ;;  %v1117_v56 = vand.u32 2147483647, %v1086_v52  ;;  %vm1113_vm5 = vweird.f32 %v1086_v52 }
 0x2d6   : >> { %5109 = vpow2.f32 %v1080_v4 }
 0x2d7   : >> { %5111 = vpow2.f32 %v1082_v6  ;;  %v1120_v1 = vor.u32 1.1754944e-38, %v1119_v11  ;;  %vm1118_vm7 = vcmp.eq.f32.partialorder %v1117_v56, 8.507059e+37  ;;  %v809_v56 = vpop.f32.mrf.mxu2 }
 0x2db   : >> { %v5108_v7 = vpop.eup %5107 }
 0x2dc   : >> { %v1109_v8 = vmul.f32 %v5108_v7, %v1086_v52  ;;  %v1089_v9 = vpop.xlane.xlu0 %1088  ;;  %v5892_v31 = vpop.eup %5109  ;;  %vm1114_vm4 = vweird.f32 %v5108_v7  ;;  %v5916_v52 = vadd.f32 %v5874_v35, %v5851_v3 }
 0x2dd   : >> { %5113 = vrcp.f32 %v1089_v9  ;;  %1608 = vrot.lane.b32.xlu1 %v5757_v46, %s5453_s15  ;;  %v5894_v48 = vpop.eup %5111  ;;  %v1102_v61 = vsel %vm1035_vm3, %v5892_v31, 0.0  ;;  %vm1115_vm6 = vmor %vm1113_vm5, %vm1114_vm4  ;;  %v1134_v24 = vand.u32 2147483648, %v1089_v9  ;;  %v1132_v36 = vand.u32 2147483647, %v1089_v9 }
 0x2de   : >> { %v1110_v10 = vsub.f32 1.0, %v1109_v8  ;;  %v1105_v19 = vsel %vm1035_vm3, %v5894_v48, 0.0  ;;  %vm1128_vm9 = vweird.f32 %v1089_v9 }
 0x2df   : >> { %v1135_v47 = vor.u32 1.1754944e-38, %v1134_v24  ;;  %vm1133_vm11 = vcmp.eq.f32.partialorder %v1132_v36, 8.507059e+37 }
 0x2e0   : >> { %v1111_v44 = vmul.f32 %v5108_v7, %v1110_v10 }
 0x2e2   : >> { %v1112_v60 = vadd.f32 %v5108_v7, %v1111_v44 }
 0x2e3   : >> { %v5114_v62 = vpop.eup %5113  ;;  %1103 = vadd.xlane.f32.xlu2 %v1102_v61 }
 0x2e4   : >> { %v1116_v63 = vsel %vm1115_vm6, %v5108_v7, %v1112_v60  ;;  %v1124_v2 = vmul.f32 %v5114_v62, %v1089_v9  ;;  %v1092_v13 = vpop.xlane.xlu1 %1091  ;;  %vm1129_vm8 = vweird.f32 %v5114_v62  ;;  %v5934_v60 = vadd.f32 %v809_v56, %v5851_v3 }
 0x2e5   : >> { %5115 = vrcp.f32 %v1092_v13  ;;  %5019 = vrot.lane.b32.xlu1 %v5898_v58, %s5453_s15  ;;  %1106 = vadd.xlane.f32.xlu0 %v1105_v19  ;;  %v1121_v12 = vsel %vm1118_vm7, %v1120_v1, %v1116_v63  ;;  %vm1130_vm10 = vmor %vm1128_vm9, %vm1129_vm8  ;;  %v1149_v7 = vand.u32 2147483648, %v1092_v13  ;;  %v1147_v9 = vand.u32 2147483647, %v1092_v13 }
 0x2e6   : >> { %v1125_v0 = vsub.f32 1.0, %v1124_v2  ;;  %v1122_v27 = vmul.f32 %v5825_v53, %v1121_v12  ;;  %vm1143_vm13 = vweird.f32 %v1092_v13 }
 0x2e7   : >> { %v1150_v44 = vor.u32 1.1754944e-38, %v1149_v7  ;;  %vm1148_vm15 = vcmp.eq.f32.partialorder %v1147_v9, 8.507059e+37 }
 0x2e8   : >> { %v1126_v16 = vmul.f32 %v5114_v62, %v1125_v0  ;;  %4842 = vmatmul.msk.f32.vlgmr.msra.gmra.mxu3 %vm1035_vm3, %v1122_v27 }
 0x2e9   : >> { %1292 = vmatpush.msra.mxu3 %v5907_v57 }
 0x2ea   : >> { %v1127_v40 = vadd.f32 %v5114_v62, %v1126_v16 }
 0x2eb   : >> { %v5116_v43 = vpop.eup %5115 }
 0x2ec   : >> { %v1131_v50 = vsel %vm1130_vm10, %v5114_v62, %v1127_v40  ;;  %v1139_v28 = vmul.f32 %v5116_v43, %v1092_v13  ;;  %vm1144_vm12 = vweird.f32 %v5116_v43  ;;  %v5940_v62 = vpop.permute.xlu2 %1498 }
 0x2ed   : >> { %2108 = vrot.lane.b32.xlu1 %v5715_v26, %s5454_s13  ;;  %v1136_v53 = vsel %vm1133_vm11, %v1135_v47, %v1131_v50  ;;  %vm1145_vm14 = vmor %vm1143_vm13, %vm1144_vm12 }
 0x2ee   : >> { %v1140_v4 = vsub.f32 1.0, %v1139_v28  ;;  %v1137_v6 = vmul.f32 %v5830_v55, %v1136_v53 }
 0x2ef   : >> { %v5943_v63 = vpop.permute.xlu0 %1468 }
 0x2f0   : >> { %v1141_v8 = vmul.f32 %v5116_v43, %v1140_v4  ;;  %4843 = vmatmul.msk.f32.vlgmr.msrb.gmra.mxu3 %vm1035_vm3, %v1137_v6 }
 0x2f1   : >> { %1315 = vmatpush.msrb.mxu3 %v5916_v52 }
 0x2f2   : >> { %v1142_v10 = vadd.f32 %v5116_v43, %v1141_v8 }
 0x2f4   : >> { %v1146_v11 = vsel %vm1145_vm14, %v5116_v43, %v1142_v10 }
 0x2f5   : >> { %2222 = vrot.lane.b32.xlu1 %v5747_v41, %s5454_s13  ;;  %v1151_v35 = vsel %vm1148_vm15, %v1150_v44, %v1146_v11 }
 0x2f6   : >> { %v1152_v55 = vmul.f32 %v5834_v51, %v1151_v35  ;;  %v812_v51 = vpop.f32.mrf.mxu2 }
 0x2f7   : >> { %v5938_v61 = vadd.f32 %v812_v51, %v5851_v3 }
 0x2f8   : >> { %4844 = vmatmul.msk.f32.vlgmr.msra.gmra.mxu3 %vm1035_vm3, %v1152_v55 }
 0x2f9   : >> { %1610 = vrot.lane.b32.xlu0 %v5755_v45, %s5453_s15  ;;  %1361 = vmatpush.msra.mxu3 %v5934_v60 }
 0x2fa   : >> { %1384 = vmatpush.msra.mxu2 %v5938_v61 }
 0x2fb   : >> { %1524 = vrot.lane.b32.xlu2 %v5733_v34, %s5453_s15 }
 0x2fc   : >> { %v5945_v0 = vpop.permute.xlu1 %1440 }
 0x2fe   : >> { %v815_v47 = vpop.f32.mrf.mxu2 }
 0x2ff   : >> { %v5948_v8 = vadd.f32 %v815_v47, %v5851_v3 }
 0x301   : >> { %1554 = vrot.lane.b32.xlu0 %v5739_v37, %s5453_s15 }
 0x303   : >> { %1552 = vrot.lane.b32.xlu2 %v5741_v38, %s5453_s15 }
 0x315   : >> { %v1095_v1 = vpop.xlane.xlu2 %1094 }
 0x316   : >> { %5117 = vrcp.f32 %v1095_v1  ;;  %v1164_v24 = vand.u32 2147483648, %v1095_v1  ;;  %v1162_v36 = vand.u32 2147483647, %v1095_v1  ;;  %vm1158_vm1 = vweird.f32 %v1095_v1 }
 0x318   : >> { %v1165_v50 = vor.u32 1.1754944e-38, %v1164_v24  ;;  %vm1163_vm5 = vcmp.eq.f32.partialorder %v1162_v36, 8.507059e+37 }
 0x31a   : >> { %v1098_v2 = vpop.xlane.xlu0 %1097 }
 0x31b   : >> { %5119 = vrcp.f32 %v1098_v2  ;;  %v1179_v7 = vand.u32 2147483648, %v1098_v2  ;;  %v1177_v44 = vand.u32 2147483647, %v1098_v2  ;;  %vm1173_vm7 = vweird.f32 %v1098_v2 }
 0x31c   : >> { %v5118_v13 = vpop.eup %5117 }
 0x31d   : >> { %v1154_v19 = vmul.f32 %v5118_v13, %v1095_v1  ;;  %vm1159_vm0 = vweird.f32 %v5118_v13  ;;  %v1180_v35 = vor.u32 1.1754944e-38, %v1179_v7  ;;  %vm1178_vm9 = vcmp.eq.f32.partialorder %v1177_v44, 8.507059e+37 }
 0x31e   : >> { %vm1160_vm4 = vmor %vm1158_vm1, %vm1159_vm0 }
 0x31f   : >> { %v1155_v12 = vsub.f32 1.0, %v1154_v19 }
 0x321   : >> { %v5120_v27 = vpop.eup %5119  ;;  %v1156_v16 = vmul.f32 %v5118_v13, %v1155_v12 }
 0x322   : >> { %v1169_v40 = vmul.f32 %v5120_v27, %v1098_v2  ;;  %vm1174_vm6 = vweird.f32 %v5120_v27 }
 0x323   : >> { %v1157_v43 = vadd.f32 %v5118_v13, %v1156_v16  ;;  %vm1175_vm8 = vmor %vm1173_vm7, %vm1174_vm6 }
 0x324   : >> { %v1170_v28 = vsub.f32 1.0, %v1169_v40  ;;  %v1581_v40 = vpop.permute.xlu2 %1580 }
 0x325   : >> { %v1161_v53 = vsel %vm1160_vm4, %v5118_v13, %v1157_v43 }
 0x326   : >> { %v1166_v4 = vsel %vm1163_vm5, %v1165_v50, %v1161_v53  ;;  %v1171_v6 = vmul.f32 %v5120_v27, %v1170_v28 }
 0x327   : >> { %v1101_v9 = vpop.xlane.xlu1 %1100  ;;  %v1167_v10 = vmul.f32 %v5856_v15, %v1166_v4 }
 0x328   : >> { %5121 = vrcp.f32 %v1101_v9  ;;  %v1172_v11 = vadd.f32 %v5120_v27, %v1171_v6  ;;  %v1194_v2 = vand.u32 2147483648, %v1101_v9  ;;  %v1192_v19 = vand.u32 2147483647, %v1101_v9 }
 0x329   : >> { %4845 = vmatmul.msk.f32.vlgmr.msrb.gmra.mxu3 %vm1035_vm3, %v1167_v10  ;;  %vm1188_vm11 = vweird.f32 %v1101_v9 }
 0x32a   : >> { %1407 = vmatpush.msrb.mxu3 %v5948_v8  ;;  %v1176_v55 = vsel %vm1175_vm8, %v5120_v27, %v1172_v11  ;;  %v1195_v24 = vor.u32 1.1754944e-38, %v1194_v2  ;;  %vm1193_vm13 = vcmp.eq.f32.partialorder %v1192_v19, 8.507059e+37 }
 0x32b   : >> { %v1181_v56 = vsel %vm1178_vm9, %v1180_v35, %v1176_v55 }
 0x32c   : >> { %v1182_v3 = vmul.f32 %v5862_v20, %v1181_v56 }
 0x32d   : >> { %v1497_v43 = vpop.permute.xlu0 %1496 }
 0x32e   : >> { %v5122_v51 = vpop.eup %5121  ;;  %4846 = vmatmul.msk.f32.vlgmr.msrb.gmra.mxu2 %vm1035_vm3, %v1182_v3 }
 0x32f   : >> { %v1184_v1 = vmul.f32 %v5122_v51, %v1101_v9  ;;  %4850 = vmatpush.xpose.msk.msrb.mxu2 %vm818_vm2, %v5822_v5  ;;  %vm1189_vm10 = vweird.f32 %v5122_v51 }
 0x330   : >> { %vm1190_vm12 = vmor %vm1188_vm11, %vm1189_vm10 }
 0x331   : >> { %v1185_v15 = vsub.f32 1.0, %v1184_v1 }
 0x333   : >> { %v1186_v13 = vmul.f32 %v5122_v51, %v1185_v15 }
 0x335   : >> { %v1187_v12 = vadd.f32 %v5122_v51, %v1186_v13 }
 0x337   : >> { %v1191_v27 = vsel %vm1190_vm12, %v5122_v51, %v1187_v12 }
 0x338   : >> { %v1196_v16 = vsel %vm1193_vm13, %v1195_v24, %v1191_v27 }
 0x339   : >> { %v1197_v20 = vmul.f32 %v5870_v32, %v1196_v16 }
 0x33b   : >> { %4847 = vmatmul.msk.f32.vlgmr.msra.gmra.mxu3 %vm1035_vm3, %v1197_v20 }
 0x33c   : >> { %4852 = vmatpush.xpose.msk.msra.mxu3 %vm818_vm2, %v5818_v49 }
 0x33f   : >> { %v1583_v5 = vpop.permute.xlu1 %1582 }
 0x347   : >> { %v1527_v36 = vpop.permute.xlu1 %1526 }
 0x348   : >> { %4858 = vmatpush.xpose.msk.msrb.mxu0 %vm818_vm2, %v1527_v36 }
 0x34f   : >> { %v1609_v51 = vpop.permute.xlu1 %1608 }
 0x356   : >> { %v1104_v47 = vpop.xlane.xlu2 %1103 }
 0x357   : >> { %5123 = vrcp.f32 %v1104_v47  ;;  %v1209_v9 = vand.u32 2147483648, %v1104_v47  ;;  %v1207_v10 = vand.u32 2147483647, %v1104_v47  ;;  %vm1203_vm15 = vweird.f32 %v1104_v47  ;;  %v5971_v20 = vpop.permute.xlu1 %5019 }
 0x358   : >> { %v1107_v50 = vpop.xlane.xlu0 %1106  ;;  %v5021_v36 = vunpack.i.l.bf16 %v5971_v20 }
 0x359   : >> { %5125 = vrcp.f32 %v1107_v50  ;;  %v1224_v11 = vand.u32 2147483648, %v1107_v50  ;;  %v1222_v56 = vand.u32 2147483647, %v1107_v50  ;;  %v1210_v3 = vor.u32 1.1754944e-38, %v1209_v9 }
 0x35a   : >> { %vm1208_vm4 = vcmp.eq.f32.partialorder %v1207_v10, 8.507059e+37  ;;  %vm1218_vm5 = vweird.f32 %v1107_v50 }
 0x35b   : >> { %v1225_v13 = vor.u32 1.1754944e-38, %v1224_v11  ;;  %vm1223_vm7 = vcmp.eq.f32.partialorder %v1222_v56, 8.507059e+37 }
 0x35d   : >> { %v5124_v28 = vpop.eup %5123 }
 0x35e   : >> { %v1199_v53 = vmul.f32 %v5124_v28, %v1104_v47  ;;  %v1525_v4 = vpop.permute.xlu2 %1524  ;;  %vm1204_vm14 = vweird.f32 %v5124_v28 }
 0x35f   : >> { %v5126_v6 = vpop.eup %5125  ;;  %4859 = vmatmul.msk.f32.vlgmr.msrb.gmra.mxu0 %vm818_vm2, %v1525_v4  ;;  %vm1205_vm1 = vmor %vm1203_vm15, %vm1204_vm14 }
 0x360   : >> { %v1200_v32 = vsub.f32 1.0, %v1199_v53  ;;  %v1214_v7 = vmul.f32 %v5126_v6, %v1107_v50  ;;  %vm1219_vm0 = vweird.f32 %v5126_v6  ;;  %v5992_v50 = vpack.i.bf16 %v5938_v61, %v5916_v52 }
 0x361   : >> { %vm1220_vm6 = vmor %vm1218_vm5, %vm1219_vm0  ;;  %v5008_v53 = vpack.i.bf16 %v5854_v14, %v5907_v57 }
 0x362   : >> { %v1201_v49 = vmul.f32 %v5124_v28, %v1200_v32  ;;  %v1215_v44 = vsub.f32 1.0, %v1214_v7 }
 0x364   : >> { %v1202_v35 = vadd.f32 %v5124_v28, %v1201_v49  ;;  %v1216_v55 = vmul.f32 %v5126_v6, %v1215_v44 }
 0x366   : >> { %v1206_v1 = vsel %vm1205_vm1, %v5124_v28, %v1202_v35  ;;  %v1217_v15 = vadd.f32 %v5126_v6, %v1216_v55 }
 0x367   : >> { %v1211_v2 = vsel %vm1208_vm4, %v1210_v3, %v1206_v1 }
 0x368   : >> { %v1221_v19 = vsel %vm1220_vm6, %v5126_v6, %v1217_v15  ;;  %v1212_v12 = vmul.f32 %v5892_v31, %v1211_v2 }
 0x369   : >> { %v1226_v24 = vsel %vm1223_vm7, %v1225_v13, %v1221_v19 }
 0x36a   : >> { %4848 = vmatmul.msk.f32.vlgmr.msra.gmra.mxu2 %vm1035_vm3, %v1212_v12  ;;  %v1227_v27 = vmul.f32 %v5894_v48, %v1226_v24 }
 0x36b   : >> { %4854 = vmatpush.xpose.msk.msra.mxu2 %vm818_vm2, %v5844_v59  ;;  %v1611_v16 = vpop.permute.xlu0 %1610  ;;  %v1553_v59 = vpop.permute.xlu2 %1552 }
 0x36c   : >> { %4849 = vmatmul.msk.f32.vlgmr.msrb.gmra.mxu3 %vm1035_vm3, %v1227_v27 }
 0x36d   : >> { %4856 = vmatpush.xpose.msk.msrb.mxu3 %vm818_vm2, %v5940_v62 }
 0x372   : >> { %4851 = vmatmul.msk.f32.vlgmr.msrb.gmra.mxu2 %vm818_vm2, %v5842_v54 }
 0x373   : >> { %4862 = vmatpush.xpose.msk.msrb.mxu2 %vm818_vm2, %v1583_v5  ;;  %v1555_v31 = vpop.permute.xlu0 %1554 }
 0x374   : >> { %4853 = vmatmul.msk.f32.vlgmr.msra.gmra.mxu3 %vm818_vm2, %v5945_v0  ;;  %4860 = vmatpush.xpose.msk.msrb.mxu1 %vm818_vm2, %v1555_v31  ;;  %v5988_v0 = vpop.f32.mrf.mxu3 }
 0x375   : >> { %4864 = vmatpush.xpose.msk.msra.mxu3 %vm818_vm2, %v1611_v16 }
 0x377   : >> { %4861 = vmatmul.msk.f32.vlgmr.msrb.gmra.mxu1 %vm818_vm2, %v1553_v59 }
 0x378   : >> { %1885 = vmatpush.msra.mxu1 %v5021_v36 }
 0x37a   : >> { %4855 = vmatmul.msk.f32.vlgmr.msra.gmra.mxu2 %vm818_vm2, %v5943_v63 }
 0x37c   : >> { %4857 = vmatmul.msk.f32.vlgmr.msrb.gmra.mxu3 %vm818_vm2, %v1497_v43  ;;  %v5023_v43 = vpack.i.bf16 %v5934_v60, %v5948_v8 }
 0x382   : >> { %4863 = vmatmul.msk.f32.vlgmr.msrb.gmra.mxu2 %vm818_vm2, %v1581_v40  ;;  %v5997_v40 = vpop.f32.mrf.mxu3 }
 0x384   : >> { %4865 = vmatmul.msk.f32.vlgmr.msra.gmra.mxu3 %vm818_vm2, %v1609_v51 }
 0x38a   : >> { %v6002_v28 = vpop.f32.mrf.mxu3 }
 0x3ac   : >> { %v6009_v4 = vpop.f32.mrf.mxu3 }
 0x3ad   : >> { %7163 = vst [vmem:[#allocation12_spill] sm:$0xff] %v6009_v4 }
 0x3b1   : >> { %v6024_v44 = vpop.f32.mrf.mxu2 }
 0x3b2   : >> { %7166 = vst [vmem:[#allocation15_spill] sm:$0xff] %v6024_v44 }
 0x3be   : >> { %v6015_v6 = vpop.f32.mrf.mxu3 }
 0x3bf   : >> { %7164 = vst [vmem:[#allocation13_spill] sm:$0xff] %v6015_v6 }
 0x3dc   : >> { %v1549_v54 = vpop.f32.mrf.mxu0 }
 0x3dd   : >> { %v1640_v48 = vmul.f32 0.17677669, %v1549_v54 }
 0x3df   : >> { %v1656_v62 = vsel %vm1035_vm3, %v1640_v48, -inf }
 0x3e0   : >> { %1657 = vmax.xlane.f32.xlu2 %v1656_v62 }
 0x3ed   : >> { %v6028_v55 = vpop.f32.mrf.mxu2 }
 0x3ee   : >> { %7167 = vst [vmem:[#allocation16_spill] sm:$0xff] %v6028_v55 }
 0x3ef   : >> { %v6019_v32 = vpop.f32.mrf.mxu3 }
 0x3f0   : >> { %7165 = vst [vmem:[#allocation14_spill] sm:$0xff] %v6019_v32 }
 0x3f4   : >> { %v1577_v5 = vpop.f32.mrf.mxu1 }
 0x3f5   : >> { %v1641_v47 = vmul.f32 0.17677669, %v1577_v5  ;;  %v1437_v2 = vpop.f32.mrf.mxu2 }
 0x3f6   : >> { %v1636_v13 = vmul.f32 0.17677669, %v1437_v2 }
 0x3f7   : >> { %v1659_v63 = vsel %vm1035_vm3, %v1641_v47, -inf  ;;  %v1465_v7 = vpop.f32.mrf.mxu3 }
 0x3f8   : >> { %1660 = vmax.xlane.f32.xlu0 %v1659_v63  ;;  %5014 = vrot.lane.b32.xlu2 %v5992_v50, %s5453_s15  ;;  %v1644_v27 = vsel %vm1035_vm3, %v1636_v13, -inf  ;;  %v1637_v16 = vmul.f32 0.17677669, %v1465_v7 }
 0x3fa   : >> { %v1647_v54 = vsel %vm1035_vm3, %v1637_v16, -inf }
 0x3fd   : >> { %v1493_v62 = vpop.f32.mrf.mxu2 }
 0x3fe   : >> { %v1638_v63 = vmul.f32 0.17677669, %v1493_v62 }
 0x3ff   : >> { %v1521_v9 = vpop.f32.mrf.mxu3 }
 0x400   : >> { %5024 = vrot.lane.b32.xlu2 %v5023_v43, %s5453_s15  ;;  %v1639_v49 = vmul.f32 0.17677669, %v1521_v9  ;;  %v1650_v7 = vsel %vm1035_vm3, %v1638_v63, -inf }
 0x402   : >> { %v1653_v10 = vsel %vm1035_vm3, %v1639_v49, -inf }
 0x408   : >> { %2052 = vrot.lane.b32.xlu2 %v5693_v18, %s5454_s13 }
 0x40c   : >> { %5009 = vrot.lane.b32.xlu0 %v5008_v53, %s5453_s15 }
 0x410   : >> { %2082 = vrot.lane.b32.xlu2 %v5703_v21, %s5454_s13 }
 0x414   : >> { %2110 = vrot.lane.b32.xlu0 %v5713_v25, %s5454_s13 }
 0x41c   : >> { %2054 = vrot.lane.b32.xlu0 %v5691_v17, %s5454_s13 }
 0x424   : >> { %2138 = vrot.lane.b32.xlu0 %v5723_v29, %s5454_s13 }
 0x439   : >> { %1654 = vmax.xlane.f32.xlu2 %v1653_v10  ;;  %v1605_v10 = vpop.f32.mrf.mxu2 }
 0x451   : >> { %2220 = vrot.lane.b32.xlu2 %v5749_v42, %s5454_s13 }
 0x453   : >> { %v1658_v11 = vpop.xlane.xlu2 %1657 }
 0x454   : >> { %v1672_v35 = vsub.f32 %v1640_v48, %v1658_v11 }
 0x456   : >> { %v1684_v56 = vmul.f32 1.442695, %v1672_v35  ;;  %v6042_v35 = vmul.f32 0.17677669, %v1605_v10 }
 0x458   : >> { %5127 = vpow2.f32 %v1684_v56  ;;  %v1662_v56 = vsel %vm1035_vm3, %v6042_v35, -inf }
 0x45b   : >> { %v5015_v3 = vpop.permute.xlu2 %5014 }
 0x45c   : >> { %v5016_v51 = vunpack.i.l.bf16 %v5015_v3  ;;  %v5017_v11 = vunpack.i.h.bf16 %v5015_v3 }
 0x45e   : >> { %v6030_v1 = vpop.eup %5127  ;;  %1939 = vmatpush.msrb.mxu3 %v5016_v51  ;;  %v1633_v51 = vpop.f32.mrf.mxu3 }
 0x45f   : >> { %v1704_v15 = vsel %vm1035_vm3, %v6030_v1, 0.0 }
 0x460   : >> { %1705 = vadd.xlane.f32.xlu0 %v1704_v15  ;;  %v6048_v15 = vmul.f32 0.17677669, %v1633_v51 }
 0x463   : >> { %v5025_v19 = vpop.permute.xlu2 %5024 }
 0x464   : >> { %v5027_v12 = vunpack.i.h.bf16 %v5025_v19  ;;  %v5026_v24 = vunpack.i.l.bf16 %v5025_v19 }
 0x466   : >> { %1993 = vmatpush.msrb.mxu1 %v5027_v12  ;;  %2047 = vmatpush.msra.mxu3 %v5026_v24 }
 0x468   : >> { %1645 = vmax.xlane.f32.xlu0 %v1644_v27 }
 0x46b   : >> { %v1661_v36 = vpop.xlane.xlu0 %1660  ;;  %v6052_v3 = vpop.permute.xlu2 %2052 }
 0x46c   : >> { %v1673_v31 = vsub.f32 %v1641_v47, %v1661_v36  ;;  %v5022_v47 = vunpack.i.h.bf16 %v5971_v20  ;;  %v1665_v20 = vsel %vm1035_vm3, %v6048_v15, -inf }
 0x46e   : >> { %v1686_v59 = vmul.f32 1.442695, %v1673_v31 }
 0x470   : >> { %5129 = vpow2.f32 %v1686_v59  ;;  %1648 = vmax.xlane.f32.xlu0 %v1647_v54 }
 0x473   : >> { %v6054_v2 = vpop.permute.xlu2 %2082 }
 0x476   : >> { %v6036_v48 = vpop.eup %5129 }
 0x477   : >> { %v1707_v5 = vsel %vm1035_vm3, %v6036_v48, 0.0 }
 0x478   : >> { %1708 = vadd.xlane.f32.xlu1 %v1707_v5 }
 0x47e   : >> { %v5010_v43 = vpop.permute.xlu0 %5009 }
 0x47f   : >> { %v5012_v53 = vunpack.i.h.bf16 %v5010_v43  ;;  %v5011_v9 = vunpack.i.l.bf16 %v5010_v43  ;;  %v5028_v43 = vpack.i.bf16 %v5907_v57, %v5854_v14 }
 0x480   : >> { %1651 = vmax.xlane.f32.xlu1 %v1650_v7 }
 0x481   : >> { %1858 = vmatpush.msra.mxu0 %v5012_v53  ;;  %1912 = vmatpush.msra.mxu2 %v5011_v9 }
 0x483   : >> { %1966 = vmatpush.msrb.mxu0 %v5022_v47  ;;  %2020 = vmatpush.msrb.mxu2 %v5017_v11 }
 0x484   : >> { %2166 = vrot.lane.b32.xlu0 %v5731_v33, %s5454_s13 }
 0x486   : >> { %v6060_v36 = vpop.permute.xlu0 %2110 }
 0x488   : >> { %1663 = vmax.xlane.f32.xlu1 %v1662_v56 }
 0x48e   : >> { %v6064_v59 = vpop.permute.xlu0 %2054 }
 0x490   : >> { %1666 = vmax.xlane.f32.xlu1 %v1665_v20  ;;  %v5043_v20 = vpack.i.bf16 %v5948_v8, %v5934_v60 }
 0x496   : >> { %v6066_v54 = vpop.permute.xlu0 %2138 }
 0x4a9   : >> { %2136 = vrot.lane.b32.xlu1 %v5725_v30, %s5454_s13 }
 0x4ac   : >> { %v1655_v19 = vpop.xlane.xlu2 %1654 }
 0x4ad   : >> { %v1671_v12 = vsub.f32 %v1639_v49, %v1655_v19  ;;  %v6074_v49 = vpop.permute.xlu1 %2108 }
 0x4af   : >> { %v1682_v24 = vmul.f32 1.442695, %v1671_v12 }
 0x4b1   : >> { %5131 = vpow2.f32 %v1682_v24 }
 0x4b5   : >> { %v6079_v7 = vpop.permute.xlu1 %2222 }
 0x4b7   : >> { %v6058_v27 = vpop.eup %5131 }
 0x4b8   : >> { %v1701_v31 = vsel %vm1035_vm3, %v6058_v27, 0.0 }
 0x4b9   : >> { %1702 = vadd.xlane.f32.xlu0 %v1701_v31 }
 0x4cd   : >> { %2080 = vrot.lane.b32.xlu0 %v5705_v22, %s5454_s13 }
 0x4d3   : >> { %v6070_v62 = vpop.xlane.xlu0 %1705 }
 0x4d4   : >> { %vm1781_vm1 = vweird.f32 %v6070_v62 }
 0x4d5   : >> { %2194 = vrot.lane.b32.xlu0 %v5739_v37, %s5454_s13 }
 0x4db   : >> { %v1646_v5 = vpop.xlane.xlu0 %1645 }
 0x4dc   : >> { %v1668_v53 = vsub.f32 %v1636_v13, %v1646_v5 }
 0x4dd   : >> { %5029 = vrot.lane.b32.xlu0 %v5028_v43, %s5454_s13 }
 0x4de   : >> { %v1676_v9 = vmul.f32 1.442695, %v1668_v53 }
 0x4e0   : >> { %5133 = vpow2.f32 %v1676_v9 }
 0x4e3   : >> { %v1649_v47 = vpop.xlane.xlu0 %1648 }
 0x4e4   : >> { %v1669_v10 = vsub.f32 %v1637_v16, %v1649_v47 }
 0x4e5   : >> { %2686 = vrot.lane.b32.xlu0 %v5691_v17, %s5455_s24 }
 0x4e6   : >> { %v6083_v11 = vpop.eup %5133  ;;  %v1678_v56 = vmul.f32 1.442695, %v1669_v10 }
 0x4e7   : >> { %v1692_v51 = vsel %vm1035_vm3, %v6083_v11, 0.0 }
 0x4e8   : >> { %5135 = vpow2.f32 %v1678_v56  ;;  %1693 = vadd.xlane.f32.xlu1 %v1692_v51 }
 0x4eb   : >> { %v6087_v13 = vpop.xlane.xlu1 %1708 }
 0x4ed   : >> { %5044 = vrot.lane.b32.xlu0 %v5043_v20, %s5454_s13 }
 0x4ee   : >> { %v6092_v16 = vpop.eup %5135 }
 0x4ef   : >> { %v1695_v17 = vsel %vm1035_vm3, %v6092_v16, 0.0 }
 0x4f0   : >> { %1696 = vadd.xlane.f32.xlu1 %v1695_v17 }
 0x4f3   : >> { %v1652_v19 = vpop.xlane.xlu1 %1651 }
 0x4f4   : >> { %v1670_v12 = vsub.f32 %v1638_v63, %v1652_v19 }
 0x4f6   : >> { %v1680_v24 = vmul.f32 1.442695, %v1670_v12  ;;  %v6110_v63 = vpop.permute.xlu0 %2166 }
 0x4f8   : >> { %5137 = vpow2.f32 %v1680_v24 }
 0x4fb   : >> { %v1664_v43 = vpop.xlane.xlu1 %1663 }
 0x4fc   : >> { %v1674_v9 = vsub.f32 %v6042_v35, %v1664_v43 }
 0x4fe   : >> { %v6096_v31 = vpop.eup %5137  ;;  %v1688_v10 = vmul.f32 1.442695, %v1674_v9 }
 0x4ff   : >> { %v1698_v5 = vsel %vm1035_vm3, %v6096_v31, 0.0 }
 0x500   : >> { %1699 = vadd.xlane.f32.xlu2 %v1698_v5 }
 0x503   : >> { %v1667_v56 = vpop.xlane.xlu1 %1666 }
 0x504   : >> { %v1675_v17 = vsub.f32 %v6048_v15, %v1667_v56 }
 0x506   : >> { %v1690_v24 = vmul.f32 1.442695, %v1675_v17 }
 0x509   : >> { %2164 = vrot.lane.b32.xlu1 %v5733_v34, %s5454_s13 }
 0x511   : >> { %2248 = vrot.lane.b32.xlu1 %v5757_v46, %s5454_s13 }
 0x518   : >> { %2250 = vrot.lane.b32.xlu2 %v5755_v45, %s5454_s13 }
 0x519   : >> { %5039 = vrot.lane.b32.xlu1 %v5992_v50, %s5454_s13 }
 0x521   : >> { %2742 = vrot.lane.b32.xlu1 %v5713_v25, %s5455_s24 }
 0x52c   : >> { %v1703_v53 = vpop.xlane.xlu0 %1702 }
 0x52d   : >> { %5139 = vrcp.f32 %v1703_v53  ;;  %v1772_v19 = vand.u32 2147483648, %v1703_v53  ;;  %v1770_v12 = vand.u32 2147483647, %v1703_v53  ;;  %vm1766_vm9 = vweird.f32 %v1703_v53 }
 0x52e   : >> { %5141 = vpow2.f32 %v1688_v10  ;;  %v6126_v10 = vpop.permute.xlu1 %2136 }
 0x52f   : >> { %v1773_v5 = vor.u32 1.1754944e-38, %v1772_v19  ;;  %vm1771_vm11 = vcmp.eq.f32.partialorder %v1770_v12, 8.507059e+37  ;;  %5143 = vpow2.f32 %v1690_v24 }
 0x530   : >> { %5145 = vrcp.f32 %v6070_v62 }
 0x533   : >> { %v5140_v47 = vpop.eup %5139 }
 0x534   : >> { %v1762_v51 = vmul.f32 %v5140_v47, %v1703_v53  ;;  %vm1767_vm8 = vweird.f32 %v5140_v47  ;;  %v6114_v35 = vpop.eup %5141 }
 0x535   : >> { %vm1768_vm10 = vmor %vm1766_vm9, %vm1767_vm8  ;;  %v1710_v15 = vsel %vm1035_vm3, %v6114_v35, 0.0  ;;  %v6122_v53 = vpop.eup %5143 }
 0x536   : >> { %v1763_v20 = vsub.f32 1.0, %v1762_v51 }
 0x538   : >> { %v1764_v50 = vmul.f32 %v5140_v47, %v1763_v20 }
 0x53a   : >> { %v1765_v25 = vadd.f32 %v5140_v47, %v1764_v50 }
 0x53c   : >> { %v1769_v32 = vsel %vm1768_vm10, %v5140_v47, %v1765_v25  ;;  %v1713_v47 = vsel %vm1035_vm3, %v6122_v53, 0.0 }
 0x53d   : >> { %v1774_v43 = vsel %vm1771_vm11, %v1773_v5, %v1769_v32  ;;  %v5146_v32 = vpop.eup %5145  ;;  %vm1796_vm11 = vweird.f32 %v6087_v13 }
 0x53e   : >> { %v1775_v9 = vmul.f32 %v6058_v27, %v1774_v43  ;;  %v1777_v56 = vmul.f32 %v5146_v32, %v6070_v62  ;;  %vm1782_vm14 = vweird.f32 %v5146_v32 }
 0x53f   : >> { %v6137_v5 = vpop.permute.xlu0 %2080  ;;  %vm6145_vm4 = vmor %vm1781_vm1, %vm1782_vm14 }
 0x540   : >> { %4869 = vmatmul.msk.f32.vlgmr.msrb.gmra.mxu3 %vm1035_vm3, %v1775_v9  ;;  %v1778_v51 = vsub.f32 1.0, %v1777_v56 }
 0x541   : >> { %4880 = vmatpush.xpose.msk.msrb.mxu3 %vm818_vm2, %v6066_v54  ;;  %1711 = vadd.xlane.f32.xlu2 %v1710_v15 }
 0x542   : >> { %v1779_v12 = vmul.f32 %v5146_v32, %v1778_v51  ;;  %v6141_v51 = vpop.permute.xlu2 %2220 }
 0x544   : >> { %v1780_v56 = vadd.f32 %v5146_v32, %v1779_v12 }
 0x549   : >> { %1714 = vadd.xlane.f32.xlu2 %v1713_v47 }
 0x55b   : >> { %v1694_v27 = vpop.xlane.xlu1 %1693 }
 0x55c   : >> { %5147 = vrcp.f32 %v1694_v27  ;;  %v1727_v25 = vand.u32 2147483648, %v1694_v27  ;;  %v1725_v9 = vand.u32 2147483647, %v1694_v27  ;;  %vm1721_vm13 = vweird.f32 %v1694_v27 }
 0x55d   : >> { %5149 = vrcp.f32 %v6087_v13 }
 0x55e   : >> { %vm1726_vm0 = vcmp.eq.f32.partialorder %v1725_v9, 8.507059e+37 }
 0x561   : >> { %2192 = vrot.lane.b32.xlu2 %v5741_v38, %s5454_s13 }
 0x562   : >> { %v5148_v54 = vpop.eup %5147 }
 0x563   : >> { %v1717_v20 = vmul.f32 %v5148_v54, %v1694_v27  ;;  %v1697_v17 = vpop.xlane.xlu1 %1696  ;;  %v6133_v19 = vpop.eup %5149  ;;  %vm1722_vm12 = vweird.f32 %v5148_v54 }
 0x564   : >> { %5151 = vrcp.f32 %v1697_v17  ;;  %v1792_v24 = vmul.f32 %v6133_v19, %v6087_v13  ;;  %vm1723_vm15 = vmor %vm1721_vm13, %vm1722_vm12  ;;  %v1740_v4 = vand.u32 2147483647, %v1697_v17  ;;  %vm1736_vm7 = vweird.f32 %v1697_v17 }
 0x565   : >> { %v1718_v50 = vsub.f32 1.0, %v1717_v20  ;;  %v1728_v20 = vor.u32 1.1754944e-38, %v1727_v25  ;;  %vm1797_vm9 = vweird.f32 %v6133_v19 }
 0x566   : >> { %v1793_v55 = vsub.f32 1.0, %v1792_v24  ;;  %v1784_v24 = vsel %vm6145_vm4, %v5146_v32, %v1780_v56  ;;  %vm1741_vm10 = vcmp.eq.f32.partialorder %v1740_v4, 8.507059e+37  ;;  %vm1798_vm12 = vmor %vm1796_vm11, %vm1797_vm9 }
 0x567   : >> { %v1719_v43 = vmul.f32 %v5148_v54, %v1718_v50  ;;  %v1787_v50 = vand.u32 2147483648, %v6070_v62 }
 0x568   : >> { %v1794_v9 = vmul.f32 %v6133_v19, %v1793_v55 }
 0x569   : >> { %v1720_v15 = vadd.f32 %v5148_v54, %v1719_v43  ;;  %5034 = vrot.lane.b32.xlu2 %v5898_v58, %s5454_s13  ;;  %v1785_v58 = vand.u32 2147483647, %v6070_v62  ;;  %v2195_v62 = vpop.permute.xlu0 %2194 }
 0x56a   : >> { %v5152_v47 = vpop.eup %5151  ;;  %v1795_v55 = vadd.f32 %v6133_v19, %v1794_v9 }
 0x56b   : >> { %v1724_v6 = vsel %vm1723_vm15, %v5148_v54, %v1720_v15  ;;  %v1732_v44 = vmul.f32 %v5152_v47, %v1697_v17  ;;  %v1742_v54 = vand.u32 2147483648, %v1697_v17  ;;  %vm1737_vm5 = vweird.f32 %v5152_v47 }
 0x56c   : >> { %v1729_v43 = vsel %vm1726_vm0, %v1728_v20, %v1724_v6  ;;  %v1788_v6 = vor.u32 1.1754944e-38, %v1787_v50  ;;  %vm1786_vm6 = vcmp.eq.f32.partialorder %v1785_v58, 8.507059e+37  ;;  %vm1738_vm8 = vmor %vm1736_vm7, %vm1737_vm5  ;;  %v1802_v50 = vand.u32 2147483648, %v6087_v13 }
 0x56d   : >> { %v1733_v12 = vsub.f32 1.0, %v1732_v44  ;;  %v1730_v25 = vmul.f32 %v6083_v11, %v1729_v43  ;;  %v1743_v32 = vor.u32 1.1754944e-38, %v1742_v54  ;;  %v1800_v17 = vand.u32 2147483647, %v6087_v13 }
 0x56e   : >> { %v1789_v11 = vsel %vm1786_vm6, %v1788_v6, %v1784_v24  ;;  %v1799_v27 = vsel %vm1798_vm12, %v6133_v19, %v1795_v55  ;;  %v1803_v4 = vor.u32 1.1754944e-38, %v1802_v50 }
 0x56f   : >> { %v1734_v15 = vmul.f32 %v5152_v47, %v1733_v12  ;;  %4866 = vmatmul.msk.f32.vlgmr.msra.gmra.mxu0 %vm1035_vm3, %v1730_v25  ;;  %v1790_v43 = vmul.f32 %v6030_v1, %v1789_v11  ;;  %vm1801_vm13 = vcmp.eq.f32.partialorder %v1800_v17, 8.507059e+37 }
 0x570   : >> { %4874 = vmatpush.xpose.msk.msra.mxu0 %vm818_vm2, %v6064_v59 }
 0x571   : >> { %v1735_v44 = vadd.f32 %v5152_v47, %v1734_v15  ;;  %2684 = vrot.lane.b32.xlu2 %v5693_v18, %s5455_s24 }
 0x573   : >> { %v1739_v56 = vsel %vm1738_vm8, %v5152_v47, %v1735_v44  ;;  %v1700_v20 = vpop.xlane.xlu2 %1699  ;;  %v1804_v47 = vsel %vm1801_vm13, %v1803_v4, %v1799_v27 }
 0x574   : >> { %v1744_v59 = vsel %vm1741_vm10, %v1743_v32, %v1739_v56  ;;  %5153 = vrcp.f32 %v1700_v20  ;;  %v1805_v19 = vmul.f32 %v6036_v48, %v1804_v47  ;;  %v1757_v25 = vand.u32 2147483648, %v1700_v20 }
 0x575   : >> { %v1745_v18 = vmul.f32 %v6092_v16, %v1744_v59  ;;  %v6173_v16 = vpop.permute.xlu0 %5029  ;;  %v1755_v54 = vand.u32 2147483647, %v1700_v20  ;;  %vm1751_vm15 = vweird.f32 %v1700_v20 }
 0x576   : >> { %v5031_v12 = vunpack.i.l.bf16 %v6173_v16 }
 0x577   : >> { %4867 = vmatmul.msk.f32.vlgmr.msra.gmra.mxu1 %vm1035_vm3, %v1745_v18  ;;  %4870 = vmatmul.msk.f32.vlgmr.msrb.gmra.mxu0 %vm1035_vm3, %v1790_v43  ;;  %vm1756_vm1 = vcmp.eq.f32.partialorder %v1755_v54, 8.507059e+37 }
 0x578   : >> { %4876 = vmatpush.xpose.msk.msra.mxu1 %vm818_vm2, %v6054_v2  ;;  %4882 = vmatpush.xpose.msk.msrb.mxu0 %vm818_vm2, %v6110_v63  ;;  %v1758_v63 = vor.u32 1.1754944e-38, %v1757_v25 }
 0x57a   : >> { %v5154_v13 = vpop.eup %5153 }
 0x57b   : >> { %v1747_v1 = vmul.f32 %v5154_v13, %v1700_v20  ;;  %vm1752_vm14 = vweird.f32 %v5154_v13  ;;  %v2165_v6 = vpop.permute.xlu1 %2164 }
 0x57c   : >> { %vm1753_vm0 = vmor %vm1751_vm15, %vm1752_vm14 }
 0x57d   : >> { %v1748_v58 = vsub.f32 1.0, %v1747_v1  ;;  %v6188_v59 = vpop.permute.xlu0 %2686 }
 0x57f   : >> { %v1749_v24 = vmul.f32 %v5154_v13, %v1748_v58  ;;  %4871 = vmatmul.msk.f32.vlgmr.msrb.gmra.mxu1 %vm1035_vm3, %v1805_v19  ;;  %4875 = vmatmul.msk.f32.vlgmr.msra.gmra.mxu0 %vm818_vm2, %v6052_v3  ;;  %v2251_v3 = vpop.permute.xlu2 %2250 }
 0x580   : >> { %4884 = vmatpush.xpose.msk.msrb.mxu1 %vm818_vm2, %v2195_v62  ;;  %2497 = vmatpush.msra.mxu0 %v5031_v12 }
 0x581   : >> { %v1750_v2 = vadd.f32 %v5154_v13, %v1749_v24 }
 0x583   : >> { %v1754_v9 = vsel %vm1753_vm0, %v5154_v13, %v1750_v2  ;;  %v2249_v19 = vpop.permute.xlu1 %2248 }
 0x584   : >> { %v1759_v48 = vsel %vm1756_vm1, %v1758_v63, %v1754_v9 }
 0x585   : >> { %v1760_v15 = vmul.f32 %v6096_v31, %v1759_v48  ;;  %v5045_v2 = vpop.permute.xlu0 %5044 }
 0x587   : >> { %4868 = vmatmul.msk.f32.vlgmr.msra.gmra.mxu2 %vm1035_vm3, %v1760_v15  ;;  %4877 = vmatmul.msk.f32.vlgmr.msra.gmra.mxu1 %vm818_vm2, %v6137_v5  ;;  %v5032_v15 = vunpack.i.h.bf16 %v6173_v16 }
 0x588   : >> { %4878 = vmatpush.xpose.msk.msra.mxu2 %vm818_vm2, %v6060_v36  ;;  %4883 = vmatmul.msk.f32.vlgmr.msrb.gmra.mxu0 %vm818_vm2, %v2165_v6  ;;  %v5046_v6 = vunpack.i.l.bf16 %v5045_v2 }
 0x5b4   : >> { %v1712_v62 = vpop.xlane.xlu2 %1711 }
 0x5b5   : >> { %5155 = vrcp.f32 %v1712_v62  ;;  %v1817_v31 = vand.u32 2147483648, %v1712_v62  ;;  %v1815_v20 = vand.u32 2147483647, %v1712_v62  ;;  %vm1811_vm5 = vweird.f32 %v1712_v62 }
 0x5b7   : >> { %v1818_v36 = vor.u32 1.1754944e-38, %v1817_v31  ;;  %vm1816_vm7 = vcmp.eq.f32.partialorder %v1815_v20, 8.507059e+37 }
 0x5bb   : >> { %v5156_v44 = vpop.eup %5155 }
 0x5bc   : >> { %v1807_v11 = vmul.f32 %v5156_v44, %v1712_v62  ;;  %v1715_v32 = vpop.xlane.xlu2 %1714  ;;  %vm1812_vm4 = vweird.f32 %v5156_v44 }
 0x5bd   : >> { %5157 = vrcp.f32 %v1715_v32  ;;  %vm1813_vm6 = vmor %vm1811_vm5, %vm1812_vm4  ;;  %v1832_v47 = vand.u32 2147483648, %v1715_v32  ;;  %v1830_v58 = vand.u32 2147483647, %v1715_v32  ;;  %vm1826_vm9 = vweird.f32 %v1715_v32 }
 0x5be   : >> { %v1808_v55 = vsub.f32 1.0, %v1807_v11 }
 0x5bf   : >> { %v1833_v25 = vor.u32 1.1754944e-38, %v1832_v47  ;;  %vm1831_vm11 = vcmp.eq.f32.partialorder %v1830_v58, 8.507059e+37 }
 0x5c0   : >> { %v1809_v56 = vmul.f32 %v5156_v44, %v1808_v55 }
 0x5c2   : >> { %v1810_v50 = vadd.f32 %v5156_v44, %v1809_v56 }
 0x5c3   : >> { %v5158_v5 = vpop.eup %5157 }
 0x5c4   : >> { %v1814_v17 = vsel %vm1813_vm6, %v5156_v44, %v1810_v50  ;;  %v1822_v18 = vmul.f32 %v5158_v5, %v1715_v32  ;;  %v2193_v43 = vpop.permute.xlu2 %2192  ;;  %vm1827_vm8 = vweird.f32 %v5158_v5 }
 0x5c5   : >> { %v1819_v27 = vsel %vm1816_vm7, %v1818_v36, %v1814_v17  ;;  %4885 = vmatmul.msk.f32.vlgmr.msrb.gmra.mxu1 %vm818_vm2, %v2193_v43  ;;  %vm1828_vm10 = vmor %vm1826_vm9, %vm1827_vm8 }
 0x5c6   : >> { %v1823_v4 = vsub.f32 1.0, %v1822_v18  ;;  %v1820_v13 = vmul.f32 %v6114_v35, %v1819_v27  ;;  %v6220_v27 = vpop.f32.mrf.mxu3 }
 0x5c8   : >> { %v1824_v1 = vmul.f32 %v5158_v5, %v1823_v4  ;;  %4872 = vmatmul.msk.f32.vlgmr.msrb.gmra.mxu2 %vm1035_vm3, %v1820_v13 }
 0x5c9   : >> { %4886 = vmatpush.xpose.msk.msrb.mxu2 %vm818_vm2, %v6079_v7  ;;  %v5040_v7 = vpop.permute.xlu1 %5039 }
 0x5ca   : >> { %v1825_v12 = vadd.f32 %v5158_v5, %v1824_v1  ;;  %v5042_v62 = vunpack.i.h.bf16 %v5040_v7  ;;  %v5041_v44 = vunpack.i.l.bf16 %v5040_v7 }
 0x5cc   : >> { %v1829_v24 = vsel %vm1828_vm10, %v5158_v5, %v1825_v12  ;;  %v5035_v54 = vpop.permute.xlu2 %5034 }
 0x5cd   : >> { %v1834_v63 = vsel %vm1831_vm11, %v1833_v25, %v1829_v24  ;;  %v5037_v35 = vunpack.i.h.bf16 %v5035_v54  ;;  %v5036_v9 = vunpack.i.l.bf16 %v5035_v54 }
 0x5ce   : >> { %v1835_v48 = vmul.f32 %v6122_v53, %v1834_v63  ;;  %v5047_v53 = vunpack.i.h.bf16 %v5045_v2 }
 0x5cf   : >> { %2523 = vmatpush.msra.mxu1 %v5036_v9  ;;  %2601 = vmatpush.msrb.mxu0 %v5037_v35 }
 0x5d0   : >> { %4873 = vmatmul.msk.f32.vlgmr.msra.gmra.mxu3 %vm1035_vm3, %v1835_v48  ;;  %4879 = vmatmul.msk.f32.vlgmr.msra.gmra.mxu2 %vm818_vm2, %v6074_v49 }
 0x5d1   : >> { %4888 = vmatpush.xpose.msk.msra.mxu3 %vm818_vm2, %v2251_v3  ;;  %2549 = vmatpush.msra.mxu2 %v5032_v15 }
 0x5d2   : >> { %2627 = vmatpush.msrb.mxu1 %v5046_v6 }
 0x5d4   : >> { %v6236_v48 = vpop.permute.xlu2 %2684 }
 0x5d8   : >> { %4881 = vmatmul.msk.f32.vlgmr.msrb.gmra.mxu3 %vm818_vm2, %v6126_v10  ;;  %4887 = vmatmul.msk.f32.vlgmr.msrb.gmra.mxu2 %vm818_vm2, %v6141_v51 }
 0x5d9   : >> { %2575 = vmatpush.msrb.mxu3 %v5041_v44  ;;  %2653 = vmatpush.msrb.mxu2 %v5042_v62 }
 0x5e0   : >> { %4889 = vmatmul.msk.f32.vlgmr.msra.gmra.mxu3 %vm818_vm2, %v2249_v19 }
 0x5e1   : >> { %2679 = vmatpush.msra.mxu3 %v5047_v53 }
 0x5ec   : >> { %v6206_v49 = vpop.f32.mrf.mxu0 }
 0x5f4   : >> { %v6208_v16 = vpop.f32.mrf.mxu1  ;;  %v6210_v3 = vpop.f32.mrf.mxu0 }
 0x5fc   : >> { %v6212_v11 = vpop.f32.mrf.mxu1  ;;  %v2077_v32 = vpop.f32.mrf.mxu0 }
 0x5fd   : >> { %v2276_v55 = vmul.f32 0.17677669, %v2077_v32 }
 0x5ff   : >> { %v2284_v10 = vsel %vm1035_vm3, %v2276_v55, -inf }
 0x600   : >> { %2285 = vmax.xlane.f32.xlu0 %v2284_v10 }
 0x604   : >> { %v2105_v51 = vpop.f32.mrf.mxu1 }
 0x605   : >> { %v2277_v31 = vmul.f32 0.17677669, %v2105_v51  ;;  %v2189_v56 = vpop.f32.mrf.mxu0 }
 0x606   : >> { %v2280_v20 = vmul.f32 0.17677669, %v2189_v56 }
 0x607   : >> { %v2287_v50 = vsel %vm1035_vm3, %v2277_v31, -inf }
 0x608   : >> { %v2296_v5 = vsel %vm1035_vm3, %v2280_v20, -inf  ;;  %2288 = vmax.xlane.f32.xlu2 %v2287_v50 }
 0x609   : >> { %2297 = vmax.xlane.f32.xlu0 %v2296_v5 }
 0x60a   : >> { %v6217_v17 = vpop.f32.mrf.mxu2 }
 0x642   : >> { %v2217_v36 = vpop.f32.mrf.mxu1 }
 0x643   : >> { %v2281_v18 = vmul.f32 0.17677669, %v2217_v36  ;;  %v6250_v36 = vpop.permute.xlu1 %2742 }
 0x645   : >> { %v2299_v43 = vsel %vm1035_vm3, %v2281_v18, -inf }
 0x646   : >> { %2300 = vmax.xlane.f32.xlu0 %v2299_v43 }
 0x64b   : >> { %v6222_v4 = vpop.f32.mrf.mxu2 }
 0x653   : >> { %v6224_v13 = vpop.f32.mrf.mxu3  ;;  %v2133_v47 = vpop.f32.mrf.mxu2 }
 0x654   : >> { %v2278_v1 = vmul.f32 0.17677669, %v2133_v47 }
 0x656   : >> { %v2290_v58 = vsel %vm1035_vm3, %v2278_v1, -inf }
 0x657   : >> { %2291 = vmax.xlane.f32.xlu1 %v2290_v58 }
 0x65a   : >> { %2740 = vrot.lane.b32.xlu0 %v5715_v26, %s5455_s24 }
 0x65b   : >> { %v2161_v19 = vpop.f32.mrf.mxu3  ;;  %v2245_v12 = vpop.f32.mrf.mxu2 }
 0x65c   : >> { %v2279_v25 = vmul.f32 0.17677669, %v2161_v19  ;;  %v2282_v24 = vmul.f32 0.17677669, %v2245_v12 }
 0x65e   : >> { %v2293_v54 = vsel %vm1035_vm3, %v2279_v25, -inf  ;;  %v2302_v2 = vsel %vm1035_vm3, %v2282_v24, -inf }
 0x65f   : >> { %2294 = vmax.xlane.f32.xlu1 %v2293_v54  ;;  %2303 = vmax.xlane.f32.xlu2 %v2302_v2 }
 0x663   : >> { %v2273_v63 = vpop.f32.mrf.mxu3 }
 0x664   : >> { %v2283_v35 = vmul.f32 0.17677669, %v2273_v63 }
 0x666   : >> { %v2305_v9 = vsel %vm1035_vm3, %v2283_v35, -inf }
 0x667   : >> { %2306 = vmax.xlane.f32.xlu1 %v2305_v9 }
 0x673   : >> { %v2286_v26 = vpop.xlane.xlu0 %2285 }
 0x674   : >> { %v2308_v15 = vsub.f32 %v2276_v55, %v2286_v26 }
 0x676   : >> { %v2316_v6 = vmul.f32 1.442695, %v2308_v15 }
 0x677   : >> { %2714 = vrot.lane.b32.xlu2 %v5703_v21, %s5455_s24 }
 0x678   : >> { %5159 = vpow2.f32 %v2316_v6 }
 0x67b   : >> { %v2289_v62 = vpop.xlane.xlu2 %2288 }
 0x67c   : >> { %v2298_v7 = vpop.xlane.xlu0 %2297  ;;  %v2309_v53 = vsub.f32 %v2277_v31, %v2289_v62 }
 0x67d   : >> { %v2312_v44 = vsub.f32 %v2280_v20, %v2298_v7 }
 0x67e   : >> { %v6238_v10 = vpop.eup %5159  ;;  %v2318_v51 = vmul.f32 1.442695, %v2309_v53 }
 0x67f   : >> { %v2324_v32 = vmul.f32 1.442695, %v2312_v44  ;;  %v2332_v21 = vsel %vm1035_vm3, %v6238_v10, 0.0 }
 0x680   : >> { %2712 = vrot.lane.b32.xlu1 %v5705_v22, %s5455_s24 }
 0x681   : >> { %5161 = vpow2.f32 %v2324_v32 }
 0x682   : >> { %5163 = vpow2.f32 %v2318_v51 }
 0x687   : >> { %v6242_v22 = vpop.eup %5161 }
 0x688   : >> { %v6244_v56 = vpop.eup %5163  ;;  %v2344_v55 = vsel %vm1035_vm3, %v6242_v22, 0.0 }
 0x689   : >> { %v2335_v31 = vsel %vm1035_vm3, %v6244_v56, 0.0 }
 0x6a0   : >> { %2333 = vadd.xlane.f32.xlu2 %v2332_v21 }
 0x6a8   : >> { %2345 = vadd.xlane.f32.xlu2 %v2344_v55 }
 0x6aa   : >> { %2336 = vadd.xlane.f32.xlu1 %v2335_v31 }
 0x6b9   : >> { %v2301_v20 = vpop.xlane.xlu0 %2300 }
 0x6ba   : >> { %v2313_v50 = vsub.f32 %v2281_v18, %v2301_v20 }
 0x6bc   : >> { %v2326_v5 = vmul.f32 1.442695, %v2313_v50 }
 0x6be   : >> { %5165 = vpow2.f32 %v2326_v5 }
 0x6c4   : >> { %v6252_v43 = vpop.eup %5165 }
 0x6c5   : >> { %v2347_v47 = vsel %vm1035_vm3, %v6252_v43, 0.0 }
 0x6c6   : >> { %2348 = vadd.xlane.f32.xlu2 %v2347_v47 }
 0x6ca   : >> { %v2292_v58 = vpop.xlane.xlu1 %2291 }
 0x6cb   : >> { %v2310_v19 = vsub.f32 %v2278_v1, %v2292_v58 }
 0x6cd   : >> { %v2320_v12 = vmul.f32 1.442695, %v2310_v19 }
 0x6cf   : >> { %5167 = vpow2.f32 %v2320_v12 }
 0x6d2   : >> { %v2295_v54 = vpop.xlane.xlu1 %2294  ;;  %v2304_v2 = vpop.xlane.xlu2 %2303 }
 0x6d3   : >> { %v2311_v63 = vsub.f32 %v2279_v25, %v2295_v54  ;;  %v2314_v9 = vsub.f32 %v2282_v24, %v2304_v2 }
 0x6d5   : >> { %v6256_v26 = vpop.eup %5167  ;;  %v2322_v18 = vmul.f32 1.442695, %v2311_v63  ;;  %v2328_v15 = vmul.f32 1.442695, %v2314_v9 }
 0x6d6   : >> { %v2338_v6 = vsel %vm1035_vm3, %v6256_v26, 0.0 }
 0x6d7   : >> { %5169 = vpow2.f32 %v2322_v18  ;;  %2339 = vadd.xlane.f32.xlu0 %v2338_v6 }
 0x6d8   : >> { %5171 = vpow2.f32 %v2328_v15 }
 0x6da   : >> { %v2307_v7 = vpop.xlane.xlu1 %2306 }
 0x6db   : >> { %v2315_v62 = vsub.f32 %v2283_v35, %v2307_v7 }
 0x6dd   : >> { %v6260_v44 = vpop.eup %5169  ;;  %v2330_v1 = vmul.f32 1.442695, %v2315_v62 }
 0x6de   : >> { %v6262_v53 = vpop.eup %5171  ;;  %2768 = vrot.lane.b32.xlu2 %v5725_v30, %s5455_s24  ;;  %v2341_v25 = vsel %vm1035_vm3, %v6260_v44, 0.0  ;;  %v2715_v30 = vpop.permute.xlu2 %2714 }
 0x6df   : >> { %5173 = vpow2.f32 %v2330_v1  ;;  %v2350_v24 = vsel %vm1035_vm3, %v6262_v53, 0.0  ;;  %2342 = vadd.xlane.f32.xlu0 %v2341_v25 }
 0x6e0   : >> { %2351 = vadd.xlane.f32.xlu1 %v2350_v24 }
 0x6e5   : >> { %v6270_v32 = vpop.eup %5173 }
 0x6e6   : >> { %2854 = vrot.lane.b32.xlu2 %v5747_v41, %s5455_s24  ;;  %v2353_v35 = vsel %vm1035_vm3, %v6270_v32, 0.0 }
 0x6e8   : >> { %2354 = vadd.xlane.f32.xlu1 %v2353_v35 }
 0x6ee   : >> { %2824 = vrot.lane.b32.xlu2 %v5741_v38, %s5455_s24 }
 0x6f2   : >> { %v6292_v38 = vpop.permute.xlu1 %2712 }
 0x6f3   : >> { %2770 = vrot.lane.b32.xlu0 %v5723_v29, %s5455_s24 }
 0x6fb   : >> { %2796 = vrot.lane.b32.xlu0 %v5733_v34, %s5455_s24 }
 0x701   : >> { %2798 = vrot.lane.b32.xlu1 %v5731_v33, %s5455_s24 }
 0x703   : >> { %2826 = vrot.lane.b32.xlu0 %v5739_v37, %s5455_s24 }
 0x709   : >> { %2852 = vrot.lane.b32.xlu1 %v5749_v42, %s5455_s24 }
 0x70b   : >> { %2880 = vrot.lane.b32.xlu0 %v5757_v46, %s5455_s24 }
 0x711   : >> { %2882 = vrot.lane.b32.xlu1 %v5755_v45, %s5455_s24 }
 0x713   : >> { %v2334_v29 = vpop.xlane.xlu2 %2333 }
 0x714   : >> { %5175 = vrcp.f32 %v2334_v29  ;;  %v2367_v21 = vand.u32 2147483648, %v2334_v29  ;;  %v2365_v55 = vand.u32 2147483647, %v2334_v29  ;;  %vm2361_vm13 = vweird.f32 %v2334_v29 }
 0x716   : >> { %v2368_v45 = vor.u32 1.1754944e-38, %v2367_v21  ;;  %vm2366_vm15 = vcmp.eq.f32.partialorder %v2365_v55, 8.507059e+37 }
 0x71a   : >> { %v5176_v34 = vpop.eup %5175 }
 0x71b   : >> { %v2357_v41 = vmul.f32 %v5176_v34, %v2334_v29  ;;  %v2346_v33 = vpop.xlane.xlu2 %2345  ;;  %vm2362_vm12 = vweird.f32 %v5176_v34 }
 0x71c   : >> { %5177 = vrcp.f32 %v2346_v33  ;;  %vm2363_vm14 = vmor %vm2361_vm13, %vm2362_vm12  ;;  %v2427_v54 = vand.u32 2147483648, %v2346_v33  ;;  %v2425_v63 = vand.u32 2147483647, %v2346_v33  ;;  %vm2421_vm1 = vweird.f32 %v2346_v33 }
 0x71d   : >> { %v2358_v51 = vsub.f32 1.0, %v2357_v41  ;;  %v2337_v37 = vpop.xlane.xlu1 %2336 }
 0x71e   : >> { %5179 = vrcp.f32 %v2337_v37  ;;  %v2382_v18 = vand.u32 2147483648, %v2337_v37  ;;  %v2380_v7 = vand.u32 2147483647, %v2337_v37  ;;  %v2428_v62 = vor.u32 1.1754944e-38, %v2427_v54 }
 0x71f   : >> { %v2359_v42 = vmul.f32 %v5176_v34, %v2358_v51  ;;  %vm2426_vm6 = vcmp.eq.f32.partialorder %v2425_v63, 8.507059e+37  ;;  %vm2376_vm7 = vweird.f32 %v2337_v37 }
 0x720   : >> { %v2383_v24 = vor.u32 1.1754944e-38, %v2382_v18  ;;  %vm2381_vm9 = vcmp.eq.f32.partialorder %v2380_v7, 8.507059e+37 }
 0x721   : >> { %v2360_v31 = vadd.f32 %v5176_v34, %v2359_v42 }
 0x722   : >> { %v5178_v46 = vpop.eup %5177 }
 0x723   : >> { %v2364_v20 = vsel %vm2363_vm14, %v5176_v34, %v2360_v31  ;;  %v2417_v50 = vmul.f32 %v5178_v46, %v2346_v33  ;;  %vm2422_vm0 = vweird.f32 %v5178_v46 }
 0x724   : >> { %v5180_v5 = vpop.eup %5179  ;;  %v2369_v47 = vsel %vm2366_vm15, %v2368_v45, %v2364_v20  ;;  %vm2423_vm5 = vmor %vm2421_vm1, %vm2422_vm0 }
 0x725   : >> { %v2418_v58 = vsub.f32 1.0, %v2417_v50  ;;  %v2372_v19 = vmul.f32 %v5180_v5, %v2337_v37  ;;  %v2370_v12 = vmul.f32 %v6238_v10, %v2369_v47  ;;  %vm2377_vm4 = vweird.f32 %v5180_v5  ;;  %v6305_v37 = vpop.permute.xlu0 %2740 }
 0x726   : >> { %vm2378_vm8 = vmor %vm2376_vm7, %vm2377_vm4 }
 0x727   : >> { %v2419_v2 = vmul.f32 %v5178_v46, %v2418_v58  ;;  %v2373_v9 = vsub.f32 1.0, %v2372_v19  ;;  %4890 = vmatmul.msk.f32.vlgmr.msra.gmra.mxu0 %vm1035_vm3, %v2370_v12 }
 0x728   : >> { %4898 = vmatpush.xpose.msk.msra.mxu0 %vm818_vm2, %v6188_v59 }
 0x729   : >> { %v2420_v15 = vadd.f32 %v5178_v46, %v2419_v2  ;;  %v2374_v6 = vmul.f32 %v5180_v5, %v2373_v9 }
 0x72b   : >> { %v2424_v1 = vsel %vm2423_vm5, %v5178_v46, %v2420_v15  ;;  %v2375_v10 = vadd.f32 %v5180_v5, %v2374_v6 }
 0x72c   : >> { %v2429_v25 = vsel %vm2426_vm6, %v2428_v62, %v2424_v1 }
 0x72d   : >> { %v2379_v35 = vsel %vm2378_vm8, %v5180_v5, %v2375_v10  ;;  %v2430_v29 = vmul.f32 %v6242_v22, %v2429_v25 }
 0x72e   : >> { %v2384_v34 = vsel %vm2381_vm9, %v2383_v24, %v2379_v35 }
 0x72f   : >> { %4894 = vmatmul.msk.f32.vlgmr.msrb.gmra.mxu0 %vm1035_vm3, %v2430_v29  ;;  %v2385_v59 = vmul.f32 %v6244_v56, %v2384_v34 }
 0x731   : >> { %4891 = vmatmul.msk.f32.vlgmr.msra.gmra.mxu1 %vm1035_vm3, %v2385_v59 }
 0x732   : >> { %4900 = vmatpush.xpose.msk.msra.mxu1 %vm818_vm2, %v2715_v30 }
 0x737   : >> { %4899 = vmatmul.msk.f32.vlgmr.msra.gmra.mxu0 %vm818_vm2, %v6236_v48 }
 0x739   : >> { %v2349_v41 = vpop.xlane.xlu2 %2348 }
 0x73a   : >> { %5181 = vrcp.f32 %v2349_v41  ;;  %v2442_v22 = vand.u32 2147483648, %v2349_v41  ;;  %v2440_v55 = vand.u32 2147483647, %v2349_v41  ;;  %vm2436_vm11 = vweird.f32 %v2349_v41 }
 0x73c   : >> { %v2443_v56 = vor.u32 1.1754944e-38, %v2442_v22  ;;  %vm2441_vm13 = vcmp.eq.f32.partialorder %v2440_v55, 8.507059e+37 }
 0x740   : >> { %v5182_v33 = vpop.eup %5181 }
 0x741   : >> { %v2432_v51 = vmul.f32 %v5182_v33, %v2349_v41  ;;  %vm2437_vm10 = vweird.f32 %v5182_v33  ;;  %v2769_v10 = vpop.permute.xlu2 %2768 }
 0x742   : >> { %vm2438_vm12 = vmor %vm2436_vm11, %vm2437_vm10 }
 0x743   : >> { %v2433_v21 = vsub.f32 1.0, %v2432_v51 }
 0x745   : >> { %v2434_v42 = vmul.f32 %v5182_v33, %v2433_v21 }
 0x747   : >> { %v2435_v31 = vadd.f32 %v5182_v33, %v2434_v42 }
 0x749   : >> { %v2439_v46 = vsel %vm2438_vm12, %v5182_v33, %v2435_v31 }
 0x74a   : >> { %v2444_v30 = vsel %vm2441_vm13, %v2443_v56, %v2439_v46  ;;  %v2340_v45 = vpop.xlane.xlu0 %2339 }
 0x74b   : >> { %5183 = vrcp.f32 %v2340_v45  ;;  %v2445_v48 = vmul.f32 %v6252_v43, %v2444_v30  ;;  %v2397_v19 = vand.u32 2147483648, %v2340_v45  ;;  %v2395_v54 = vand.u32 2147483647, %v2340_v45 }
 0x74c   : >> { %vm2391_vm15 = vweird.f32 %v2340_v45 }
 0x74d   : >> { %4895 = vmatmul.msk.f32.vlgmr.msrb.gmra.mxu1 %vm1035_vm3, %v2445_v48  ;;  %v2398_v43 = vor.u32 1.1754944e-38, %v2397_v19  ;;  %vm2396_vm1 = vcmp.eq.f32.partialorder %v2395_v54, 8.507059e+37 }
 0x751   : >> { %v5184_v20 = vpop.eup %5183 }
 0x752   : >> { %v2387_v50 = vmul.f32 %v5184_v20, %v2340_v45  ;;  %v2343_v5 = vpop.xlane.xlu0 %2342  ;;  %vm2392_vm14 = vweird.f32 %v5184_v20 }
 0x753   : >> { %v2352_v47 = vpop.xlane.xlu1 %2351  ;;  %5185 = vrcp.f32 %v2343_v5  ;;  %vm2393_vm0 = vmor %vm2391_vm15, %vm2392_vm14  ;;  %v2412_v24 = vand.u32 2147483648, %v2343_v5  ;;  %v2410_v34 = vand.u32 2147483647, %v2343_v5  ;;  %vm2406_vm6 = vweird.f32 %v2343_v5 }
 0x754   : >> { %v2388_v58 = vsub.f32 1.0, %v2387_v50  ;;  %5187 = vrcp.f32 %v2352_v47  ;;  %v2455_v41 = vand.u32 2147483647, %v2352_v47  ;;  %vm2451_vm7 = vweird.f32 %v2352_v47  ;;  %v2855_v50 = vpop.permute.xlu2 %2854 }
 0x755   : >> { %4901 = vmatmul.msk.f32.vlgmr.msra.gmra.mxu1 %vm818_vm2, %v6292_v38  ;;  %v2457_v38 = vand.u32 2147483648, %v2352_v47  ;;  %v2413_v21 = vor.u32 1.1754944e-38, %v2412_v24  ;;  %vm2411_vm10 = vcmp.eq.f32.partialorder %v2410_v34, 8.507059e+37 }
 0x756   : >> { %v2389_v12 = vmul.f32 %v5184_v20, %v2388_v58  ;;  %vm2456_vm11 = vcmp.eq.f32.partialorder %v2455_v41, 8.507059e+37 }
 0x758   : >> { %v2390_v2 = vadd.f32 %v5184_v20, %v2389_v12 }
 0x759   : >> { %v5186_v63 = vpop.eup %5185 }
 0x75a   : >> { %v5188_v9 = vpop.eup %5187  ;;  %v2394_v18 = vsel %vm2393_vm0, %v5184_v20, %v2390_v2  ;;  %v2402_v15 = vmul.f32 %v5186_v63, %v2343_v5  ;;  %vm2407_vm4 = vweird.f32 %v5186_v63 }
 0x75b   : >> { %v2399_v6 = vsel %vm2396_vm1, %v2398_v43, %v2394_v18  ;;  %v2447_v7 = vmul.f32 %v5188_v9, %v2352_v47  ;;  %v2355_v62 = vpop.xlane.xlu1 %2354  ;;  %vm2452_vm5 = vweird.f32 %v5188_v9  ;;  %vm2408_vm8 = vmor %vm2406_vm6, %vm2407_vm4 }
 0x75c   : >> { %v2403_v1 = vsub.f32 1.0, %v2402_v15  ;;  %5189 = vrcp.f32 %v2355_v62  ;;  %v2400_v35 = vmul.f32 %v6256_v26, %v2399_v6  ;;  %vm2453_vm9 = vmor %vm2451_vm7, %vm2452_vm5  ;;  %v2458_v26 = vor.u32 1.1754944e-38, %v2457_v38  ;;  %v2825_v43 = vpop.permute.xlu2 %2824 }
 0x75d   : >> { %v2448_v25 = vsub.f32 1.0, %v2447_v7  ;;  %v2472_v20 = vand.u32 2147483648, %v2355_v62  ;;  %v2470_v47 = vand.u32 2147483647, %v2355_v62  ;;  %vm2466_vm13 = vweird.f32 %v2355_v62 }
 0x75e   : >> { %v2404_v29 = vmul.f32 %v5186_v63, %v2403_v1  ;;  %4892 = vmatmul.msk.f32.vlgmr.msra.gmra.mxu2 %vm1035_vm3, %v2400_v35 }
 0x75f   : >> { %v2449_v59 = vmul.f32 %v5188_v9, %v2448_v25  ;;  %4902 = vmatpush.xpose.msk.msra.mxu2 %vm818_vm2, %v6250_v36  ;;  %vm2471_vm15 = vcmp.eq.f32.partialorder %v2470_v47, 8.507059e+37 }
 0x760   : >> { %v2405_v33 = vadd.f32 %v5186_v63, %v2404_v29 }
 0x761   : >> { %v2450_v51 = vadd.f32 %v5188_v9, %v2449_v59 }
 0x762   : >> { %v5190_v22 = vpop.eup %5189  ;;  %v2409_v42 = vsel %vm2408_vm8, %v5186_v63, %v2405_v33 }
 0x763   : >> { %v2454_v55 = vsel %vm2453_vm9, %v5188_v9, %v2450_v51  ;;  %v2414_v31 = vsel %vm2411_vm10, %v2413_v21, %v2409_v42  ;;  %v2462_v56 = vmul.f32 %v5190_v22, %v2355_v62  ;;  %vm2467_vm12 = vweird.f32 %v5190_v22 }
 0x764   : >> { %v2459_v46 = vsel %vm2456_vm11, %v2458_v26, %v2454_v55  ;;  %v2415_v30 = vmul.f32 %v6260_v44, %v2414_v31  ;;  %vm2468_vm14 = vmor %vm2466_vm13, %vm2467_vm12  ;;  %v2473_v44 = vor.u32 1.1754944e-38, %v2472_v20 }
 0x765   : >> { %v2463_v45 = vsub.f32 1.0, %v2462_v56  ;;  %v2771_v48 = vpop.permute.xlu0 %2770  ;;  %v2460_v36 = vmul.f32 %v6262_v53, %v2459_v46 }
 0x766   : >> { %4893 = vmatmul.msk.f32.vlgmr.msrb.gmra.mxu3 %vm1035_vm3, %v2415_v30 }
 0x767   : >> { %v2464_v5 = vmul.f32 %v5190_v22, %v2463_v45  ;;  %4896 = vmatmul.msk.f32.vlgmr.msrb.gmra.mxu2 %vm1035_vm3, %v2460_v36  ;;  %4904 = vmatpush.xpose.msk.msrb.mxu3 %vm818_vm2, %v2771_v48 }
 0x768   : >> { %4910 = vmatpush.xpose.msk.msrb.mxu2 %vm818_vm2, %v2855_v50 }
 0x769   : >> { %v2465_v58 = vadd.f32 %v5190_v22, %v2464_v5 }
 0x76b   : >> { %v2469_v19 = vsel %vm2468_vm14, %v5190_v22, %v2465_v58 }
 0x76c   : >> { %v2474_v53 = vsel %vm2471_vm15, %v2473_v44, %v2469_v19 }
 0x76d   : >> { %v2797_v12 = vpop.permute.xlu0 %2796  ;;  %v2475_v54 = vmul.f32 %v6270_v32, %v2474_v53 }
 0x76f   : >> { %4897 = vmatmul.msk.f32.vlgmr.msra.gmra.mxu3 %vm1035_vm3, %v2475_v54  ;;  %4903 = vmatmul.msk.f32.vlgmr.msra.gmra.mxu2 %vm818_vm2, %v6305_v37 }
 0x773   : >> { %v2799_v2 = vpop.permute.xlu1 %2798 }
 0x774   : >> { %4906 = vmatpush.xpose.msk.msrb.mxu0 %vm818_vm2, %v2799_v2 }
 0x775   : >> { %v2827_v63 = vpop.permute.xlu0 %2826 }
 0x776   : >> { %4908 = vmatpush.xpose.msk.msrb.mxu1 %vm818_vm2, %v2827_v63 }
 0x777   : >> { %4905 = vmatmul.msk.f32.vlgmr.msrb.gmra.mxu3 %vm818_vm2, %v2769_v10  ;;  %4907 = vmatmul.msk.f32.vlgmr.msrb.gmra.mxu0 %vm818_vm2, %v2797_v12 }
 0x779   : >> { %4909 = vmatmul.msk.f32.vlgmr.msrb.gmra.mxu1 %vm818_vm2, %v2825_v43 }
 0x77b   : >> { %v2853_v9 = vpop.permute.xlu1 %2852 }
 0x77c   : >> { %4911 = vmatmul.msk.f32.vlgmr.msrb.gmra.mxu2 %vm818_vm2, %v2853_v9 }
 0x77d   : >> { %v2881_v37 = vpop.permute.xlu0 %2880 }
 0x783   : >> { %v2883_v32 = vpop.permute.xlu1 %2882 }
 0x784   : >> { %4912 = vmatpush.xpose.msk.msra.mxu3 %vm818_vm2, %v2883_v32 }
 0x787   : >> { %4913 = vmatmul.msk.f32.vlgmr.msra.gmra.mxu3 %vm818_vm2, %v2881_v37 }
 0x7a4   : >> { %v6333_v18 = vpop.f32.mrf.mxu0 }
 0x7ac   : >> { %v6335_v15 = vpop.f32.mrf.mxu0 }
 0x7ae   : >> { %v6338_v1 = vpop.f32.mrf.mxu1 }
 0x7b4   : >> { %v2709_v6 = vpop.f32.mrf.mxu0 }
 0x7b5   : >> { %v2908_v7 = vmul.f32 0.17677669, %v2709_v6 }
 0x7b7   : >> { %v2916_v62 = vsel %vm1035_vm3, %v2908_v7, -inf }
 0x7b8   : >> { %2917 = vmax.xlane.f32.xlu2 %v2916_v62 }
 0x7ca   : >> { %v6340_v10 = vpop.f32.mrf.mxu1 }
 0x7d2   : >> { %v2737_v25 = vpop.f32.mrf.mxu1 }
 0x7d3   : >> { %v2909_v24 = vmul.f32 0.17677669, %v2737_v25  ;;  %v5048_v25 = vpack.i.bf16 %v5865_v23, %v5854_v14 }
 0x7d5   : >> { %v2919_v35 = vsel %vm1035_vm3, %v2909_v24, -inf }
 0x7d6   : >> { %2920 = vmax.xlane.f32.xlu1 %v2919_v35 }
 0x7e1   : >> { %v6343_v38 = vpop.f32.mrf.mxu2 }
 0x7e9   : >> { %v6345_v29 = vpop.f32.mrf.mxu3 }
 0x7ea   : >> { %v5083_v34 = vpack.i.bf16 %v6345_v29, %v6343_v38  ;;  %v6349_v59 = vpop.f32.mrf.mxu2  ;;  %v3454_v38 = vld [vmem:[%s6462_s28 + $0x70] sm:$0xff] }
 0x7f2   : >> { %v6351_v41 = vpop.f32.mrf.mxu3  ;;  %v2765_v33 = vpop.f32.mrf.mxu2 }
 0x7f3   : >> { %v2910_v51 = vmul.f32 0.17677669, %v2765_v33 }
 0x7f4   : >> { %v2821_v21 = vpop.f32.mrf.mxu0 }
 0x7f5   : >> { %v2912_v22 = vmul.f32 0.17677669, %v2821_v21  ;;  %v2922_v26 = vsel %vm1035_vm3, %v2910_v51, -inf }
 0x7f6   : >> { %2923 = vmax.xlane.f32.xlu0 %v2922_v26  ;;  %v2849_v42 = vpop.f32.mrf.mxu1 }
 0x7f7   : >> { %v2928_v55 = vsel %vm1035_vm3, %v2912_v22, -inf  ;;  %v2913_v31 = vmul.f32 0.17677669, %v2849_v42 }
 0x7f8   : >> { %2929 = vmax.xlane.f32.xlu1 %v2928_v55 }
 0x7f9   : >> { %v2931_v45 = vsel %vm1035_vm3, %v2913_v31, -inf }
 0x7fa   : >> { %v2793_v56 = vpop.f32.mrf.mxu3 }
 0x7fb   : >> { %v2911_v46 = vmul.f32 0.17677669, %v2793_v56 }
 0x7fd   : >> { %v2925_v30 = vsel %vm1035_vm3, %v2911_v46, -inf }
 0x7fe   : >> { %2926 = vmax.xlane.f32.xlu2 %v2925_v30  ;;  %2932 = vmax.xlane.f32.xlu0 %v2931_v45 }
 0x7ff   : >> { %v2877_v48 = vpop.f32.mrf.mxu2 }
 0x800   : >> { %v2914_v36 = vmul.f32 0.17677669, %v2877_v48 }
 0x802   : >> { %v2934_v20 = vsel %vm1035_vm3, %v2914_v36, -inf }
 0x806   : >> { %2935 = vmax.xlane.f32.xlu2 %v2934_v20 }
 0x80a   : >> { %v2905_v50 = vpop.f32.mrf.mxu3 }
 0x80b   : >> { %v2915_v5 = vmul.f32 0.17677669, %v2905_v50 }
 0x80d   : >> { %v2937_v47 = vsel %vm1035_vm3, %v2915_v5, -inf }
 0x80e   : >> { %2938 = vmax.xlane.f32.xlu1 %v2937_v47 }
 0x82b   : >> { %v2918_v58 = vpop.xlane.xlu2 %2917 }
 0x82c   : >> { %v2940_v44 = vsub.f32 %v2908_v7, %v2918_v58 }
 0x82e   : >> { %v2948_v19 = vmul.f32 1.442695, %v2940_v44 }
 0x830   : >> { %5191 = vpow2.f32 %v2948_v19 }
 0x836   : >> { %v6359_v53 = vpop.eup %5191 }
 0x837   : >> { %v2964_v12 = vsel %vm1035_vm3, %v6359_v53, 0.0 }
 0x838   : >> { %2965 = vadd.xlane.f32.xlu0 %v2964_v12 }
 0x849   : >> { %v2921_v54 = vpop.xlane.xlu1 %2920 }
 0x84a   : >> { %v2941_v2 = vsub.f32 %v2909_v24, %v2921_v54 }
 0x84c   : >> { %v2950_v63 = vmul.f32 1.442695, %v2941_v2 }
 0x84e   : >> { %5193 = vpow2.f32 %v2950_v63 }
 0x854   : >> { %v6363_v43 = vpop.eup %5193 }
 0x855   : >> { %v2967_v9 = vsel %vm1035_vm3, %v6363_v43, 0.0 }
 0x856   : >> { %2968 = vadd.xlane.f32.xlu2 %v2967_v9 }
 0x869   : >> { %v2924_v32 = vpop.xlane.xlu0 %2923 }
 0x86a   : >> { %v2942_v37 = vsub.f32 %v2910_v51, %v2924_v32 }
 0x86b   : >> { %v2930_v6 = vpop.xlane.xlu1 %2929 }
 0x86c   : >> { %v2952_v7 = vmul.f32 1.442695, %v2942_v37  ;;  %v2944_v62 = vsub.f32 %v2912_v22, %v2930_v6 }
 0x86e   : >> { %5195 = vpow2.f32 %v2952_v7  ;;  %v2956_v35 = vmul.f32 1.442695, %v2944_v62  ;;  %5049 = vrot.lane.b32.xlu2 %v5048_v25, %s5455_s24 }
 0x870   : >> { %5197 = vpow2.f32 %v2956_v35 }
 0x871   : >> { %v2927_v24 = vpop.xlane.xlu2 %2926  ;;  %v2933_v33 = vpop.xlane.xlu0 %2932 }
 0x872   : >> { %v2945_v21 = vsub.f32 %v2913_v31, %v2933_v33  ;;  %v2943_v22 = vsub.f32 %v2911_v46, %v2927_v24 }
 0x874   : >> { %v6370_v26 = vpop.eup %5195  ;;  %v2958_v42 = vmul.f32 1.442695, %v2945_v21  ;;  %v2954_v23 = vmul.f32 1.442695, %v2943_v22 }
 0x875   : >> { %v2970_v51 = vsel %vm1035_vm3, %v6370_v26, 0.0 }
 0x876   : >> { %v6374_v55 = vpop.eup %5197  ;;  %2971 = vadd.xlane.f32.xlu1 %v2970_v51  ;;  %5199 = vpow2.f32 %v2958_v42 }
 0x877   : >> { %v2976_v14 = vsel %vm1035_vm3, %v6374_v55, 0.0  ;;  %5201 = vpow2.f32 %v2954_v23 }
 0x878   : >> { %2977 = vadd.xlane.f32.xlu0 %v2976_v14 }
 0x879   : >> { %v2936_v56 = vpop.xlane.xlu2 %2935 }
 0x87a   : >> { %v2946_v31 = vsub.f32 %v2914_v36, %v2936_v56  ;;  %v5053_v36 = vpack.i.bf16 %v5916_v52, %v5907_v57  ;;  %v5063_v57 = vpack.i.bf16 %v6208_v16, %v6206_v49  ;;  %v5068_v52 = vpack.i.bf16 %v6338_v1, %v6333_v18 }
 0x87c   : >> { %v6378_v30 = vpop.eup %5199  ;;  %v2960_v48 = vmul.f32 1.442695, %v2946_v31 }
 0x87d   : >> { %v2979_v45 = vsel %vm1035_vm3, %v6378_v30, 0.0  ;;  %v6382_v50 = vpop.eup %5201 }
 0x87e   : >> { %5203 = vpow2.f32 %v2960_v48  ;;  %v2973_v47 = vsel %vm1035_vm3, %v6382_v50, 0.0 }
 0x880   : >> { %2980 = vadd.xlane.f32.xlu0 %v2979_v45 }
 0x881   : >> { %v2939_v20 = vpop.xlane.xlu1 %2938 }
 0x882   : >> { %v2947_v46 = vsub.f32 %v2915_v5, %v2939_v20  ;;  %v5058_v5 = vpack.i.bf16 %v5938_v61, %v5934_v60  ;;  %v5078_v60 = vpack.i.bf16 %v6220_v27, %v6217_v17 }
 0x884   : >> { %v2962_v58 = vmul.f32 1.442695, %v2947_v46  ;;  %v6386_v44 = vpop.eup %5203 }
 0x885   : >> { %v2982_v19 = vsel %vm1035_vm3, %v6386_v44, 0.0 }
 0x886   : >> { %5205 = vpow2.f32 %v2962_v58 }
 0x888   : >> { %2974 = vadd.xlane.f32.xlu0 %v2973_v47 }
 0x88c   : >> { %v6393_v12 = vpop.eup %5205 }
 0x88d   : >> { %v2985_v54 = vsel %vm1035_vm3, %v6393_v12, 0.0 }
 0x88f   : >> { %5054 = vrot.lane.b32.xlu1 %v5053_v36, %s5455_s24 }
 0x890   : >> { %2983 = vadd.xlane.f32.xlu0 %v2982_v19 }
 0x897   : >> { %5059 = vrot.lane.b32.xlu1 %v5058_v5, %s5455_s24  ;;  %2986 = vadd.xlane.f32.xlu2 %v2985_v54 }
 0x89f   : >> { %3290 = vrot.lane.b32.xlu1 %v5948_v8, %s5455_s24 }
 0x8a4   : >> { %3212 = vrot.lane.b32.xlu0 %v5881_v39, %s5455_s24 }
 0x8a7   : >> { %5064 = vrot.lane.b32.xlu1 %v5063_v57, %s5455_s24 }
 0x8ab   : >> { %v2966_v61 = vpop.xlane.xlu0 %2965 }
 0x8ac   : >> { %5069 = vrot.lane.b32.xlu0 %v5068_v52, %s5454_s13  ;;  %5207 = vrcp.f32 %v2966_v61  ;;  %v2999_v16 = vand.u32 2147483648, %v2966_v61  ;;  %vm2993_vm1 = vweird.f32 %v2966_v61  ;;  %v2997_v18 = vand.u32 2147483647, %v2966_v61 }
 0x8ae   : >> { %v3000_v32 = vor.u32 1.1754944e-38, %v2999_v16  ;;  %vm2998_vm5 = vcmp.eq.f32.partialorder %v2997_v18, 8.507059e+37 }
 0x8b2   : >> { %v5208_v8 = vpop.eup %5207 }
 0x8b3   : >> { %v2989_v2 = vmul.f32 %v5208_v8, %v2966_v61  ;;  %vm2994_vm0 = vweird.f32 %v5208_v8 }
 0x8b4   : >> { %5079 = vrot.lane.b32.xlu0 %v5078_v60, %s5455_s24  ;;  %vm2995_vm4 = vmor %vm2993_vm1, %vm2994_vm0 }
 0x8b5   : >> { %v2990_v39 = vsub.f32 1.0, %v2989_v2 }
 0x8b7   : >> { %v2991_v63 = vmul.f32 %v5208_v8, %v2990_v39 }
 0x8b9   : >> { %v2992_v9 = vadd.f32 %v5208_v8, %v2991_v63 }
 0x8bb   : >> { %v2996_v1 = vsel %vm2995_vm4, %v5208_v8, %v2992_v9 }
 0x8bc   : >> { %v3001_v27 = vsel %vm2998_vm5, %v3000_v32, %v2996_v1 }
 0x8bd   : >> { %v3002_v35 = vmul.f32 %v6359_v53, %v3001_v27 }
 0x8c9   : >> { %v2969_v49 = vpop.xlane.xlu2 %2968 }
 0x8ca   : >> { %5209 = vrcp.f32 %v2969_v49  ;;  %v3014_v24 = vand.u32 2147483648, %v2969_v49  ;;  %v3012_v21 = vand.u32 2147483647, %v2969_v49  ;;  %vm3008_vm7 = vweird.f32 %v2969_v49 }
 0x8cc   : >> { %v3015_v51 = vor.u32 1.1754944e-38, %v3014_v24  ;;  %vm3013_vm9 = vcmp.eq.f32.partialorder %v3012_v21, 8.507059e+37 }
 0x8d0   : >> { %v5210_v17 = vpop.eup %5209 }
 0x8d1   : >> { %v3004_v37 = vmul.f32 %v5210_v17, %v2969_v49  ;;  %v5050_v6 = vpop.permute.xlu2 %5049  ;;  %vm3009_vm6 = vweird.f32 %v5210_v17 }
 0x8d2   : >> { %v5052_v7 = vunpack.i.h.bf16 %v5050_v6  ;;  %v5051_v62 = vunpack.i.l.bf16 %v5050_v6  ;;  %vm3010_vm8 = vmor %vm3008_vm7, %vm3009_vm6 }
 0x8d3   : >> { %v3005_v25 = vsub.f32 1.0, %v3004_v37 }
 0x8d4   : >> { %3129 = vmatpush.msra.mxu0 %v5051_v62  ;;  %3155 = vmatpush.msra.mxu1 %v5052_v7 }
 0x8d5   : >> { %v3006_v33 = vmul.f32 %v5210_v17, %v3005_v25  ;;  %4914 = vmatmul.msk.f32.vlgmr.msra.gmra.mxu0 %vm1035_vm3, %v3002_v35 }
 0x8d7   : >> { %v3007_v42 = vadd.f32 %v5210_v17, %v3006_v33 }
 0x8d9   : >> { %v3011_v22 = vsel %vm3010_vm8, %v5210_v17, %v3007_v42 }
 0x8da   : >> { %v3016_v14 = vsel %vm3013_vm9, %v3015_v51, %v3011_v22 }
 0x8db   : >> { %v3017_v23 = vmul.f32 %v6363_v43, %v3016_v14 }
 0x8dd   : >> { %4915 = vmatmul.msk.f32.vlgmr.msra.gmra.mxu1 %vm1035_vm3, %v3017_v23 }
 0x8e9   : >> { %v2972_v53 = vpop.xlane.xlu1 %2971 }
 0x8ea   : >> { %5211 = vrcp.f32 %v2972_v53  ;;  %v3029_v36 = vand.u32 2147483648, %v2972_v53  ;;  %vm3023_vm11 = vweird.f32 %v2972_v53  ;;  %v3027_v43 = vand.u32 2147483647, %v2972_v53 }
 0x8eb   : >> { %v6417_v56 = vpop.xlane.xlu0 %2977 }
 0x8ec   : >> { %v3030_v60 = vor.u32 1.1754944e-38, %v3029_v36  ;;  %vm3028_vm13 = vcmp.eq.f32.partialorder %v3027_v43, 8.507059e+37  ;;  %vm3053_vm9 = vweird.f32 %v6417_v56  ;;  %v3057_v43 = vand.u32 2147483647, %v6417_v56 }
 0x8f0   : >> { %v5212_v31 = vpop.eup %5211 }
 0x8f1   : >> { %v3019_v45 = vmul.f32 %v5212_v31, %v2972_v53  ;;  %vm3024_vm10 = vweird.f32 %v5212_v31 }
 0x8f2   : >> { %vm3025_vm12 = vmor %vm3023_vm11, %vm3024_vm10 }
 0x8f3   : >> { %v3020_v48 = vsub.f32 1.0, %v3019_v45  ;;  %v2981_v20 = vpop.xlane.xlu0 %2980 }
 0x8f4   : >> { %5213 = vrcp.f32 %v2981_v20  ;;  %v3074_v49 = vand.u32 2147483648, %v2981_v20  ;;  %vm3068_vm15 = vweird.f32 %v2981_v20  ;;  %v3072_v1 = vand.u32 2147483647, %v2981_v20 }
 0x8f5   : >> { %v3021_v46 = vmul.f32 %v5212_v31, %v3020_v48  ;;  %5215 = vrcp.f32 %v6417_v56 }
 0x8f6   : >> { %v3075_v62 = vor.u32 1.1754944e-38, %v3074_v49  ;;  %vm3073_vm1 = vcmp.eq.f32.partialorder %v3072_v1, 8.507059e+37 }
 0x8f7   : >> { %v3022_v47 = vadd.f32 %v5212_v31, %v3021_v46 }
 0x8f9   : >> { %v3026_v57 = vsel %vm3025_vm12, %v5212_v31, %v3022_v47  ;;  %v3059_v47 = vand.u32 2147483648, %v6417_v56 }
 0x8fa   : >> { %v5214_v58 = vpop.eup %5213  ;;  %v3031_v8 = vsel %vm3028_vm13, %v3030_v60, %v3026_v57  ;;  %vm3058_vm13 = vcmp.eq.f32.partialorder %v3057_v43, 8.507059e+37 }
 0x8fb   : >> { %v3064_v19 = vmul.f32 %v5214_v58, %v2981_v20  ;;  %v2975_v5 = vpop.xlane.xlu0 %2974  ;;  %v6420_v54 = vpop.eup %5215  ;;  %vm3069_vm14 = vweird.f32 %v5214_v58  ;;  %v3032_v27 = vmul.f32 %v6370_v26, %v3031_v8 }
 0x8fc   : >> { %5217 = vrcp.f32 %v2975_v5  ;;  %v3049_v2 = vmul.f32 %v6420_v54, %v6417_v56  ;;  %vm3070_vm0 = vmor %vm3068_vm15, %vm3069_vm14  ;;  %v3044_v25 = vand.u32 2147483648, %v2975_v5  ;;  %v3042_v24 = vand.u32 2147483647, %v2975_v5 }
 0x8fd   : >> { %v3065_v52 = vsub.f32 1.0, %v3064_v19  ;;  %vm3038_vm5 = vweird.f32 %v2975_v5  ;;  %vm3054_vm8 = vweird.f32 %v6420_v54 }
 0x8fe   : >> { %v3050_v37 = vsub.f32 1.0, %v3049_v2  ;;  %v3045_v22 = vor.u32 1.1754944e-38, %v3044_v25  ;;  %vm3043_vm7 = vcmp.eq.f32.partialorder %v3042_v24, 8.507059e+37  ;;  %vm6435_vm10 = vmor %vm3053_vm9, %vm3054_vm8 }
 0x8ff   : >> { %v3066_v61 = vmul.f32 %v5214_v58, %v3065_v52  ;;  %v3060_v52 = vor.u32 1.1754944e-38, %v3059_v47 }
 0x900   : >> { %v3051_v33 = vmul.f32 %v6420_v54, %v3050_v37 }
 0x901   : >> { %v3067_v39 = vadd.f32 %v5214_v58, %v3066_v61  ;;  %v5055_v63 = vpop.permute.xlu1 %5054 }
 0x902   : >> { %v5218_v9 = vpop.eup %5217  ;;  %v5057_v16 = vunpack.i.h.bf16 %v5055_v63  ;;  %v5056_v18 = vunpack.i.l.bf16 %v5055_v63  ;;  %v3052_v20 = vadd.f32 %v6420_v54, %v3051_v33  ;;  %v3450_v33 = vld [vmem:[%s6462_s28 + $0x50] sm:$0xff] }
 0x903   : >> { %v3034_v32 = vmul.f32 %v5218_v9, %v2975_v5  ;;  %v2984_v17 = vpop.xlane.xlu0 %2983  ;;  %v3071_v6 = vsel %vm3070_vm0, %v5214_v58, %v3067_v39  ;;  %vm3039_vm4 = vweird.f32 %v5218_v9 }
 0x904   : >> { %5219 = vrcp.f32 %v2984_v17  ;;  %3181 = vmatpush.msra.mxu2 %v5056_v18  ;;  %3207 = vmatpush.msrb.mxu3 %v5057_v16  ;;  %v3076_v21 = vsel %vm3073_vm1, %v3075_v62, %v3071_v6  ;;  %vm3040_vm6 = vmor %vm3038_vm5, %vm3039_vm4  ;;  %v3087_v57 = vand.u32 2147483647, %v2984_v17  ;;  %vm3083_vm12 = vweird.f32 %v2984_v17 }
 0x905   : >> { %v3035_v7 = vsub.f32 1.0, %v3034_v32  ;;  %4916 = vmatmul.msk.f32.vlgmr.msra.gmra.mxu2 %vm1035_vm3, %v3032_v27  ;;  %v3077_v48 = vmul.f32 %v6378_v30, %v3076_v21  ;;  %v3089_v30 = vand.u32 2147483648, %v2984_v17 }
 0x906   : >> { %vm3088_vm15 = vcmp.eq.f32.partialorder %v3087_v57, 8.507059e+37 }
 0x907   : >> { %v3036_v35 = vmul.f32 %v5218_v9, %v3035_v7  ;;  %v3090_v56 = vor.u32 1.1754944e-38, %v3089_v30 }
 0x909   : >> { %v3037_v42 = vadd.f32 %v5218_v9, %v3036_v35  ;;  %v5060_v26 = vpop.permute.xlu1 %5059  ;;  %v5088_v35 = vpack.i.bf16 %v6212_v11, %v6210_v3  ;;  %v3455_v11 = vld [vmem:[%s6462_s28 + $0x78] sm:$0xff] }
 0x90a   : >> { %v5220_v51 = vpop.eup %5219  ;;  %v5062_v14 = vunpack.i.h.bf16 %v5060_v26  ;;  %v5061_v23 = vunpack.i.l.bf16 %v5060_v26  ;;  %v2987_v45 = vpop.xlane.xlu2 %2986  ;;  %v3447_v26 = vld [vmem:[%s6462_s28 + $0x38] sm:$0xff] }
 0x90b   : >> { %v3041_v53 = vsel %vm3040_vm6, %v5218_v9, %v3037_v42  ;;  %v3079_v31 = vmul.f32 %v5220_v51, %v2984_v17  ;;  %5221 = vrcp.f32 %v2987_v45  ;;  %vm3084_vm11 = vweird.f32 %v5220_v51  ;;  %v3449_v42 = vld [vmem:[%s6462_s28 + $0x48] sm:$0xff] }
 0x90c   : >> { %v3046_v46 = vsel %vm3043_vm7, %v3045_v22, %v3041_v53  ;;  %3259 = vmatpush.msrb.mxu1 %v5061_v23  ;;  %3285 = vmatpush.msrb.mxu2 %v5062_v14  ;;  %vm3085_vm14 = vmor %vm3083_vm12, %vm3084_vm11  ;;  %v3104_v18 = vand.u32 2147483648, %v2987_v45  ;;  %v3102_v17 = vand.u32 2147483647, %v2987_v45  ;;  %vm3098_vm1 = vweird.f32 %v2987_v45  ;;  %v3445_v22 = vld [vmem:[%s6462_s28 + $0x28] sm:$0xff]  ;;  %v3444_v14 = vld [vmem:[%s6462_s28 + $0x20] sm:$0xff] }
 0x90d   : >> { %v3047_v58 = vmul.f32 %v6382_v50, %v3046_v46  ;;  %v3080_v36 = vsub.f32 1.0, %v3079_v31  ;;  %4919 = vmatmul.msk.f32.vlgmr.msrb.gmra.mxu1 %vm1035_vm3, %v3077_v48  ;;  %v3056_v50 = vsel %vm6435_vm10, %v6420_v54, %v3052_v20  ;;  %v3442_v23 = vld [vmem:[%s6462_s28 + $0x10] sm:$0xff]  ;;  %v3441_v31 = vld [vmem:[%s6462_s28 + $0x8] sm:$0xff]  ;;  %vm3429_vm6 = vcmask 785408  }
 0x90e   : >> { %v3061_v2 = vsel %vm3058_vm13, %v3060_v52, %v3056_v50  ;;  %v3105_v37 = vor.u32 1.1754944e-38, %v3104_v18  ;;  %vm3103_vm5 = vcmp.eq.f32.partialorder %v3102_v17, 8.507059e+37  ;;  %4934 = vmatpush.msra.mxu1 %v3455_v11 }
 0x90f   : >> { %v3081_v5 = vmul.f32 %v5220_v51, %v3080_v36  ;;  %4917 = vmatmul.msk.f32.vlgmr.msrb.gmra.mxu3 %vm1035_vm3, %v3047_v58  ;;  %v3062_v54 = vmul.f32 %v6374_v55, %v3061_v2 }
 0x910   : >> { %4935 = vmatpush.msra.mxu1 %v3454_v38 }
 0x911   : >> { %v3082_v60 = vadd.f32 %v5220_v51, %v3081_v5  ;;  %v3291_v61 = vpop.permute.xlu1 %3290  ;;  %v5222_v8 = vpop.eup %5221 }
 0x912   : >> { %3311 = vmatpush.msra.mxu3 %v3291_v61  ;;  %v3094_v63 = vmul.f32 %v5222_v8, %v2987_v45  ;;  %vm3099_vm0 = vweird.f32 %v5222_v8  ;;  %v3440_v45 = vld [vmem:[%s6462_s28] sm:$0xff] }
 0x913   : >> { %v3086_v39 = vsel %vm3085_vm14, %v5220_v51, %v3082_v60  ;;  %vm3100_vm4 = vmor %vm3098_vm1, %vm3099_vm0 }
 0x914   : >> { %v3091_v9 = vsel %vm3088_vm15, %v3090_v56, %v3086_v39  ;;  %v3095_v49 = vsub.f32 1.0, %v3094_v63 }
 0x915   : >> { %v3092_v16 = vmul.f32 %v6386_v44, %v3091_v9 }
 0x916   : >> { %v3213_v1 = vpop.permute.xlu0 %3212  ;;  %v3096_v32 = vmul.f32 %v5222_v8, %v3095_v49 }
 0x917   : >> { %3233 = vmatpush.msrb.mxu0 %v3213_v1  ;;  %4920 = vmatmul.msk.f32.vlgmr.msrb.gmra.mxu2 %vm1035_vm3, %v3092_v16  ;;  %v7172_v16 = vld [vmem:[#allocation12_spill] sm:$0xff] }
 0x918   : >> { %4918 = vmatmul.msk.f32.vlgmr.msrb.gmra.mxu0 %vm1035_vm3, %v3062_v54  ;;  %v3097_v27 = vadd.f32 %v5222_v8, %v3096_v32 }
 0x919   : >> { %3461 = vmatpush.msra.mxu0 %v3455_v11  ;;  %v5065_v48 = vpop.permute.xlu1 %5064 }
 0x91a   : >> { %v3101_v6 = vsel %vm3100_vm4, %v5222_v8, %v3097_v27  ;;  %v5066_v20 = vunpack.i.l.bf16 %v5065_v48  ;;  %v5067_v19 = vunpack.i.h.bf16 %v5065_v48  ;;  %v7173_v27 = vld [vmem:[#allocation15_spill] sm:$0xff] }
 0x91b   : >> { %v3106_v44 = vsel %vm3103_vm5, %v3105_v37, %v3101_v6  ;;  %3462 = vmatpush.msra.mxu0 %v3454_v38 }
 0x91c   : >> { %v3107_v7 = vmul.f32 %v6393_v12, %v3106_v44  ;;  %v3452_v12 = vld [vmem:[%s6462_s28 + $0x60] sm:$0xff]  ;;  %v3412_v58 = vsel %vm818_vm2, %v5988_v0, %v5066_v20  ;;  %v3413_v57 = vsel %vm818_vm2, %v5997_v40, %v5067_v19 }
 0x91d   : >> { %v5322_v20 = vld [vmem:[#allocation2] sm:$0xff] }
 0x91e   : >> { %4921 = vmatmul.msk.f32.vlgmr.msra.gmra.mxu3 %vm1035_vm3, %v3107_v7  ;;  %vm3420_vm3 = vcmask 523264  }
 0x952   : >> { %v3131_v55 = vpop.f32.mrf.mxu0 }
 0x95a   : >> { %v3157_v62 = vpop.f32.mrf.mxu1 }
 0x95b   : >> { %v5073_v25 = vpack.i.bf16 %v3157_v62, %v3131_v55 }
 0x95d   : >> { %5074 = vrot.lane.b32.xlu1 %v5073_v25, %s5453_s15  ;;  %v7174_v25 = vld [vmem:[#allocation13_spill] sm:$0xff] }
 0x965   : >> { %5084 = vrot.lane.b32.xlu1 %v5083_v34, %s5454_s13  ;;  %v3453_v34 = vld [vmem:[%s6462_s28 + $0x68] sm:$0xff] }
 0x966   : >> { %3463 = vmatpush.msra.mxu0 %v3453_v34  ;;  %4936 = vmatpush.msra.mxu1 %v3453_v34  ;;  %v7175_v34 = vld [vmem:[#allocation16_spill] sm:$0xff] }
 0x968   : >> { %3464 = vmatpush.msra.mxu0 %v3452_v12  ;;  %4937 = vmatpush.msra.mxu1 %v3452_v12 }
 0x96d   : >> { %5089 = vrot.lane.b32.xlu1 %v5088_v35, %s5455_s24 }
 0x988   : >> { %v3183_v24 = vpop.f32.mrf.mxu2 }
 0x989   : >> { %3392 = vrot.lane.b32.xlu2 %v3183_v24, %s5453_s15 }
 0x98a   : >> { %v3261_v21 = vpop.f32.mrf.mxu1 }
 0x991   : >> { %3336 = vrot.lane.b32.xlu2 %v6222_v4, %s5455_s24  ;;  %v3451_v4 = vld [vmem:[%s6462_s28 + $0x58] sm:$0xff] }
 0x992   : >> { %v3209_v3 = vpop.f32.mrf.mxu3  ;;  %3465 = vmatpush.msra.mxu0 %v3451_v4  ;;  %4938 = vmatpush.msra.mxu1 %v3451_v4 }
 0x993   : >> { %3394 = vrot.lane.b32.xlu0 %v3209_v3, %s5453_s15 }
 0x994   : >> { %3466 = vmatpush.msra.mxu0 %v3450_v33  ;;  %4939 = vmatpush.msra.mxu1 %v3450_v33 }
 0x995   : >> { %v3235_v29 = vpop.f32.mrf.mxu0 }
 0x996   : >> { %3396 = vrot.lane.b32.xlu1 %v3235_v29, %s5453_s15  ;;  %3467 = vmatpush.msra.mxu0 %v3449_v42 }
 0x997   : >> { %4940 = vmatpush.msra.mxu1 %v3449_v42 }
 0x999   : >> { %3338 = vrot.lane.b32.xlu2 %v6224_v13, %s5455_s24  ;;  %v3448_v13 = vld [vmem:[%s6462_s28 + $0x40] sm:$0xff] }
 0x99a   : >> { %3468 = vmatpush.msra.mxu0 %v3448_v13  ;;  %4941 = vmatpush.msra.mxu1 %v3448_v13  ;;  %v3287_v51 = vpop.f32.mrf.mxu2  ;;  %v7176_v13 = vld [vmem:[#allocation14_spill] sm:$0xff] }
 0x99b   : >> { %3364 = vrot.lane.b32.xlu0 %v6335_v15, %s5454_s13  ;;  %v3446_v15 = vld [vmem:[%s6462_s28 + $0x30] sm:$0xff] }
 0x99c   : >> { %3469 = vmatpush.msra.mxu0 %v3447_v26  ;;  %4942 = vmatpush.msra.mxu1 %v3447_v26 }
 0x99e   : >> { %3398 = vrot.lane.b32.xlu1 %v3261_v21, %s5453_s15  ;;  %3470 = vmatpush.msra.mxu0 %v3446_v15 }
 0x99f   : >> { %4943 = vmatpush.msra.mxu1 %v3446_v15 }
 0x9a0   : >> { %3471 = vmatpush.msra.mxu0 %v3445_v22 }
 0x9a1   : >> { %4944 = vmatpush.msra.mxu1 %v3445_v22  ;;  %v3313_v53 = vpop.f32.mrf.mxu3 }
 0x9a2   : >> { %3472 = vmatpush.msra.mxu0 %v3444_v14 }
 0x9a3   : >> { %3366 = vrot.lane.b32.xlu0 %v6340_v10, %s5454_s13  ;;  %v3443_v10 = vld [vmem:[%s6462_s28 + $0x18] sm:$0xff]  ;;  %4945 = vmatpush.msra.mxu1 %v3444_v14 }
 0x9a4   : >> { %3473 = vmatpush.msra.mxu0 %v3443_v10 }
 0x9a5   : >> { %4946 = vmatpush.msra.mxu1 %v3443_v10  ;;  %v5093_v10 = vld [vmem:[%s3456_s30] ss:$0 sm:$0xff] }
 0x9a6   : >> { %3400 = vrot.lane.b32.xlu1 %v3287_v51, %s5453_s15  ;;  %3474 = vmatpush.msra.mxu0 %v3442_v23 }
 0x9a7   : >> { %4947 = vmatpush.msra.mxu1 %v3442_v23 }
 0x9a8   : >> { %3475 = vmatpush.msra.mxu0 %v3441_v31 }
 0x9a9   : >> { %4948 = vmatpush.msra.mxu1 %v3441_v31  ;;  %v5321_v31 = vld [vmem:[#allocation2 + $0x30] sm:$0xff] }
 0x9aa   : >> { %3476 = vmatpush.msra.mxu0 %v3440_v45 }
 0x9ab   : >> { %3368 = vrot.lane.b32.xlu0 %v6349_v59, %s5454_s13  ;;  %4949 = vmatpush.msra.mxu1 %v3440_v45  ;;  %v5070_v59 = vpop.permute.xlu0 %5069 }
 0x9ac   : >> { %v5071_v46 = vunpack.i.l.bf16 %v5070_v59 }
 0x9ae   : >> { %3402 = vrot.lane.b32.xlu1 %v3313_v53, %s5453_s15  ;;  %v3421_v43 = vsel %vm3420_vm3, %v3412_v58, %v5071_v46 }
 0x9b3   : >> { %3370 = vrot.lane.b32.xlu0 %v6351_v41, %s5454_s13  ;;  %v5072_v41 = vunpack.i.h.bf16 %v5070_v59  ;;  %v5080_v52 = vpop.permute.xlu0 %5079  ;;  %s3745_s13 = scalar_lea.vmem %s7149_s9, %s4925_s4 }
 0x9b4   : >> { %v5081_v0 = vunpack.i.l.bf16 %v5080_v52  ;;  %v5082_v9 = vunpack.i.h.bf16 %v5080_v52  ;;  %v5325_v52 = vld [vmem:[#allocation2 + $0x8] sm:$0xff] }
 0x9b5   : >> { %v3422_v50 = vsel %vm3420_vm3, %v3413_v57, %v5072_v41  ;;  %v5324_v41 = vld [vmem:[#allocation2 + $0x10] sm:$0xff] }
 0x9b6   : >> { %v3414_v56 = vsel %vm818_vm2, %v6002_v28, %v5081_v0  ;;  %v3415_v18 = vsel %vm818_vm2, %v7172_v16, %v5082_v9 }
 0x9cf   : >> { %v5075_v47 = vpop.permute.xlu1 %5074 }
 0x9d0   : >> { %v5076_v36 = vunpack.i.l.bf16 %v5075_v47  ;;  %v5077_v5 = vunpack.i.h.bf16 %v5075_v47 }
 0x9d2   : >> { %v3430_v30 = vsel %vm3429_vm6, %v3421_v43, %v5076_v36  ;;  %v3431_v60 = vsel %vm3429_vm6, %v3422_v50, %v5077_v5  ;;  %v5323_v36 = vld [vmem:[#allocation2 + $0x18] sm:$0xff] }
 0x9d3   : >> { %3477 = vmatmul.f32.vlgmr.msra.gmra.mxu0 %v3430_v30 }
 0x9d7   : >> { %v5085_v61 = vpop.permute.xlu1 %5084 }
 0x9d8   : >> { %v5086_v8 = vunpack.i.l.bf16 %v5085_v61  ;;  %v5087_v49 = vunpack.i.h.bf16 %v5085_v61 }
 0x9da   : >> { %v3423_v39 = vsel %vm3420_vm3, %v3414_v56, %v5086_v8  ;;  %v3424_v54 = vsel %vm3420_vm3, %v3415_v18, %v5087_v49  ;;  %v5326_v8 = vld [vmem:[#allocation2 + $0x20] sm:$0xff] }
 0x9db   : >> { %3480 = vmatmul.f32.gmra.mxu0 %v3431_v60 }
 0x9df   : >> { %v5090_v40 = vpop.permute.xlu1 %5089 }
 0x9e0   : >> { %v5091_v28 = vunpack.i.l.bf16 %v5090_v40  ;;  %v5092_v55 = vunpack.i.h.bf16 %v5090_v40  ;;  %v5456_v40 = vmov 128.0  }
 0x9e1   : >> { %5223 = vrcp.f32 %v5456_v40  ;;  %v3717_v40 = vld [vmem:[%s6573_s23 + $0x128] sm:$0xff] }
 0x9e2   : >> { %v3416_v37 = vsel %vm818_vm2, %v7173_v27, %v5091_v28  ;;  %v3417_v35 = vsel %vm818_vm2, %v7174_v25, %v5092_v55 }
 0x9e3   : >> { %v3393_v2 = vpop.permute.xlu2 %3392 }
 0x9e4   : >> { %v3432_v63 = vsel %vm3429_vm6, %v3423_v39, %v3393_v2 }
 0x9e5   : >> { %3483 = vmatmul.f32.gmra.mxu0 %v3432_v63  ;;  %v5327_v63 = vld [vmem:[#allocation2 + $0x28] sm:$0xff] }
 0x9e7   : >> { %v5224_v49 = vpop.eup %5223 }
 0x9e8   : >> { %v3527_v16 = vmul.f32 128.0, %v5224_v49 }
 0x9ea   : >> { %v3528_v18 = vsub.f32 1.0, %v3527_v16  ;;  %v3719_v16 = vld [vmem:[%s6573_s23 + $0x138] sm:$0xff] }
 0x9eb   : >> { %v3337_v38 = vpop.permute.xlu2 %3336 }
 0x9ec   : >> { %v3418_v12 = vsel %vm818_vm2, %v7175_v34, %v3337_v38 }
 0x9f3   : >> { %v3339_v42 = vpop.permute.xlu2 %3338 }
 0x9f4   : >> { %v3419_v26 = vsel %vm818_vm2, %v7176_v13, %v3339_v42  ;;  %vm3531_vm2 = vweird.f32 %v5224_v49  ;;  %v3743_v42 = vld [vmem:[%s6573_s23 + $0x1f8] sm:$0xff]  ;;  %v3736_v13 = vld [vmem:[%s6573_s23 + $0x1c0] sm:$0xff] }
 0x9f5   : >> { %3879 = vmatpush.msrb.mxu0 %v3743_v42  ;;  %v3692_v42 = vld [vmem:[%s6573_s23 + $0x60] sm:$0xff] }
 0xa05   : >> { %v3395_v1 = vpop.permute.xlu0 %3394 }
 0xa06   : >> { %v3433_v32 = vsel %vm3429_vm6, %v3424_v54, %v3395_v1  ;;  %v3529_v1 = vmul.f32 %v5224_v49, %v3528_v18  ;;  %v3712_v18 = vld [vmem:[%s6573_s23 + $0x100] sm:$0xff] }
 0xa07   : >> { %3486 = vmatmul.f32.gmra.mxu0 %v3433_v32 }
 0xa08   : >> { %v3397_v17 = vpop.permute.xlu1 %3396  ;;  %v3530_v54 = vadd.f32 %v5224_v49, %v3529_v1  ;;  %v3713_v1 = vld [vmem:[%s6573_s23 + $0x108] sm:$0xff] }
 0xa0a   : >> { %v6550_v32 = vsel %vm3531_vm2, %v5224_v49, %v3530_v54  ;;  %v3718_v49 = vld [vmem:[%s6573_s23 + $0x130] sm:$0xff] }
 0xa0b   : >> { %v3714_v54 = vld [vmem:[%s6573_s23 + $0x110] sm:$0xff] }
 0xa0d   : >> { %v3365_v6 = vpop.permute.xlu0 %3364 }
 0xa0e   : >> { %v3425_v44 = vsel %vm3420_vm3, %v3416_v37, %v3365_v6 }
 0xa0f   : >> { %v3434_v7 = vsel %vm3429_vm6, %v3425_v44, %v3397_v17 }
 0xa10   : >> { %3489 = vmatmul.f32.vlgmr.msra.gmra.mxu1 %v3434_v7  ;;  %v3399_v62 = vpop.permute.xlu1 %3398 }
 0xa15   : >> { %v3367_v24 = vpop.permute.xlu0 %3366 }
 0xa16   : >> { %v3426_v3 = vsel %vm3420_vm3, %v3417_v35, %v3367_v24  ;;  %v5328_v35 = vld [vmem:[#allocation2 + $0x38] sm:$0xff] }
 0xa17   : >> { %v3435_v11 = vsel %vm3429_vm6, %v3426_v3, %v3399_v62 }
 0xa18   : >> { %3492 = vmatmul.f32.gmra.mxu1 %v3435_v11  ;;  %v3401_v29 = vpop.permute.xlu1 %3400 }
 0xa1d   : >> { %v3369_v4 = vpop.permute.xlu0 %3368 }
 0xa1e   : >> { %v3427_v33 = vsel %vm3420_vm3, %v3418_v12, %v3369_v4  ;;  %v3740_v12 = vld [vmem:[%s6573_s23 + $0x1e0] sm:$0xff]  ;;  %v3741_v4 = vld [vmem:[%s6573_s23 + $0x1e8] sm:$0xff] }
 0xa1f   : >> { %v3436_v21 = vsel %vm3429_vm6, %v3427_v33, %v3401_v29  ;;  %v3742_v33 = vld [vmem:[%s6573_s23 + $0x1f0] sm:$0xff]  ;;  %3756 = vmatpush.msrb.mxu1 %v3740_v12  ;;  %3797 = vmatpush.msra.mxu2 %v3741_v4  ;;  %v3696_v12 = vld [vmem:[%s6573_s23 + $0x80] sm:$0xff]  ;;  %v3697_v4 = vld [vmem:[%s6573_s23 + $0x88] sm:$0xff] }
 0xa20   : >> { %3495 = vmatmul.f32.gmra.mxu1 %v3436_v21  ;;  %v3403_v51 = vpop.permute.xlu1 %3402  ;;  %3838 = vmatpush.msrb.mxu3 %v3742_v33  ;;  %v3698_v33 = vld [vmem:[%s6573_s23 + $0x90] sm:$0xff] }
 0xa21   : >> { %3757 = vmatpush.msrb.mxu1 %v3736_v13  ;;  %v3693_v13 = vld [vmem:[%s6573_s23 + $0x68] sm:$0xff] }
 0xa25   : >> { %v3371_v15 = vpop.permute.xlu0 %3370 }
 0xa26   : >> { %v3428_v22 = vsel %vm3420_vm3, %v3419_v26, %v3371_v15  ;;  %v3737_v26 = vld [vmem:[%s6573_s23 + $0x1c8] sm:$0xff]  ;;  %v3738_v15 = vld [vmem:[%s6573_s23 + $0x1d0] sm:$0xff] }
 0xa27   : >> { %v3437_v14 = vsel %vm3429_vm6, %v3428_v22, %v3403_v51  ;;  %v3739_v51 = vld [vmem:[%s6573_s23 + $0x1d8] sm:$0xff]  ;;  %v3732_v22 = vld [vmem:[%s6573_s23 + $0x1a0] sm:$0xff]  ;;  %3798 = vmatpush.msra.mxu2 %v3737_v26  ;;  %3839 = vmatpush.msrb.mxu3 %v3738_v15  ;;  %v3694_v26 = vld [vmem:[%s6573_s23 + $0x70] sm:$0xff] }
 0xa28   : >> { %3498 = vmatmul.f32.gmra.mxu1 %v3437_v14  ;;  %3880 = vmatpush.msrb.mxu0 %v3739_v51  ;;  %v3695_v15 = vld [vmem:[%s6573_s23 + $0x78] sm:$0xff]  ;;  %v3688_v51 = vld [vmem:[%s6573_s23 + $0x40] sm:$0xff] }
 0xa29   : >> { %3758 = vmatpush.msrb.mxu1 %v3732_v22  ;;  %v3689_v22 = vld [vmem:[%s6573_s23 + $0x48] sm:$0xff] }
 0xa50   : >> { %v3478_v23 = vpop.f32.mrf.mxu0 }
 0xa51   : >> { %v3479_v53 = vadd.f32 %v5093_v10, %v3478_v23  ;;  %v3734_v23 = vld [vmem:[%s6573_s23 + $0x1b0] sm:$0xff] }
 0xa52   : >> { %3840 = vmatpush.msrb.mxu3 %v3734_v23  ;;  %v3691_v23 = vld [vmem:[%s6573_s23 + $0x58] sm:$0xff] }
 0xa53   : >> { %v3502_v45 = vadd.f32 %v5321_v31, %v3479_v53  ;;  %v3735_v53 = vld [vmem:[%s6573_s23 + $0x1b8] sm:$0xff]  ;;  %v3728_v31 = vld [vmem:[%s6573_s23 + $0x180] sm:$0xff] }
 0xa54   : >> { %3881 = vmatpush.msrb.mxu0 %v3735_v53  ;;  %3759 = vmatpush.msrb.mxu1 %v3728_v31  ;;  %v3684_v53 = vld [vmem:[%s6573_s23 + $0x20] sm:$0xff]  ;;  %v3685_v31 = vld [vmem:[%s6573_s23 + $0x28] sm:$0xff] }
 0xa55   : >> { %3510 = vadd.xlane.f32.xlu2 %v3502_v45 }
 0xa58   : >> { %v3481_v48 = vpop.f32.mrf.mxu0 }
 0xa59   : >> { %v3482_v59 = vadd.f32 %v5093_v10, %v3481_v48  ;;  %v3729_v48 = vld [vmem:[%s6573_s23 + $0x188] sm:$0xff] }
 0xa5b   : >> { %v3503_v46 = vadd.f32 %v5322_v20, %v3482_v59  ;;  %v3730_v59 = vld [vmem:[%s6573_s23 + $0x190] sm:$0xff]  ;;  %v3731_v20 = vld [vmem:[%s6573_s23 + $0x198] sm:$0xff] }
 0xa5c   : >> { %3841 = vmatpush.msrb.mxu3 %v3730_v59  ;;  %3882 = vmatpush.msrb.mxu0 %v3731_v20  ;;  %v3680_v59 = vld [vmem:[%s6573_s23] sm:$0xff]  ;;  %v3681_v20 = vld [vmem:[%s6573_s23 + $0x8] sm:$0xff] }
 0xa5d   : >> { %3512 = vadd.xlane.f32.xlu0 %v3503_v46 }
 0xa62   : >> { %v3484_v47 = vpop.f32.mrf.mxu0 }
 0xa63   : >> { %v3485_v58 = vadd.f32 %v5093_v10, %v3484_v47 }
 0xa65   : >> { %v3504_v43 = vadd.f32 %v5323_v36, %v3485_v58 }
 0xa67   : >> { %3514 = vadd.xlane.f32.xlu1 %v3504_v43 }
 0xa84   : >> { %v3487_v30 = vpop.f32.mrf.mxu0 }
 0xa85   : >> { %v3488_v19 = vadd.f32 %v5093_v10, %v3487_v30 }
 0xa87   : >> { %v6538_v5 = vadd.f32 %v5324_v41, %v3488_v19 }
 0xa89   : >> { %3516 = vadd.xlane.f32.xlu2 %v6538_v5 }
 0xa8d   : >> { %v3490_v57 = vpop.f32.mrf.mxu1 }
 0xa8e   : >> { %v3491_v50 = vadd.f32 %v5093_v10, %v3490_v57 }
 0xa90   : >> { %v6541_v60 = vadd.f32 %v5325_v52, %v3491_v50 }
 0xa92   : >> { %3518 = vadd.xlane.f32.xlu0 %v6541_v60 }
 0xa95   : >> { %v3493_v61 = vpop.f32.mrf.mxu1 }
 0xa96   : >> { %v3494_v0 = vadd.f32 %v5093_v10, %v3493_v61  ;;  %v3725_v61 = vld [vmem:[%s6573_s23 + $0x168] sm:$0xff] }
 0xa98   : >> { %v6544_v56 = vadd.f32 %v5326_v8, %v3494_v0  ;;  %v3726_v0 = vld [vmem:[%s6573_s23 + $0x170] sm:$0xff]  ;;  %v3727_v8 = vld [vmem:[%s6573_s23 + $0x178] sm:$0xff] }
 0xa99   : >> { %3842 = vmatpush.msrb.mxu3 %v3726_v0  ;;  %3883 = vmatpush.msrb.mxu0 %v3727_v8 }
 0xa9a   : >> { %3520 = vadd.xlane.f32.xlu1 %v6544_v56 }
 0xa9d   : >> { %v3496_v2 = vpop.f32.mrf.mxu1 }
 0xa9e   : >> { %v3497_v39 = vadd.f32 %v5093_v10, %v3496_v2  ;;  %v3721_v2 = vld [vmem:[%s6573_s23 + $0x148] sm:$0xff] }
 0xaa0   : >> { %v6547_v9 = vadd.f32 %v5327_v63, %v3497_v39  ;;  %v3722_v39 = vld [vmem:[%s6573_s23 + $0x150] sm:$0xff]  ;;  %v3723_v63 = vld [vmem:[%s6573_s23 + $0x158] sm:$0xff] }
 0xaa1   : >> { %3843 = vmatpush.msrb.mxu3 %v3722_v39  ;;  %3884 = vmatpush.msrb.mxu0 %v3723_v63 }
 0xaa2   : >> { %3522 = vadd.xlane.f32.xlu0 %v6547_v9 }
 0xaa3   : >> { %3844 = vmatpush.msrb.mxu3 %v3718_v49  ;;  %3885 = vmatpush.msrb.mxu0 %v3719_v16 }
 0xaa5   : >> { %v3499_v6 = vpop.f32.mrf.mxu1  ;;  %3845 = vmatpush.msrb.mxu3 %v3714_v54 }
 0xaa6   : >> { %v3500_v7 = vadd.f32 %v5093_v10, %v3499_v6  ;;  %v3733_v10 = vld [vmem:[%s6573_s23 + $0x1a8] sm:$0xff]  ;;  %v3710_v6 = vld [vmem:[%s6573_s23 + $0xf0] sm:$0xff] }
 0xaa7   : >> { %3799 = vmatpush.msra.mxu2 %v3733_v10  ;;  %3846 = vmatpush.msrb.mxu3 %v3710_v6  ;;  %v3690_v10 = vld [vmem:[%s6573_s23 + $0x50] sm:$0xff] }
 0xaa8   : >> { %v6562_v24 = vadd.f32 %v5328_v35, %v3500_v7  ;;  %v3704_v7 = vld [vmem:[%s6573_s23 + $0xc0] sm:$0xff]  ;;  %v3707_v35 = vld [vmem:[%s6573_s23 + $0xd8] sm:$0xff] }
 0xaa9   : >> { %3800 = vmatpush.msra.mxu2 %v3729_v48  ;;  %v3687_v48 = vld [vmem:[%s6573_s23 + $0x38] sm:$0xff] }
 0xaab   : >> { %3801 = vmatpush.msra.mxu2 %v3725_v61 }
 0xaad   : >> { %3802 = vmatpush.msra.mxu2 %v3721_v2 }
 0xaaf   : >> { %3803 = vmatpush.msra.mxu2 %v3717_v40 }
 0xab1   : >> { %3804 = vmatpush.msra.mxu2 %v3713_v1 }
 0xac8   : >> { %v3511_v17 = vpop.xlane.xlu2 %3510 }
 0xac9   : >> { %v3533_v28 = vmul.f32 %v6550_v32, %v3511_v17  ;;  %v3715_v17 = vld [vmem:[%s6573_s23 + $0x118] sm:$0xff] }
 0xaca   : >> { %3886 = vmatpush.msrb.mxu0 %v3715_v17 }
 0xacb   : >> { %v6553_v27 = vsub.f32 %v3502_v45, %v3533_v28  ;;  %v3708_v28 = vld [vmem:[%s6573_s23 + $0xe0] sm:$0xff] }
 0xacd   : >> { %v3549_v37 = vmul.f32 %v6553_v27, %v6553_v27 }
 0xacf   : >> { %3557 = vadd.xlane.f32.xlu2 %v3549_v37  ;;  %v3709_v37 = vld [vmem:[%s6573_s23 + $0xe8] sm:$0xff] }
 0xad0   : >> { %v3513_v44 = vpop.xlane.xlu0 %3512  ;;  %3805 = vmatpush.msra.mxu2 %v3709_v37 }
 0xad1   : >> { %v3534_v55 = vmul.f32 %v6550_v32, %v3513_v44  ;;  %v3711_v44 = vld [vmem:[%s6573_s23 + $0xf8] sm:$0xff] }
 0xad2   : >> { %3887 = vmatpush.msrb.mxu0 %v3711_v44 }
 0xad3   : >> { %v6558_v62 = vsub.f32 %v3503_v46, %v3534_v55  ;;  %v3705_v55 = vld [vmem:[%s6573_s23 + $0xc8] sm:$0xff] }
 0xad4   : >> { %3806 = vmatpush.msra.mxu2 %v3705_v55  ;;  %3888 = vmatpush.msrb.mxu0 %v3707_v35 }
 0xad5   : >> { %v3550_v25 = vmul.f32 %v6558_v62, %v6558_v62 }
 0xad7   : >> { %3559 = vadd.xlane.f32.xlu1 %v3550_v25  ;;  %3524 = vadd.xlane.f32.xlu2 %v6562_v24  ;;  %v3706_v25 = vld [vmem:[%s6573_s23 + $0xd0] sm:$0xff] }
 0xad8   : >> { %3847 = vmatpush.msrb.mxu3 %v3706_v25 }
 0xada   : >> { %v3515_v3 = vpop.xlane.xlu1 %3514 }
 0xadb   : >> { %v3535_v11 = vmul.f32 %v6550_v32, %v3515_v3  ;;  %v3700_v3 = vld [vmem:[%s6573_s23 + $0xa0] sm:$0xff] }
 0xadd   : >> { %v6566_v38 = vsub.f32 %v3504_v43, %v3535_v11  ;;  %v3701_v11 = vld [vmem:[%s6573_s23 + $0xa8] sm:$0xff] }
 0xade   : >> { %3807 = vmatpush.msra.mxu2 %v3701_v11 }
 0xadf   : >> { %v3551_v29 = vmul.f32 %v6566_v38, %v6566_v38 }
 0xae0   : >> { %3808 = vmatpush.msra.mxu2 %v3697_v4 }
 0xae1   : >> { %3561 = vadd.xlane.f32.xlu0 %v3551_v29  ;;  %v3702_v29 = vld [vmem:[%s6573_s23 + $0xb0] sm:$0xff] }
 0xae2   : >> { %3848 = vmatpush.msrb.mxu3 %v3702_v29  ;;  %3809 = vmatpush.msra.mxu2 %v3693_v13 }
 0xae4   : >> { %3849 = vmatpush.msrb.mxu3 %v3698_v33  ;;  %3810 = vmatpush.msra.mxu2 %v3689_v22 }
 0xae6   : >> { %3850 = vmatpush.msrb.mxu3 %v3694_v26  ;;  %3811 = vmatpush.msra.mxu2 %v3685_v31 }
 0xae8   : >> { %3851 = vmatpush.msrb.mxu3 %v3690_v10  ;;  %3812 = vmatpush.msra.mxu2 %v3681_v20 }
 0xafc   : >> { %v3517_v34 = vpop.xlane.xlu2 %3516 }
 0xafd   : >> { %v3536_v21 = vmul.f32 %v6550_v32, %v3517_v34  ;;  %v3703_v34 = vld [vmem:[%s6573_s23 + $0xb8] sm:$0xff] }
 0xafe   : >> { %3889 = vmatpush.msrb.mxu0 %v3703_v34 }
 0xaff   : >> { %v6586_v14 = vsub.f32 %v6538_v5, %v3536_v21  ;;  %v3699_v21 = vld [vmem:[%s6573_s23 + $0x98] sm:$0xff] }
 0xb00   : >> { %3890 = vmatpush.msrb.mxu0 %v3699_v21 }
 0xb01   : >> { %v3552_v45 = vmul.f32 %v6586_v14, %v6586_v14 }
 0xb02   : >> { %3891 = vmatpush.msrb.mxu0 %v3695_v15 }
 0xb03   : >> { %3563 = vadd.xlane.f32.xlu1 %v3552_v45  ;;  %v3686_v45 = vld [vmem:[%s6573_s23 + $0x30] sm:$0xff] }
 0xb04   : >> { %3892 = vmatpush.msrb.mxu0 %v3691_v23  ;;  %3852 = vmatpush.msrb.mxu3 %v3686_v45 }
 0xb05   : >> { %v3519_v46 = vpop.xlane.xlu0 %3518 }
 0xb06   : >> { %v3537_v47 = vmul.f32 %v6550_v32, %v3519_v46  ;;  %3893 = vmatpush.msrb.mxu0 %v3687_v48  ;;  %v3682_v46 = vld [vmem:[%s6573_s23 + $0x10] sm:$0xff] }
 0xb07   : >> { %3853 = vmatpush.msrb.mxu3 %v3682_v46 }
 0xb08   : >> { %v6599_v58 = vsub.f32 %v6541_v60, %v3537_v47  ;;  %v3724_v60 = vld [vmem:[%s6573_s23 + $0x160] sm:$0xff]  ;;  %v3683_v47 = vld [vmem:[%s6573_s23 + $0x18] sm:$0xff] }
 0xb09   : >> { %3760 = vmatpush.msrb.mxu1 %v3724_v60  ;;  %3894 = vmatpush.msrb.mxu0 %v3683_v47 }
 0xb0a   : >> { %v3553_v36 = vmul.f32 %v6599_v58, %v6599_v58 }
 0xb0c   : >> { %3565 = vadd.xlane.f32.xlu2 %v3553_v36 }
 0xb0d   : >> { %v3521_v43 = vpop.xlane.xlu1 %3520 }
 0xb0e   : >> { %v3538_v30 = vmul.f32 %v6550_v32, %v3521_v43 }
 0xb10   : >> { %v6605_v19 = vsub.f32 %v6544_v56, %v3538_v30  ;;  %v3720_v56 = vld [vmem:[%s6573_s23 + $0x140] sm:$0xff] }
 0xb11   : >> { %3761 = vmatpush.msrb.mxu1 %v3720_v56 }
 0xb12   : >> { %v3554_v41 = vmul.f32 %v6605_v19, %v6605_v19 }
 0xb14   : >> { %3567 = vadd.xlane.f32.xlu0 %v3554_v41 }
 0xb15   : >> { %v3523_v5 = vpop.xlane.xlu0 %3522 }
 0xb16   : >> { %v3539_v57 = vmul.f32 %v6550_v32, %v3523_v5 }
 0xb18   : >> { %v6611_v50 = vsub.f32 %v6547_v9, %v3539_v57  ;;  %v3716_v9 = vld [vmem:[%s6573_s23 + $0x120] sm:$0xff] }
 0xb19   : >> { %3762 = vmatpush.msrb.mxu1 %v3716_v9 }
 0xb1a   : >> { %v3555_v52 = vmul.f32 %v6611_v50, %v6611_v50 }
 0xb1b   : >> { %3763 = vmatpush.msrb.mxu1 %v3712_v18 }
 0xb1c   : >> { %3569 = vadd.xlane.f32.xlu1 %v3555_v52 }
 0xb1d   : >> { %3764 = vmatpush.msrb.mxu1 %v3708_v28 }
 0xb1f   : >> { %3765 = vmatpush.msrb.mxu1 %v3704_v7 }
 0xb21   : >> { %3766 = vmatpush.msrb.mxu1 %v3700_v3 }
 0xb23   : >> { %3767 = vmatpush.msrb.mxu1 %v3696_v12 }
 0xb25   : >> { %3768 = vmatpush.msrb.mxu1 %v3692_v42 }
 0xb27   : >> { %3769 = vmatpush.msrb.mxu1 %v3688_v51 }
 0xb29   : >> { %3770 = vmatpush.msrb.mxu1 %v3684_v53 }
 0xb2b   : >> { %3771 = vmatpush.msrb.mxu1 %v3680_v59 }
 0xb42   : >> { %v3558_v36 = vpop.xlane.xlu2 %3557 }
 0xb43   : >> { %v3573_v43 = vmul.f32 %v3558_v36, %v6550_v32 }
 0xb45   : >> { %v3581_v30 = vadd.f32 1e-06, %v3573_v43 }
 0xb47   : >> { %5225 = vrsqrt.f32 %v3581_v30  ;;  %vm3595_vm8 = vweird.f32 %v3581_v30 }
 0xb4a   : >> { %v3560_v41 = vpop.xlane.xlu1 %3559  ;;  %v3525_v5 = vpop.xlane.xlu2 %3524 }
 0xb4b   : >> { %v3574_v57 = vmul.f32 %v3560_v41, %v6550_v32  ;;  %v3540_v52 = vmul.f32 %v6550_v32, %v3525_v5 }
 0xb4d   : >> { %v5226_v60 = vpop.eup %5225  ;;  %v3582_v61 = vadd.f32 1e-06, %v3574_v57  ;;  %v6667_v0 = vsub.f32 %v6562_v24, %v3540_v52 }
 0xb4e   : >> { %v3590_v8 = vmul.f32 %v5226_v60, %v3581_v30  ;;  %vm3596_vm7 = vweird.f32 %v5226_v60 }
 0xb4f   : >> { %5227 = vrsqrt.f32 %v3582_v61  ;;  %v3556_v56 = vmul.f32 %v6667_v0, %v6667_v0  ;;  %vm3597_vm9 = vmor %vm3595_vm8, %vm3596_vm7  ;;  %vm3605_vm11 = vweird.f32 %v3582_v61 }
 0xb50   : >> { %v3591_v2 = vmul.f32 %v5226_v60, %v3590_v8 }
 0xb51   : >> { %3571 = vadd.xlane.f32.xlu2 %v3556_v56 }
 0xb52   : >> { %v3592_v39 = vmul.f32 0.5, %v3591_v2 }
 0xb54   : >> { %v3562_v63 = vpop.xlane.xlu0 %3561  ;;  %v3593_v9 = vsub.f32 1.5, %v3592_v39 }
 0xb55   : >> { %v3575_v40 = vmul.f32 %v3562_v63, %v6550_v32  ;;  %v5228_v49 = vpop.eup %5227 }
 0xb56   : >> { %v3594_v16 = vmul.f32 %v5226_v60, %v3593_v9  ;;  %v3600_v18 = vmul.f32 %v5228_v49, %v3582_v61  ;;  %vm3606_vm10 = vweird.f32 %v5228_v49 }
 0xb57   : >> { %v3583_v1 = vadd.f32 1e-06, %v3575_v40  ;;  %vm3607_vm12 = vmor %vm3605_vm11, %vm3606_vm10 }
 0xb58   : >> { %v3598_v24 = vsel %vm3597_vm9, %v5226_v60, %v3594_v16  ;;  %v3601_v54 = vmul.f32 %v5228_v49, %v3600_v18 }
 0xb59   : >> { %5229 = vrsqrt.f32 %v3583_v1  ;;  %v6673_v17 = vmul.f32 %v3598_v24, %v6553_v27  ;;  %vm3615_vm14 = vweird.f32 %v3583_v1  ;;  %v4224_v24 = vld [vmem:[%s6727_s18 + $0x70] sm:$0xff] }
 0xb5a   : >> { %v3602_v28 = vmul.f32 0.5, %v3601_v54  ;;  %v4272_v54 = vld [vmem:[%s6727_s18 + $0x1f0] sm:$0xff] }
 0xb5b   : >> { %3772 = vmatmul.f32.vlgmr.msrb.gmra.mxu1 %v6673_v17  ;;  %3813 = vmatmul.f32.vlgmr.msra.gmra.mxu2 %v6673_v17 }
 0xb5c   : >> { %v3603_v37 = vsub.f32 1.5, %v3602_v28  ;;  %3854 = vmatmul.f32.vlgmr.msrb.gmra.mxu3 %v6673_v17  ;;  %3895 = vmatmul.f32.vlgmr.msrb.gmra.mxu0 %v6673_v17  ;;  %v4223_v28 = vld [vmem:[%s6727_s18 + $0x68] sm:$0xff] }
 0xb5e   : >> { %v3604_v44 = vmul.f32 %v5228_v49, %v3603_v37  ;;  %v4271_v37 = vld [vmem:[%s6727_s18 + $0x1e8] sm:$0xff] }
 0xb5f   : >> { %v5230_v6 = vpop.eup %5229 }
 0xb60   : >> { %v3610_v7 = vmul.f32 %v5230_v6, %v3583_v1  ;;  %v3608_v55 = vsel %vm3607_vm12, %v5228_v49, %v3604_v44  ;;  %vm3616_vm13 = vweird.f32 %v5230_v6  ;;  %v4241_v44 = vld [vmem:[%s6727_s18 + $0xf8] sm:$0xff] }
 0xb61   : >> { %v6680_v27 = vmul.f32 %v3608_v55, %v6558_v62  ;;  %vm3617_vm15 = vmor %vm3615_vm14, %vm3616_vm13  ;;  %4320 = vmatpush.msrb.mxu2 %v4241_v44  ;;  %v4270_v55 = vld [vmem:[%s6727_s18 + $0x1e0] sm:$0xff] }
 0xb62   : >> { %v3611_v25 = vmul.f32 %v5230_v6, %v3610_v7  ;;  %v4257_v7 = vld [vmem:[%s6727_s18 + $0x178] sm:$0xff]  ;;  %v4258_v44 = vld [vmem:[%s6727_s18 + $0x180] sm:$0xff] }
 0xb63   : >> { %3775 = vmatmul.f32.gmra.mxu1 %v6680_v27  ;;  %3816 = vmatmul.f32.gmra.mxu2 %v6680_v27 }
 0xb64   : >> { %v3612_v35 = vmul.f32 0.5, %v3611_v25  ;;  %3857 = vmatmul.f32.gmra.mxu3 %v6680_v27  ;;  %3898 = vmatmul.f32.gmra.mxu0 %v6680_v27  ;;  %v4221_v25 = vld [vmem:[%s6727_s18 + $0x58] sm:$0xff] }
 0xb65   : >> { %4361 = vmatpush.msra.mxu3 %v4257_v7  ;;  %v4228_v7 = vld [vmem:[%s6727_s18 + $0x90] sm:$0xff] }
 0xb66   : >> { %v3613_v3 = vsub.f32 1.5, %v3612_v35  ;;  %v4240_v35 = vld [vmem:[%s6727_s18 + $0xf0] sm:$0xff] }
 0xb67   : >> { %4321 = vmatpush.msrb.mxu2 %v4240_v35  ;;  %v3746_v35 = vld [vmem:[%s3745_s13] sm:$0xf] }
 0xb68   : >> { %v3614_v11 = vmul.f32 %v5230_v6, %v3613_v3  ;;  %v4256_v3 = vld [vmem:[%s6727_s18 + $0x170] sm:$0xff] }
 0xb69   : >> { %4362 = vmatpush.msra.mxu3 %v4256_v3  ;;  %v4227_v3 = vld [vmem:[%s6727_s18 + $0x88] sm:$0xff] }
 0xb6a   : >> { %v3618_v29 = vsel %vm3617_vm15, %v5230_v6, %v3614_v11  ;;  %v4222_v6 = vld [vmem:[%s6727_s18 + $0x60] sm:$0xff]  ;;  %v4269_v11 = vld [vmem:[%s6727_s18 + $0x1d8] sm:$0xff] }
 0xb6b   : >> { %v6687_v34 = vmul.f32 %v3618_v29, %v6566_v38  ;;  %v4220_v29 = vld [vmem:[%s6727_s18 + $0x50] sm:$0xff] }
 0xb6d   : >> { %3778 = vmatmul.f32.gmra.mxu1 %v6687_v34  ;;  %3819 = vmatmul.f32.gmra.mxu2 %v6687_v34 }
 0xb6e   : >> { %3860 = vmatmul.f32.gmra.mxu3 %v6687_v34  ;;  %3901 = vmatmul.f32.gmra.mxu0 %v6687_v34 }
 0xb76   : >> { %v3564_v62 = vpop.xlane.xlu1 %3563 }
 0xb77   : >> { %v3576_v12 = vmul.f32 %v3564_v62, %v6550_v32  ;;  %v4239_v62 = vld [vmem:[%s6727_s18 + $0xe8] sm:$0xff] }
 0xb78   : >> { %4322 = vmatpush.msrb.mxu2 %v4239_v62 }
 0xb79   : >> { %v3584_v4 = vadd.f32 1e-06, %v3576_v12  ;;  %v4255_v12 = vld [vmem:[%s6727_s18 + $0x168] sm:$0xff] }
 0xb7a   : >> { %4363 = vmatpush.msra.mxu3 %v4255_v12  ;;  %v4242_v12 = vld [vmem:[%s6727_s18 + $0x100] sm:$0xff] }
 0xb7b   : >> { %5231 = vrsqrt.f32 %v3584_v4  ;;  %vm3625_vm1 = vweird.f32 %v3584_v4 }
 0xb7f   : >> { %v3566_v33 = vpop.xlane.xlu2 %3565 }
 0xb80   : >> { %v3577_v21 = vmul.f32 %v3566_v33, %v6550_v32  ;;  %v4219_v33 = vld [vmem:[%s6727_s18 + $0x48] sm:$0xff] }
 0xb81   : >> { %v5232_v42 = vpop.eup %5231 }
 0xb82   : >> { %v3620_v13 = vmul.f32 %v5232_v42, %v3584_v4  ;;  %v3585_v38 = vadd.f32 1e-06, %v3577_v21  ;;  %vm3626_vm0 = vweird.f32 %v5232_v42  ;;  %v4268_v4 = vld [vmem:[%s6727_s18 + $0x1d0] sm:$0xff]  ;;  %v4238_v21 = vld [vmem:[%s6727_s18 + $0xe0] sm:$0xff] }
 0xb83   : >> { %vm3627_vm4 = vmor %vm3625_vm1, %vm3626_vm0  ;;  %4323 = vmatpush.msrb.mxu2 %v4238_v21  ;;  %v6804_v21 = vperm.slane %v3746_v35, 3 }
 0xb84   : >> { %v3621_v26 = vmul.f32 %v5232_v42, %v3620_v13  ;;  %5233 = vrsqrt.f32 %v3585_v38  ;;  %vm3635_vm3 = vweird.f32 %v3585_v38  ;;  %v4267_v13 = vld [vmem:[%s6727_s18 + $0x1c8] sm:$0xff] }
 0xb86   : >> { %v3622_v15 = vmul.f32 0.5, %v3621_v26  ;;  %v4237_v26 = vld [vmem:[%s6727_s18 + $0xd8] sm:$0xff] }
 0xb87   : >> { %v3568_v51 = vpop.xlane.xlu0 %3567  ;;  %4324 = vmatpush.msrb.mxu2 %v4237_v26 }
 0xb88   : >> { %v3623_v22 = vsub.f32 1.5, %v3622_v15  ;;  %v3578_v10 = vmul.f32 %v3568_v51, %v6550_v32  ;;  %v4253_v15 = vld [vmem:[%s6727_s18 + $0x158] sm:$0xff]  ;;  %v4266_v51 = vld [vmem:[%s6727_s18 + $0x1c0] sm:$0xff] }
 0xb8a   : >> { %v5234_v23 = vpop.eup %5233  ;;  %v3624_v53 = vmul.f32 %v5232_v42, %v3623_v22  ;;  %v3586_v31 = vadd.f32 1e-06, %v3578_v10  ;;  %v4217_v22 = vld [vmem:[%s6727_s18 + $0x38] sm:$0xff]  ;;  %v4236_v10 = vld [vmem:[%s6727_s18 + $0xd0] sm:$0xff] }
 0xb8b   : >> { %v3630_v45 = vmul.f32 %v5234_v23, %v3585_v38  ;;  %vm3636_vm5 = vweird.f32 %v5234_v23  ;;  %v4218_v38 = vld [vmem:[%s6727_s18 + $0x40] sm:$0xff]  ;;  %4325 = vmatpush.msrb.mxu2 %v4236_v10 }
 0xb8c   : >> { %v3628_v48 = vsel %vm3627_vm4, %v5232_v42, %v3624_v53  ;;  %5235 = vrsqrt.f32 %v3586_v31  ;;  %vm3637_vm6 = vmor %vm3635_vm3, %vm3636_vm5  ;;  %vm3645_vm7 = vweird.f32 %v3586_v31  ;;  %v4254_v42 = vld [vmem:[%s6727_s18 + $0x160] sm:$0xff]  ;;  %v4265_v53 = vld [vmem:[%s6727_s18 + $0x1b8] sm:$0xff] }
 0xb8d   : >> { %v6697_v59 = vmul.f32 %v3628_v48, %v6586_v14  ;;  %v3631_v20 = vmul.f32 %v5234_v23, %v3630_v45  ;;  %4364 = vmatpush.msra.mxu3 %v4254_v42  ;;  %v4235_v45 = vld [vmem:[%s6727_s18 + $0xc8] sm:$0xff] }
 0xb8e   : >> { %v4251_v48 = vld [vmem:[%s6727_s18 + $0x148] sm:$0xff]  ;;  %4326 = vmatpush.msrb.mxu2 %v4235_v45 }
 0xb8f   : >> { %v3632_v46 = vmul.f32 0.5, %v3631_v20  ;;  %v3570_v47 = vpop.xlane.xlu1 %3569  ;;  %3781 = vmatmul.f32.gmra.mxu1 %v6697_v59  ;;  %3822 = vmatmul.f32.gmra.mxu2 %v6697_v59 }
 0xb90   : >> { %v3579_v36 = vmul.f32 %v3570_v47, %v6550_v32  ;;  %3863 = vmatmul.f32.gmra.mxu3 %v6697_v59  ;;  %3904 = vmatmul.f32.gmra.mxu0 %v6697_v59 }
 0xb91   : >> { %v3633_v43 = vsub.f32 1.5, %v3632_v46  ;;  %4365 = vmatpush.msra.mxu3 %v4253_v15  ;;  %v4264_v46 = vld [vmem:[%s6727_s18 + $0x1b0] sm:$0xff] }
 0xb92   : >> { %v5236_v30 = vpop.eup %5235  ;;  %v3587_v41 = vadd.f32 1e-06, %v3579_v36  ;;  %v4215_v36 = vld [vmem:[%s6727_s18 + $0x28] sm:$0xff] }
 0xb93   : >> { %v3634_v5 = vmul.f32 %v5234_v23, %v3633_v43  ;;  %v3640_v14 = vmul.f32 %v5236_v30, %v3586_v31  ;;  %vm3646_vm2 = vweird.f32 %v5236_v30  ;;  %v4216_v31 = vld [vmem:[%s6727_s18 + $0x30] sm:$0xff]  ;;  %v4234_v43 = vld [vmem:[%s6727_s18 + $0xc0] sm:$0xff] }
 0xb94   : >> { %5237 = vrsqrt.f32 %v3587_v41  ;;  %vm3647_vm8 = vmor %vm3645_vm7, %vm3646_vm2  ;;  %vm3655_vm10 = vweird.f32 %v3587_v41  ;;  %4327 = vmatpush.msrb.mxu2 %v4234_v43 }
 0xb95   : >> { %v3638_v57 = vsel %vm3637_vm6, %v5234_v23, %v3634_v5  ;;  %v3641_v52 = vmul.f32 %v5236_v30, %v3640_v14  ;;  %v4252_v23 = vld [vmem:[%s6727_s18 + $0x150] sm:$0xff]  ;;  %v4214_v14 = vld [vmem:[%s6727_s18 + $0x20] sm:$0xff] }
 0xb96   : >> { %v6705_v60 = vmul.f32 %v3638_v57, %v6599_v58  ;;  %4366 = vmatpush.msra.mxu3 %v4252_v23  ;;  %v4233_v57 = vld [vmem:[%s6727_s18 + $0xb8] sm:$0xff]  ;;  %v6812_v23 = vperm.slane %v3746_v35, 1 }
 0xb97   : >> { %v3642_v61 = vmul.f32 0.5, %v3641_v52  ;;  %v4249_v52 = vld [vmem:[%s6727_s18 + $0x138] sm:$0xff]  ;;  %4328 = vmatpush.msrb.mxu2 %v4233_v57 }
 0xb98   : >> { %3784 = vmatmul.f32.gmra.mxu1 %v6705_v60  ;;  %3825 = vmatmul.f32.gmra.mxu2 %v6705_v60 }
 0xb99   : >> { %v3643_v8 = vsub.f32 1.5, %v3642_v61  ;;  %3866 = vmatmul.f32.gmra.mxu3 %v6705_v60  ;;  %3907 = vmatmul.f32.gmra.mxu0 %v6705_v60  ;;  %v4262_v61 = vld [vmem:[%s6727_s18 + $0x1a0] sm:$0xff] }
 0xb9a   : >> { %v5238_v56 = vpop.eup %5237  ;;  %4367 = vmatpush.msra.mxu3 %v4251_v48 }
 0xb9b   : >> { %v3644_v2 = vmul.f32 %v5236_v30, %v3643_v8  ;;  %v3650_v39 = vmul.f32 %v5238_v56, %v3587_v41  ;;  %vm3656_vm9 = vweird.f32 %v5238_v56  ;;  %v4263_v41 = vld [vmem:[%s6727_s18 + $0x1a8] sm:$0xff]  ;;  %v4213_v8 = vld [vmem:[%s6727_s18 + $0x18] sm:$0xff] }
 0xb9c   : >> { %vm3657_vm11 = vmor %vm3655_vm10, %vm3656_vm9 }
 0xb9d   : >> { %v3648_v63 = vsel %vm3647_vm8, %v5236_v30, %v3644_v2  ;;  %v3651_v9 = vmul.f32 %v5238_v56, %v3650_v39  ;;  %v4250_v30 = vld [vmem:[%s6727_s18 + $0x140] sm:$0xff]  ;;  %v4248_v2 = vld [vmem:[%s6727_s18 + $0x130] sm:$0xff]  ;;  %v4261_v39 = vld [vmem:[%s6727_s18 + $0x198] sm:$0xff] }
 0xb9e   : >> { %v6712_v58 = vmul.f32 %v3648_v63, %v6605_v19  ;;  %v4225_v19 = vld [vmem:[%s6727_s18 + $0x78] sm:$0xff]  ;;  %4368 = vmatpush.msra.mxu3 %v4250_v30  ;;  %v4212_v63 = vld [vmem:[%s6727_s18 + $0x10] sm:$0xff] }
 0xb9f   : >> { %v3652_v40 = vmul.f32 0.5, %v3651_v9  ;;  %4279 = vmatpush.msra.mxu1 %v4225_v19  ;;  %v4231_v9 = vld [vmem:[%s6727_s18 + $0xa8] sm:$0xff]  ;;  %v4246_v19 = vld [vmem:[%s6727_s18 + $0x120] sm:$0xff] }
 0xba0   : >> { %3787 = vmatmul.f32.gmra.mxu1 %v6712_v58  ;;  %3828 = vmatmul.f32.gmra.mxu2 %v6712_v58 }
 0xba1   : >> { %v3653_v49 = vsub.f32 1.5, %v3652_v40  ;;  %3869 = vmatmul.f32.gmra.mxu3 %v6712_v58  ;;  %3910 = vmatmul.f32.gmra.mxu0 %v6712_v58  ;;  %v4247_v40 = vld [vmem:[%s6727_s18 + $0x128] sm:$0xff] }
 0xba2   : >> { %4280 = vmatpush.msra.mxu1 %v4224_v24  ;;  %4369 = vmatpush.msra.mxu3 %v4249_v52 }
 0xba3   : >> { %v3654_v16 = vmul.f32 %v5238_v56, %v3653_v49  ;;  %v4260_v49 = vld [vmem:[%s6727_s18 + $0x190] sm:$0xff] }
 0xba4   : >> { %4281 = vmatpush.msra.mxu1 %v4223_v28  ;;  %4370 = vmatpush.msra.mxu3 %v4248_v2  ;;  %v4229_v28 = vld [vmem:[%s6727_s18 + $0x98] sm:$0xff] }
 0xba5   : >> { %v3658_v18 = vsel %vm3657_vm11, %v5238_v56, %v3654_v16  ;;  %v4232_v56 = vld [vmem:[%s6727_s18 + $0xb0] sm:$0xff]  ;;  %v4211_v16 = vld [vmem:[%s6727_s18 + $0x8] sm:$0xff] }
 0xba6   : >> { %v6719_v1 = vmul.f32 %v3658_v18, %v6611_v50  ;;  %v4273_v50 = vld [vmem:[%s6727_s18 + $0x1f8] sm:$0xff]  ;;  %4282 = vmatpush.msra.mxu1 %v4222_v6  ;;  %4329 = vmatpush.msrb.mxu2 %v4232_v56  ;;  %v4230_v18 = vld [vmem:[%s6727_s18 + $0xa0] sm:$0xff] }
 0xba7   : >> { %4402 = vmatpush.msra.mxu0 %v4273_v50  ;;  %4371 = vmatpush.msra.mxu3 %v4247_v40  ;;  %v4259_v50 = vld [vmem:[%s6727_s18 + $0x188] sm:$0xff] }
 0xba8   : >> { %3790 = vmatmul.f32.gmra.mxu1 %v6719_v1  ;;  %3831 = vmatmul.f32.gmra.mxu2 %v6719_v1 }
 0xba9   : >> { %3872 = vmatmul.f32.gmra.mxu3 %v6719_v1  ;;  %3913 = vmatmul.f32.gmra.mxu0 %v6719_v1 }
 0xbaa   : >> { %4403 = vmatpush.msra.mxu0 %v4272_v54  ;;  %4283 = vmatpush.msra.mxu1 %v4221_v25  ;;  %v4210_v54 = vld [vmem:[%s6727_s18] sm:$0xff] }
 0xbab   : >> { %4330 = vmatpush.msrb.mxu2 %v4231_v9  ;;  %4372 = vmatpush.msra.mxu3 %v4246_v19 }
 0xbac   : >> { %4404 = vmatpush.msra.mxu0 %v4271_v37  ;;  %4284 = vmatpush.msra.mxu1 %v4220_v29  ;;  %v4245_v37 = vld [vmem:[%s6727_s18 + $0x118] sm:$0xff]  ;;  %v4226_v29 = vld [vmem:[%s6727_s18 + $0x80] sm:$0xff] }
 0xbad   : >> { %4331 = vmatpush.msrb.mxu2 %v4230_v18  ;;  %4373 = vmatpush.msra.mxu3 %v4245_v37 }
 0xbae   : >> { %4405 = vmatpush.msra.mxu0 %v4270_v55  ;;  %4285 = vmatpush.msra.mxu1 %v4219_v33  ;;  %v4244_v55 = vld [vmem:[%s6727_s18 + $0x110] sm:$0xff] }
 0xbaf   : >> { %4332 = vmatpush.msrb.mxu2 %v4229_v28  ;;  %4374 = vmatpush.msra.mxu3 %v4244_v55 }
 0xbb0   : >> { %4406 = vmatpush.msra.mxu0 %v4269_v11  ;;  %4286 = vmatpush.msra.mxu1 %v4218_v38  ;;  %v4243_v11 = vld [vmem:[%s6727_s18 + $0x108] sm:$0xff] }
 0xbb1   : >> { %4333 = vmatpush.msrb.mxu2 %v4228_v7  ;;  %4375 = vmatpush.msra.mxu3 %v4243_v11 }
 0xbb2   : >> { %4407 = vmatpush.msra.mxu0 %v4268_v4  ;;  %4287 = vmatpush.msra.mxu1 %v4217_v22  ;;  %v6802_v4 = vperm.slane %v3746_v35, 0 }
 0xbb3   : >> { %4334 = vmatpush.msrb.mxu2 %v4227_v3  ;;  %4376 = vmatpush.msra.mxu3 %v4242_v12 }
 0xbb4   : >> { %4408 = vmatpush.msra.mxu0 %v4267_v13  ;;  %4288 = vmatpush.msra.mxu1 %v4216_v31  ;;  %v6814_v31 = vperm.slane %v3746_v35, 2 }
 0xbb5   : >> { %4335 = vmatpush.msrb.mxu2 %v4226_v29 }
 0xbb6   : >> { %4409 = vmatpush.msra.mxu0 %v4266_v51  ;;  %4289 = vmatpush.msra.mxu1 %v4215_v36 }
 0xbb8   : >> { %4410 = vmatpush.msra.mxu0 %v4265_v53  ;;  %4290 = vmatpush.msra.mxu1 %v4214_v14 }
 0xbba   : >> { %4411 = vmatpush.msra.mxu0 %v4264_v46  ;;  %4291 = vmatpush.msra.mxu1 %v4213_v8 }
 0xbbc   : >> { %4412 = vmatpush.msra.mxu0 %v4263_v41  ;;  %4292 = vmatpush.msra.mxu1 %v4212_v63 }
 0xbbe   : >> { %4413 = vmatpush.msra.mxu0 %v4262_v61  ;;  %4293 = vmatpush.msra.mxu1 %v4211_v16 }
 0xbc0   : >> { %4414 = vmatpush.msra.mxu0 %v4261_v39  ;;  %4294 = vmatpush.msra.mxu1 %v4210_v54 }
 0xbc2   : >> { %4415 = vmatpush.msra.mxu0 %v4260_v49 }
 0xbc4   : >> { %v3572_v20 = vpop.xlane.xlu2 %3571  ;;  %4416 = vmatpush.msra.mxu0 %v4259_v50 }
 0xbc5   : >> { %v3580_v47 = vmul.f32 %v3572_v20, %v6550_v32 }
 0xbc6   : >> { %4417 = vmatpush.msra.mxu0 %v4258_v44 }
 0xbc7   : >> { %v6768_v5 = vadd.f32 1e-06, %v3580_v47 }
 0xbc9   : >> { %5239 = vrsqrt.f32 %v6768_v5  ;;  %vm3665_vm13 = vweird.f32 %v6768_v5 }
 0xbcf   : >> { %v5240_v24 = vpop.eup %5239 }
 0xbd0   : >> { %v3660_v6 = vmul.f32 %v5240_v24, %v6768_v5  ;;  %vm3666_vm12 = vweird.f32 %v5240_v24 }
 0xbd1   : >> { %vm3667_vm14 = vmor %vm3665_vm13, %vm3666_vm12 }
 0xbd2   : >> { %v3661_v25 = vmul.f32 %v5240_v24, %v3660_v6 }
 0xbd4   : >> { %v3662_v62 = vmul.f32 0.5, %v3661_v25 }
 0xbd6   : >> { %v3663_v33 = vsub.f32 1.5, %v3662_v62 }
 0xbd8   : >> { %v3664_v42 = vmul.f32 %v5240_v24, %v3663_v33  ;;  %v3773_v13 = vpop.f32.mrf.mxu1 }
 0xbd9   : >> { %v3774_v38 = vadd.f32 %v3773_v13, %v6802_v4  ;;  %v3896_v26 = vpop.f32.mrf.mxu0 }
 0xbda   : >> { %v3668_v15 = vsel %vm3667_vm14, %v5240_v24, %v3664_v42  ;;  %v3897_v51 = vadd.f32 %v3896_v26, %v6804_v21 }
 0xbdb   : >> { %v6810_v22 = vmul.f32 %v3668_v15, %v6667_v0  ;;  %v3952_v10 = vmul.f32 0.044715, %v3774_v38  ;;  %v3920_v6 = vmul.f32 0.5, %v3774_v38 }
 0xbdc   : >> { %v3955_v53 = vmul.f32 0.044715, %v3897_v51  ;;  %v3923_v25 = vmul.f32 0.5, %v3897_v51 }
 0xbdd   : >> { %v3984_v45 = vmul.f32 %v3952_v10, %v3774_v38  ;;  %3793 = vmatmul.f32.gmra.mxu1 %v6810_v22  ;;  %3834 = vmatmul.f32.gmra.mxu2 %v6810_v22 }
 0xbde   : >> { %v3987_v48 = vmul.f32 %v3955_v53, %v3897_v51  ;;  %3875 = vmatmul.f32.gmra.mxu3 %v6810_v22  ;;  %3916 = vmatmul.f32.gmra.mxu0 %v6810_v22  ;;  %v3814_v20 = vpop.f32.mrf.mxu2 }
 0xbdf   : >> { %v4016_v46 = vmul.f32 %v3984_v45, %v3774_v38  ;;  %v3815_v0 = vadd.f32 %v3814_v20, %v6812_v23  ;;  %v3855_v47 = vpop.f32.mrf.mxu3 }
 0xbe0   : >> { %v4019_v36 = vmul.f32 %v3987_v48, %v3897_v51  ;;  %v6822_v43 = vadd.f32 %v3855_v47, %v6814_v31  ;;  %v3776_v30 = vpop.f32.mrf.mxu1 }
 0xbe1   : >> { %v4048_v41 = vadd.f32 %v4016_v46, %v3774_v38  ;;  %v3953_v5 = vmul.f32 0.044715, %v3815_v0  ;;  %v6825_v14 = vadd.f32 %v3776_v30, %v6802_v4  ;;  %v3899_v57 = vpop.f32.mrf.mxu0 }
 0xbe2   : >> { %v4051_v52 = vadd.f32 %v4019_v36, %v3897_v51  ;;  %v3954_v61 = vmul.f32 0.044715, %v6822_v43  ;;  %v6829_v8 = vadd.f32 %v3899_v57, %v6804_v21 }
 0xbe3   : >> { %v4080_v56 = vmul.f32 0.7978846, %v4048_v41  ;;  %v3985_v2 = vmul.f32 %v3953_v5, %v3815_v0  ;;  %v3956_v39 = vmul.f32 0.044715, %v6825_v14  ;;  %v3921_v41 = vmul.f32 0.5, %v3815_v0 }
 0xbe4   : >> { %v4083_v63 = vmul.f32 0.7978846, %v4051_v52  ;;  %v3986_v9 = vmul.f32 %v3954_v61, %v6822_v43  ;;  %v3959_v40 = vmul.f32 0.044715, %v6829_v8 }
 0xbe5   : >> { %5241 = vtanh.f32 %v4080_v56  ;;  %v4017_v49 = vmul.f32 %v3985_v2, %v3815_v0  ;;  %v3988_v16 = vmul.f32 %v3956_v39, %v6825_v14  ;;  %v3922_v56 = vmul.f32 0.5, %v6822_v43 }
 0xbe6   : >> { %5243 = vtanh.f32 %v4083_v63  ;;  %v4018_v18 = vmul.f32 %v3986_v9, %v6822_v43  ;;  %v3817_v19 = vpop.f32.mrf.mxu2  ;;  %v3991_v50 = vmul.f32 %v3959_v40, %v6829_v8 }
 0xbe7   : >> { %v4049_v24 = vadd.f32 %v4017_v49, %v3815_v0  ;;  %v6842_v54 = vadd.f32 %v3817_v19, %v6812_v23  ;;  %v3858_v28 = vpop.f32.mrf.mxu3  ;;  %v4020_v37 = vmul.f32 %v3988_v16, %v6825_v14  ;;  %v3924_v49 = vmul.f32 0.5, %v6825_v14 }
 0xbe8   : >> { %v4050_v44 = vadd.f32 %v4018_v18, %v6822_v43  ;;  %v6847_v7 = vadd.f32 %v3858_v28, %v6814_v31  ;;  %v4023_v55 = vmul.f32 %v3991_v50, %v6829_v8 }
 0xbe9   : >> { %v4081_v35 = vmul.f32 0.7978846, %v4049_v24  ;;  %v3957_v3 = vmul.f32 0.044715, %v6842_v54  ;;  %v4052_v29 = vadd.f32 %v4020_v37, %v6825_v14 }
 0xbea   : >> { %v3779_v11 = vpop.f32.mrf.mxu1  ;;  %v4082_v62 = vmul.f32 0.7978846, %v4050_v44  ;;  %v3958_v12 = vmul.f32 0.044715, %v6847_v7  ;;  %v4055_v13 = vadd.f32 %v4023_v55, %v6829_v8 }
 0xbeb   : >> { %v6854_v33 = vadd.f32 %v3779_v11, %v6802_v4  ;;  %v3902_v42 = vpop.f32.mrf.mxu0  ;;  %v5242_v38 = vpop.eup %5241  ;;  %5245 = vtanh.f32 %v4081_v35  ;;  %v4084_v15 = vmul.f32 0.7978846, %v4052_v29  ;;  %v3989_v51 = vmul.f32 %v3957_v3, %v6842_v54 }
 0xbec   : >> { %v6858_v26 = vadd.f32 %v3902_v42, %v6804_v21  ;;  %v5244_v10 = vpop.eup %5243  ;;  %5247 = vtanh.f32 %v4082_v62  ;;  %v4144_v45 = vadd.f32 1.0, %v5242_v38  ;;  %v4087_v48 = vmul.f32 0.7978846, %v4055_v13 }
 0xbed   : >> { %v3960_v53 = vmul.f32 0.044715, %v6854_v33  ;;  %v4147_v46 = vadd.f32 1.0, %v5244_v10  ;;  %5249 = vtanh.f32 %v4084_v15  ;;  %v4021_v47 = vmul.f32 %v3989_v51, %v6842_v54 }
 0xbee   : >> { %v3963_v20 = vmul.f32 0.044715, %v6858_v26  ;;  %v4176_v36 = vmul.f32 %v4144_v45, %v3920_v6  ;;  %5251 = vtanh.f32 %v4087_v48  ;;  %v3990_v30 = vmul.f32 %v3958_v12, %v6847_v7 }
 0xbef   : >> { %v4179_v57 = vmul.f32 %v4147_v46, %v3923_v25  ;;  %v4053_v52 = vadd.f32 %v4021_v47, %v6842_v54  ;;  %v3992_v61 = vmul.f32 %v3960_v53, %v6854_v33  ;;  %v3927_v62 = vmul.f32 0.5, %v6829_v8 }
 0xbf0   : >> { %v3820_v5 = vpop.f32.mrf.mxu2  ;;  %4295 = vmatmul.f32.vlgmr.msra.gmra.mxu1 %v4176_v36  ;;  %v4022_v63 = vmul.f32 %v3990_v30, %v6847_v7  ;;  %v3995_v9 = vmul.f32 %v3963_v20, %v6858_v26  ;;  %v3925_v48 = vmul.f32 0.5, %v6842_v54 }
 0xbf1   : >> { %v6869_v2 = vadd.f32 %v3820_v5, %v6812_v23  ;;  %v3861_v39 = vpop.f32.mrf.mxu3  ;;  %v5246_v40 = vpop.eup %5245  ;;  %4418 = vmatmul.f32.vlgmr.msra.gmra.mxu0 %v4179_v57  ;;  %v4085_v16 = vmul.f32 0.7978846, %v4053_v52  ;;  %v4024_v18 = vmul.f32 %v3992_v61, %v6854_v33  ;;  %v3926_v57 = vmul.f32 0.5, %v6847_v7 }
 0xbf2   : >> { %v6874_v0 = vadd.f32 %v3861_v39, %v6814_v31  ;;  %v5248_v43 = vpop.eup %5247  ;;  %v4145_v50 = vadd.f32 1.0, %v5246_v40  ;;  %v4054_v24 = vadd.f32 %v4022_v63, %v6847_v7  ;;  %v4027_v28 = vmul.f32 %v3995_v9, %v6858_v26 }
 0xbf3   : >> { %v3961_v19 = vmul.f32 0.044715, %v6869_v2  ;;  %v5250_v37 = vpop.eup %5249  ;;  %v4146_v44 = vadd.f32 1.0, %v5248_v43  ;;  %5253 = vtanh.f32 %v4085_v16  ;;  %v4056_v55 = vadd.f32 %v4024_v18, %v6854_v33 }
 0xbf4   : >> { %v3962_v6 = vmul.f32 0.044715, %v6874_v0  ;;  %v5252_v25 = vpop.eup %5251  ;;  %v4177_v14 = vmul.f32 %v4145_v50, %v3921_v41  ;;  %v4148_v35 = vadd.f32 1.0, %v5250_v37  ;;  %v4086_v3 = vmul.f32 0.7978846, %v4054_v24 }
 0xbf5   : >> { %v4059_v11 = vadd.f32 %v4027_v28, %v6858_v26  ;;  %v4178_v29 = vmul.f32 %v4146_v44, %v3922_v56  ;;  %v4151_v12 = vadd.f32 1.0, %v5252_v25  ;;  %v4088_v42 = vmul.f32 0.7978846, %v4056_v55 }
 0xbf6   : >> { %4336 = vmatmul.f32.vlgmr.msrb.gmra.mxu2 %v4177_v14  ;;  %v4180_v13 = vmul.f32 %v4148_v35, %v3924_v49  ;;  %5255 = vtanh.f32 %v4086_v3  ;;  %v3993_v15 = vmul.f32 %v3961_v19, %v6869_v2  ;;  %v3994_v10 = vmul.f32 %v3962_v6, %v6874_v0 }
 0xbf7   : >> { %v4091_v38 = vmul.f32 0.7978846, %v4059_v11  ;;  %4377 = vmatmul.f32.vlgmr.msra.gmra.mxu3 %v4178_v29  ;;  %v4183_v51 = vmul.f32 %v4151_v12, %v3927_v62  ;;  %5257 = vtanh.f32 %v4088_v42  ;;  %v3928_v39 = vmul.f32 0.5, %v6854_v33 }
 0xbf8   : >> { %4298 = vmatmul.f32.gmra.mxu1 %v4180_v13  ;;  %v4025_v53 = vmul.f32 %v3993_v15, %v6869_v2  ;;  %v4026_v8 = vmul.f32 %v3994_v10, %v6874_v0  ;;  %v3931_v9 = vmul.f32 0.5, %v6858_v26  ;;  %v3929_v43 = vmul.f32 0.5, %v6869_v2 }
 0xbf9   : >> { %5259 = vtanh.f32 %v4091_v38  ;;  %v5254_v45 = vpop.eup %5253  ;;  %4421 = vmatmul.f32.gmra.mxu0 %v4183_v51  ;;  %v3930_v50 = vmul.f32 0.5, %v6874_v0 }
 0xbfa   : >> { %v4149_v20 = vadd.f32 1.0, %v5254_v45  ;;  %v4057_v46 = vadd.f32 %v4025_v53, %v6869_v2  ;;  %v4058_v47 = vadd.f32 %v4026_v8, %v6874_v0 }
 0xbfc   : >> { %v5256_v36 = vpop.eup %5255  ;;  %v4181_v30 = vmul.f32 %v4149_v20, %v3925_v48  ;;  %v4089_v41 = vmul.f32 0.7978846, %v4057_v46  ;;  %v4090_v61 = vmul.f32 0.7978846, %v4058_v47 }
 0xbfd   : >> { %v5258_v5 = vpop.eup %5257  ;;  %v4150_v52 = vadd.f32 1.0, %v5256_v36 }
 0xbfe   : >> { %4339 = vmatmul.f32.gmra.mxu2 %v4181_v30  ;;  %v4152_v63 = vadd.f32 1.0, %v5258_v5  ;;  %5261 = vtanh.f32 %v4089_v41 }
 0xbff   : >> { %v5260_v56 = vpop.eup %5259  ;;  %v4182_v54 = vmul.f32 %v4150_v52, %v3926_v57  ;;  %5263 = vtanh.f32 %v4090_v61 }
 0xc00   : >> { %v4155_v40 = vadd.f32 1.0, %v5260_v56  ;;  %v4184_v49 = vmul.f32 %v4152_v63, %v3928_v39 }
 0xc01   : >> { %4380 = vmatmul.f32.gmra.mxu3 %v4182_v54 }
 0xc02   : >> { %v4187_v16 = vmul.f32 %v4155_v40, %v3931_v9  ;;  %4301 = vmatmul.f32.gmra.mxu1 %v4184_v49 }
 0xc04   : >> { %4424 = vmatmul.f32.gmra.mxu0 %v4187_v16  ;;  %v5262_v18 = vpop.eup %5261 }
 0xc05   : >> { %v5264_v7 = vpop.eup %5263  ;;  %v4153_v19 = vadd.f32 1.0, %v5262_v18 }
 0xc06   : >> { %v4154_v33 = vadd.f32 1.0, %v5264_v7 }
 0xc07   : >> { %v4185_v24 = vmul.f32 %v4153_v19, %v3929_v43 }
 0xc08   : >> { %v4186_v28 = vmul.f32 %v4154_v33, %v3930_v50 }
 0xc09   : >> { %4342 = vmatmul.f32.gmra.mxu2 %v4185_v24 }
 0xc0a   : >> { %4383 = vmatmul.f32.gmra.mxu3 %v4186_v28 }
 0xc0c   : >> { %v3782_v26 = vpop.f32.mrf.mxu1 }
 0xc0d   : >> { %v3783_v37 = vadd.f32 %v3782_v26, %v6802_v4  ;;  %v3905_v6 = vpop.f32.mrf.mxu0 }
 0xc0e   : >> { %v3906_v44 = vadd.f32 %v3905_v6, %v6804_v21 }
 0xc0f   : >> { %v3964_v55 = vmul.f32 0.044715, %v3783_v37  ;;  %v3932_v40 = vmul.f32 0.5, %v3783_v37 }
 0xc10   : >> { %v3967_v25 = vmul.f32 0.044715, %v3906_v44 }
 0xc11   : >> { %v3996_v14 = vmul.f32 %v3964_v55, %v3783_v37 }
 0xc12   : >> { %v3823_v35 = vpop.f32.mrf.mxu2  ;;  %v3999_v3 = vmul.f32 %v3967_v25, %v3906_v44 }
 0xc13   : >> { %v3824_v2 = vadd.f32 %v3823_v35, %v6812_v23  ;;  %v3864_v11 = vpop.f32.mrf.mxu3  ;;  %v4028_v0 = vmul.f32 %v3996_v14, %v3783_v37  ;;  %v3935_v14 = vmul.f32 0.5, %v3906_v44 }
 0xc14   : >> { %v3865_v29 = vadd.f32 %v3864_v11, %v6814_v31  ;;  %v4031_v62 = vmul.f32 %v3999_v3, %v3906_v44 }
 0xc15   : >> { %v3965_v12 = vmul.f32 0.044715, %v3824_v2  ;;  %v3785_v42 = vpop.f32.mrf.mxu1  ;;  %v4060_v13 = vadd.f32 %v4028_v0, %v3783_v37 }
 0xc16   : >> { %v3966_v38 = vmul.f32 0.044715, %v3865_v29  ;;  %v6902_v15 = vadd.f32 %v3785_v42, %v6802_v4  ;;  %v3908_v51 = vpop.f32.mrf.mxu0  ;;  %v4063_v10 = vadd.f32 %v4031_v62, %v3906_v44  ;;  %v3934_v44 = vmul.f32 0.5, %v3865_v29 }
 0xc17   : >> { %v3909_v53 = vadd.f32 %v3908_v51, %v6804_v21  ;;  %v4092_v45 = vmul.f32 0.7978846, %v4060_v13  ;;  %v3997_v8 = vmul.f32 %v3965_v12, %v3824_v2  ;;  %v3933_v13 = vmul.f32 0.5, %v3824_v2 }
 0xc18   : >> { %v3968_v48 = vmul.f32 0.044715, %v6902_v15  ;;  %v4095_v20 = vmul.f32 0.7978846, %v4063_v10  ;;  %v3998_v46 = vmul.f32 %v3966_v38, %v3865_v29 }
 0xc19   : >> { %v3971_v47 = vmul.f32 0.044715, %v3909_v53  ;;  %5265 = vtanh.f32 %v4092_v45  ;;  %v4029_v36 = vmul.f32 %v3997_v8, %v3824_v2 }
 0xc1a   : >> { %5267 = vtanh.f32 %v4095_v20  ;;  %v4030_v30 = vmul.f32 %v3998_v46, %v3865_v29  ;;  %v4000_v41 = vmul.f32 %v3968_v48, %v6902_v15 }
 0xc1b   : >> { %v3826_v5 = vpop.f32.mrf.mxu2  ;;  %v4061_v57 = vadd.f32 %v4029_v36, %v3824_v2  ;;  %v4003_v52 = vmul.f32 %v3971_v47, %v3909_v53  ;;  %v3936_v2 = vmul.f32 0.5, %v6902_v15  ;;  %v3939_v47 = vmul.f32 0.5, %v3909_v53 }
 0xc1c   : >> { %v6908_v61 = vadd.f32 %v3826_v5, %v6812_v23  ;;  %v3867_v56 = vpop.f32.mrf.mxu3  ;;  %v4062_v39 = vadd.f32 %v4030_v30, %v3865_v29  ;;  %v4032_v63 = vmul.f32 %v4000_v41, %v6902_v15 }
 0xc1d   : >> { %v6912_v54 = vadd.f32 %v3867_v56, %v6814_v31  ;;  %v3788_v9 = vpop.f32.mrf.mxu1  ;;  %v4093_v49 = vmul.f32 0.7978846, %v4061_v57  ;;  %v4035_v16 = vmul.f32 %v4003_v52, %v3909_v53 }
 0xc1e   : >> { %v3969_v18 = vmul.f32 0.044715, %v6908_v61  ;;  %v6916_v7 = vadd.f32 %v3788_v9, %v6802_v4  ;;  %v3911_v43 = vpop.f32.mrf.mxu0  ;;  %v4094_v19 = vmul.f32 0.7978846, %v4062_v39  ;;  %v4064_v50 = vadd.f32 %v4032_v63, %v6902_v15 }
 0xc1f   : >> { %v5266_v33 = vpop.eup %5265  ;;  %v3970_v24 = vmul.f32 0.044715, %v6912_v54  ;;  %v6921_v28 = vadd.f32 %v3911_v43, %v6804_v21  ;;  %5269 = vtanh.f32 %v4093_v49  ;;  %v4067_v26 = vadd.f32 %v4035_v16, %v3909_v53 }
 0xc20   : >> { %v5268_v37 = vpop.eup %5267  ;;  %v3972_v6 = vmul.f32 0.044715, %v6916_v7  ;;  %v4156_v55 = vadd.f32 1.0, %v5266_v33  ;;  %5271 = vtanh.f32 %v4094_v19  ;;  %v4096_v25 = vmul.f32 0.7978846, %v4064_v50 }
 0xc21   : >> { %v4159_v35 = vadd.f32 1.0, %v5268_v37  ;;  %v4099_v3 = vmul.f32 0.7978846, %v4067_v26  ;;  %v3975_v11 = vmul.f32 0.044715, %v6921_v28  ;;  %v4001_v62 = vmul.f32 %v3969_v18, %v6908_v61 }
 0xc22   : >> { %v4188_v0 = vmul.f32 %v4156_v55, %v3932_v40  ;;  %5273 = vtanh.f32 %v4096_v25  ;;  %v4002_v38 = vmul.f32 %v3970_v24, %v6912_v54  ;;  %v4004_v8 = vmul.f32 %v3972_v6, %v6916_v7 }
 0xc23   : >> { %v3829_v12 = vpop.f32.mrf.mxu2  ;;  %v4191_v42 = vmul.f32 %v4159_v35, %v3935_v14  ;;  %5275 = vtanh.f32 %v4099_v3  ;;  %v4033_v45 = vmul.f32 %v4001_v62, %v6908_v61  ;;  %v4007_v52 = vmul.f32 %v3975_v11, %v6921_v28 }
 0xc24   : >> { %v6928_v51 = vadd.f32 %v3829_v12, %v6812_v23  ;;  %v3870_v10 = vpop.f32.mrf.mxu3  ;;  %4304 = vmatmul.f32.gmra.mxu1 %v4188_v0  ;;  %v4034_v36 = vmul.f32 %v4002_v38, %v6912_v54  ;;  %v4036_v16 = vmul.f32 %v4004_v8, %v6916_v7 }
 0xc25   : >> { %v5270_v48 = vpop.eup %5269  ;;  %v6933_v20 = vadd.f32 %v3870_v10, %v6814_v31  ;;  %4427 = vmatmul.f32.gmra.mxu0 %v4191_v42  ;;  %v3791_v46 = vpop.f32.mrf.mxu1  ;;  %v4065_v57 = vadd.f32 %v4033_v45, %v6908_v61  ;;  %v4039_v37 = vmul.f32 %v4007_v52, %v6921_v28  ;;  %v3938_v52 = vmul.f32 0.5, %v6912_v54 }
 0xc26   : >> { %v5272_v30 = vpop.eup %5271  ;;  %v6938_v41 = vadd.f32 %v3791_v46, %v6802_v4  ;;  %v3914_v29 = vpop.f32.mrf.mxu0  ;;  %v4157_v5 = vadd.f32 1.0, %v5270_v48  ;;  %v3973_v56 = vmul.f32 0.044715, %v6928_v51  ;;  %v4066_v15 = vadd.f32 %v4034_v36, %v6912_v54 }
 0xc27   : >> { %v6944_v39 = vadd.f32 %v3914_v29, %v6804_v21  ;;  %v4158_v63 = vadd.f32 1.0, %v5272_v30  ;;  %v3974_v9 = vmul.f32 0.044715, %v6933_v20  ;;  %v4097_v49 = vmul.f32 0.7978846, %v4065_v57 }
 0xc28   : >> { %v5274_v53 = vpop.eup %5273  ;;  %v4189_v40 = vmul.f32 %v4157_v5, %v3933_v13  ;;  %v3976_v43 = vmul.f32 0.044715, %v6938_v41  ;;  %v4098_v33 = vmul.f32 0.7978846, %v4066_v15  ;;  %v4068_v26 = vadd.f32 %v4036_v16, %v6916_v7 }
 0xc29   : >> { %v5276_v18 = vpop.eup %5275  ;;  %v4190_v19 = vmul.f32 %v4158_v63, %v3934_v44  ;;  %v4160_v50 = vadd.f32 1.0, %v5274_v53  ;;  %5277 = vtanh.f32 %v4097_v49  ;;  %v3979_v6 = vmul.f32 0.044715, %v6944_v39 }
 0xc2a   : >> { %4345 = vmatmul.f32.gmra.mxu2 %v4189_v40  ;;  %v4163_v24 = vadd.f32 1.0, %v5276_v18  ;;  %5279 = vtanh.f32 %v4098_v33  ;;  %v4005_v14 = vmul.f32 %v3973_v56, %v6928_v51  ;;  %v4100_v0 = vmul.f32 0.7978846, %v4068_v26 }
 0xc2b   : >> { %4386 = vmatmul.f32.gmra.mxu3 %v4190_v19  ;;  %v3832_v55 = vpop.f32.mrf.mxu2  ;;  %v4192_v25 = vmul.f32 %v4160_v50, %v3936_v2  ;;  %v4071_v62 = vadd.f32 %v4039_v37, %v6921_v28  ;;  %v4006_v13 = vmul.f32 %v3974_v9, %v6933_v20  ;;  %v4008_v8 = vmul.f32 %v3976_v43, %v6938_v41 }
 0xc2c   : >> { %v6955_v35 = vadd.f32 %v3832_v55, %v6812_v23  ;;  %v3873_v3 = vpop.f32.mrf.mxu3  ;;  %v4195_v11 = vmul.f32 %v4163_v24, %v3939_v47  ;;  %v4037_v42 = vmul.f32 %v4005_v14, %v6928_v51  ;;  %5281 = vtanh.f32 %v4100_v0 }
 0xc2d   : >> { %v6959_v12 = vadd.f32 %v3873_v3, %v6814_v31  ;;  %4307 = vmatmul.f32.gmra.mxu1 %v4192_v25  ;;  %v4103_v10 = vmul.f32 0.7978846, %v4071_v62  ;;  %v4038_v45 = vmul.f32 %v4006_v13, %v6933_v20  ;;  %v3937_v2 = vmul.f32 0.5, %v6908_v61 }
 0xc2e   : >> { %v3977_v38 = vmul.f32 0.044715, %v6955_v35  ;;  %4430 = vmatmul.f32.gmra.mxu0 %v4195_v11  ;;  %v4069_v44 = vadd.f32 %v4037_v42, %v6928_v51  ;;  %v4011_v47 = vmul.f32 %v3979_v6, %v6944_v39  ;;  %v4040_v57 = vmul.f32 %v4008_v8, %v6938_v41 }
 0xc2f   : >> { %v5278_v48 = vpop.eup %5277  ;;  %v3978_v46 = vmul.f32 0.044715, %v6959_v12  ;;  %5283 = vtanh.f32 %v4103_v10  ;;  %v4070_v5 = vadd.f32 %v4038_v45, %v6933_v20  ;;  %v3940_v54 = vmul.f32 0.5, %v6916_v7 }
 0xc30   : >> { %v5280_v36 = vpop.eup %5279  ;;  %v4161_v30 = vadd.f32 1.0, %v5278_v48  ;;  %v4101_v29 = vmul.f32 0.7978846, %v4069_v44  ;;  %v4043_v63 = vmul.f32 %v4011_v47, %v6944_v39  ;;  %v4009_v15 = vmul.f32 %v3977_v38, %v6955_v35 }
 0xc31   : >> { %v4162_v56 = vadd.f32 1.0, %v5280_v36  ;;  %v4102_v61 = vmul.f32 0.7978846, %v4070_v5  ;;  %v4072_v9 = vadd.f32 %v4040_v57, %v6938_v41  ;;  %v4010_v43 = vmul.f32 %v3978_v46, %v6959_v12 }
 0xc32   : >> { %v4193_v53 = vmul.f32 %v4161_v30, %v3937_v2  ;;  %5285 = vtanh.f32 %v4101_v29  ;;  %v5282_v40 = vpop.eup %5281  ;;  %v4075_v16 = vadd.f32 %v4043_v63, %v6944_v39  ;;  %v4041_v18 = vmul.f32 %v4009_v15, %v6955_v35 }
 0xc33   : >> { %v4194_v49 = vmul.f32 %v4162_v56, %v3938_v52  ;;  %v4164_v19 = vadd.f32 1.0, %v5282_v40  ;;  %5287 = vtanh.f32 %v4102_v61  ;;  %v4104_v50 = vmul.f32 0.7978846, %v4072_v9 }
 0xc34   : >> { %4348 = vmatmul.f32.gmra.mxu2 %v4193_v53  ;;  %v4107_v24 = vmul.f32 0.7978846, %v4075_v16  ;;  %v4073_v26 = vadd.f32 %v4041_v18, %v6955_v35  ;;  %v4042_v37 = vmul.f32 %v4010_v43, %v6959_v12  ;;  %v3943_v55 = vmul.f32 0.5, %v6921_v28 }
 0xc35   : >> { %v5284_v33 = vpop.eup %5283  ;;  %4389 = vmatmul.f32.gmra.mxu3 %v4194_v49  ;;  %v4196_v6 = vmul.f32 %v4164_v19, %v3940_v54  ;;  %5289 = vtanh.f32 %v4104_v50  ;;  %v3941_v0 = vmul.f32 0.5, %v6928_v51  ;;  %v3942_v10 = vmul.f32 0.5, %v6933_v20 }
 0xc36   : >> { %v4167_v25 = vadd.f32 1.0, %v5284_v33  ;;  %5291 = vtanh.f32 %v4107_v24  ;;  %v4105_v14 = vmul.f32 0.7978846, %v4073_v26  ;;  %v4074_v3 = vadd.f32 %v4042_v37, %v6959_v12 }
 0xc37   : >> { %4310 = vmatmul.f32.gmra.mxu1 %v4196_v6  ;;  %v3944_v48 = vmul.f32 0.5, %v6938_v41  ;;  %v3947_v2 = vmul.f32 0.5, %v6944_v39  ;;  %v3945_v29 = vmul.f32 0.5, %v6955_v35  ;;  %v3946_v52 = vmul.f32 0.5, %v6959_v12 }
 0xc38   : >> { %v5286_v7 = vpop.eup %5285  ;;  %v4199_v11 = vmul.f32 %v4167_v25, %v3943_v55  ;;  %5293 = vtanh.f32 %v4105_v14  ;;  %v4106_v42 = vmul.f32 0.7978846, %v4074_v3 }
 0xc39   : >> { %v4165_v62 = vadd.f32 1.0, %v5286_v7  ;;  %v5288_v13 = vpop.eup %5287 }
 0xc3a   : >> { %4433 = vmatmul.f32.gmra.mxu0 %v4199_v11  ;;  %v4166_v28 = vadd.f32 1.0, %v5288_v13  ;;  %5295 = vtanh.f32 %v4106_v42 }
 0xc3b   : >> { %v4197_v38 = vmul.f32 %v4165_v62, %v3941_v0  ;;  %v5290_v44 = vpop.eup %5289 }
 0xc3c   : >> { %v5292_v45 = vpop.eup %5291  ;;  %v4198_v8 = vmul.f32 %v4166_v28, %v3942_v10  ;;  %v4168_v46 = vadd.f32 1.0, %v5290_v44 }
 0xc3d   : >> { %4351 = vmatmul.f32.gmra.mxu2 %v4197_v38  ;;  %v4171_v51 = vadd.f32 1.0, %v5292_v45  ;;  %v6999_v45 = vld [vmem:[%s4274_s26] ss:$0 sm:$0xff] }
 0xc3e   : >> { %v5294_v47 = vpop.eup %5293  ;;  %4392 = vmatmul.f32.gmra.mxu3 %v4198_v8  ;;  %v4200_v36 = vmul.f32 %v4168_v46, %v3944_v48 }
 0xc3f   : >> { %v4203_v30 = vmul.f32 %v4171_v51, %v3947_v2  ;;  %v4169_v5 = vadd.f32 1.0, %v5294_v47 }
 0xc40   : >> { %v5296_v20 = vpop.eup %5295  ;;  %4313 = vmatmul.f32.gmra.mxu1 %v4200_v36 }
 0xc41   : >> { %v4201_v57 = vmul.f32 %v4169_v5, %v3945_v29  ;;  %v4170_v56 = vadd.f32 1.0, %v5296_v20 }
 0xc42   : >> { %4436 = vmatmul.f32.gmra.mxu0 %v4203_v30 }
 0xc43   : >> { %v4202_v63 = vmul.f32 %v4170_v56, %v3946_v52 }
 0xc45   : >> { %4354 = vmatmul.f32.gmra.mxu2 %v4201_v57 }
 0xc46   : >> { %4395 = vmatmul.f32.gmra.mxu3 %v4202_v63 }
 0xc5a   : >> { %v3794_v41 = vpop.f32.mrf.mxu1 }
 0xc5b   : >> { %v3795_v39 = vadd.f32 %v3794_v41, %v6802_v4  ;;  %v3917_v15 = vpop.f32.mrf.mxu0 }
 0xc5c   : >> { %v3918_v53 = vadd.f32 %v3917_v15, %v6804_v21 }
 0xc5d   : >> { %v3980_v61 = vmul.f32 0.044715, %v3795_v39  ;;  %v3948_v11 = vmul.f32 0.5, %v3795_v39 }
 0xc5e   : >> { %v3983_v9 = vmul.f32 0.044715, %v3918_v53  ;;  %v3951_v62 = vmul.f32 0.5, %v3918_v53 }
 0xc5f   : >> { %v4012_v35 = vmul.f32 %v3980_v61, %v3795_v39 }
 0xc60   : >> { %v3835_v40 = vpop.f32.mrf.mxu2  ;;  %v4015_v49 = vmul.f32 %v3983_v9, %v3918_v53 }
 0xc61   : >> { %v3836_v16 = vadd.f32 %v3835_v40, %v6812_v23  ;;  %v3876_v18 = vpop.f32.mrf.mxu3  ;;  %v4044_v43 = vmul.f32 %v4012_v35, %v3795_v39 }
 0xc62   : >> { %v3877_v12 = vadd.f32 %v3876_v18, %v6814_v31  ;;  %v4047_v54 = vmul.f32 %v4015_v49, %v3918_v53 }
 0xc63   : >> { %v3981_v19 = vmul.f32 0.044715, %v3836_v16  ;;  %v4076_v50 = vadd.f32 %v4044_v43, %v3795_v39  ;;  %v3949_v8 = vmul.f32 0.5, %v3836_v16 }
 0xc64   : >> { %v3982_v33 = vmul.f32 0.044715, %v3877_v12  ;;  %v4079_v24 = vadd.f32 %v4047_v54, %v3918_v53  ;;  %v3950_v46 = vmul.f32 0.5, %v3877_v12 }
 0xc65   : >> { %v4108_v4 = vmul.f32 0.7978846, %v4076_v50  ;;  %v4013_v26 = vmul.f32 %v3981_v19, %v3836_v16 }
 0xc66   : >> { %v4111_v37 = vmul.f32 0.7978846, %v4079_v24  ;;  %v4014_v21 = vmul.f32 %v3982_v33, %v3877_v12 }
 0xc67   : >> { %5297 = vtanh.f32 %v4108_v4  ;;  %v4045_v6 = vmul.f32 %v4013_v26, %v3836_v16 }
 0xc68   : >> { %5299 = vtanh.f32 %v4111_v37  ;;  %v4046_v55 = vmul.f32 %v4014_v21, %v3877_v12 }
 0xc69   : >> { %v4077_v25 = vadd.f32 %v4045_v6, %v3836_v16 }
 0xc6a   : >> { %v4078_v14 = vadd.f32 %v4046_v55, %v3877_v12 }
 0xc6b   : >> { %v4109_v23 = vmul.f32 0.7978846, %v4077_v25 }
 0xc6c   : >> { %v4110_v3 = vmul.f32 0.7978846, %v4078_v14 }
 0xc6d   : >> { %v5298_v7 = vpop.eup %5297  ;;  %5301 = vtanh.f32 %v4109_v23  ;;  %v4296_v28 = vpop.f32.mrf.mxu1 }
 0xc6e   : >> { %v5300_v31 = vpop.eup %5299  ;;  %v4172_v0 = vadd.f32 1.0, %v5298_v7  ;;  %5303 = vtanh.f32 %v4110_v3  ;;  %v4297_v36 = vadd.f32 %v6999_v45, %v4296_v28  ;;  %v4419_v20 = vpop.f32.mrf.mxu0 }
 0xc6f   : >> { %v4175_v42 = vadd.f32 1.0, %v5300_v31 }
 0xc70   : >> { %v4204_v13 = vmul.f32 %v4172_v0, %v3948_v11 }
 0xc71   : >> { %v4207_v38 = vmul.f32 %v4175_v42, %v3951_v62 }
 0xc72   : >> { %4316 = vmatmul.f32.gmra.mxu1 %v4204_v13 }
 0xc73   : >> { %v5302_v10 = vpop.eup %5301  ;;  %4439 = vmatmul.f32.gmra.mxu0 %v4207_v38 }
 0xc74   : >> { %v5304_v44 = vpop.eup %5303  ;;  %v4173_v48 = vadd.f32 1.0, %v5302_v10 }
 0xc75   : >> { %v4174_v2 = vadd.f32 1.0, %v5304_v44  ;;  %v4299_v52 = vpop.f32.mrf.mxu1 }
 0xc76   : >> { %v4205_v51 = vmul.f32 %v4173_v48, %v3949_v8  ;;  %v4300_v63 = vadd.f32 %v6999_v45, %v4299_v52  ;;  %v4422_v9 = vpop.f32.mrf.mxu0 }
 0xc77   : >> { %v4206_v47 = vmul.f32 %v4174_v2, %v3950_v46 }
 0xc78   : >> { %4357 = vmatmul.f32.gmra.mxu2 %v4205_v51 }
 0xc79   : >> { %4398 = vmatmul.f32.gmra.mxu3 %v4206_v47  ;;  %v4337_v30 = vpop.f32.mrf.mxu2 }
 0xc7a   : >> { %v4338_v29 = vadd.f32 %v4337_v30, %v4297_v36  ;;  %v4378_v5 = vpop.f32.mrf.mxu3 }
 0xc7c   : >> { %v4379_v57 = vadd.f32 %v4378_v5, %v4338_v29 }
 0xc7e   : >> { %v4420_v56 = vadd.f32 %v4419_v20, %v4379_v57 }
 0xc7f   : >> { %v4302_v40 = vpop.f32.mrf.mxu1 }
 0xc80   : >> { %v7004_v41 = vadd.f32 %v4420_v56, %v6673_v17  ;;  %v4303_v16 = vadd.f32 %v6999_v45, %v4302_v40 }
 0xc81   : >> { %v4340_v39 = vpop.f32.mrf.mxu2  ;;  %v4425_v54 = vpop.f32.mrf.mxu0 }
 0xc82   : >> { %v4341_v15 = vadd.f32 %v4340_v39, %v4300_v63  ;;  %4451 = vadd.xlane.f32.xlu0 %v7004_v41 }
 0xc84   : >> { %v4381_v53 = vpop.f32.mrf.mxu3 }
 0xc85   : >> { %v4382_v61 = vadd.f32 %v4381_v53, %v4341_v15 }
 0xc87   : >> { %v4423_v35 = vadd.f32 %v4422_v9, %v4382_v61 }
 0xc89   : >> { %v7008_v49 = vadd.f32 %v4423_v35, %v6680_v27 }
 0xc8b   : >> { %4453 = vadd.xlane.f32.xlu1 %v7008_v49 }
 0xc8c   : >> { %v4343_v18 = vpop.f32.mrf.mxu2 }
 0xc8d   : >> { %v4344_v43 = vadd.f32 %v4343_v18, %v4303_v16  ;;  %v4384_v17 = vpop.f32.mrf.mxu3 }
 0xc8f   : >> { %v4385_v12 = vadd.f32 %v4384_v17, %v4344_v43 }
 0xc91   : >> { %v4426_v19 = vadd.f32 %v4425_v54, %v4385_v12 }
 0xc93   : >> { %v7013_v50 = vadd.f32 %v4426_v19, %v6687_v34 }
 0xc95   : >> { %4455 = vadd.xlane.f32.xlu2 %v7013_v50 }
 0xca1   : >> { %v4305_v33 = vpop.f32.mrf.mxu1 }
 0xca2   : >> { %v4306_v24 = vadd.f32 %v6999_v45, %v4305_v33  ;;  %v4428_v26 = vpop.f32.mrf.mxu0 }
 0xcaa   : >> { %v4308_v6 = vpop.f32.mrf.mxu1 }
 0xcab   : >> { %v4309_v14 = vadd.f32 %v6999_v45, %v4308_v6  ;;  %v4431_v34 = vpop.f32.mrf.mxu0 }
 0xcad   : >> { %v4346_v27 = vpop.f32.mrf.mxu2 }
 0xcae   : >> { %v4347_v4 = vadd.f32 %v4346_v27, %v4306_v24  ;;  %v4387_v37 = vpop.f32.mrf.mxu3 }
 0xcb0   : >> { %v4388_v21 = vadd.f32 %v4387_v37, %v4347_v4 }
 0xcb2   : >> { %v4429_v55 = vadd.f32 %v4428_v26, %v4388_v21 }
 0xcb4   : >> { %v4446_v25 = vadd.f32 %v4429_v55, %v6697_v59  ;;  %v4311_v31 = vpop.f32.mrf.mxu1 }
 0xcb5   : >> { %v4312_v42 = vadd.f32 %v6999_v45, %v4311_v31 }
 0xcb6   : >> { %4457 = vadd.xlane.f32.xlu0 %v4446_v25 }
 0xcb7   : >> { %v4349_v23 = vpop.f32.mrf.mxu2  ;;  %v4434_v10 = vpop.f32.mrf.mxu0 }
 0xcb8   : >> { %v4350_v3 = vadd.f32 %v4349_v23, %v4309_v14  ;;  %v4390_v7 = vpop.f32.mrf.mxu3 }
 0xcba   : >> { %v4391_v11 = vadd.f32 %v4390_v7, %v4350_v3 }
 0xcbc   : >> { %v4432_v0 = vadd.f32 %v4431_v34, %v4391_v11 }
 0xcbd   : >> { %v4314_v44 = vpop.f32.mrf.mxu1 }
 0xcbe   : >> { %v4447_v62 = vadd.f32 %v4432_v0, %v6705_v60  ;;  %v4315_v48 = vadd.f32 %v6999_v45, %v4314_v44 }
 0xcbf   : >> { %v4437_v60 = vpop.f32.mrf.mxu0 }
 0xcc0   : >> { %v4352_v13 = vpop.f32.mrf.mxu2  ;;  %4459 = vadd.xlane.f32.xlu1 %v4447_v62 }
 0xcc1   : >> { %v4353_v38 = vadd.f32 %v4352_v13, %v4312_v42  ;;  %v4393_v28 = vpop.f32.mrf.mxu3 }
 0xcc3   : >> { %v4394_v59 = vadd.f32 %v4393_v28, %v4353_v38 }
 0xcc5   : >> { %v4435_v8 = vadd.f32 %v4434_v10, %v4394_v59 }
 0xcc7   : >> { %v4448_v46 = vadd.f32 %v4435_v8, %v6712_v58 }
 0xcc8   : >> { %v4355_v2 = vpop.f32.mrf.mxu2 }
 0xcc9   : >> { %v4356_v51 = vadd.f32 %v4355_v2, %v4315_v48  ;;  %4461 = vadd.xlane.f32.xlu2 %v4448_v46  ;;  %v4396_v47 = vpop.f32.mrf.mxu3 }
 0xccb   : >> { %v4397_v36 = vadd.f32 %v4396_v47, %v4356_v51 }
 0xccd   : >> { %v4438_v30 = vadd.f32 %v4437_v60, %v4397_v36 }
 0xccf   : >> { %v4449_v29 = vadd.f32 %v4438_v30, %v6719_v1 }
 0xcd1   : >> { %4463 = vadd.xlane.f32.xlu0 %v4449_v29 }
 0xcef   : >> { %v4317_v57 = vpop.f32.mrf.mxu1 }
 0xcf0   : >> { %v4318_v56 = vadd.f32 %v6999_v45, %v4317_v57  ;;  %v4440_v1 = vpop.f32.mrf.mxu0 }
 0xcf5   : >> { %v4452_v5 = vpop.xlane.xlu0 %4451 }
 0xcf6   : >> { %v4467_v20 = vmul.f32 %v4452_v5, %v6550_v32 }
 0xcf8   : >> { %v7026_v52 = vsub.f32 %v7004_v41, %v4467_v20 }
 0xcfa   : >> { %v4483_v58 = vmul.f32 %v7026_v52, %v7026_v52 }
 0xcfb   : >> { %v4358_v63 = vpop.f32.mrf.mxu2 }
 0xcfc   : >> { %v4359_v39 = vadd.f32 %v4358_v63, %v4318_v56  ;;  %4491 = vadd.xlane.f32.xlu2 %v4483_v58  ;;  %v4399_v15 = vpop.f32.mrf.mxu3 }
 0xcfe   : >> { %v4400_v53 = vadd.f32 %v4399_v15, %v4359_v39  ;;  %v4454_v61 = vpop.xlane.xlu1 %4453 }
 0xcff   : >> { %v4468_v9 = vmul.f32 %v4454_v61, %v6550_v32 }
 0xd00   : >> { %v4441_v35 = vadd.f32 %v4440_v1, %v4400_v53 }
 0xd01   : >> { %v7033_v40 = vsub.f32 %v7008_v49, %v4468_v9 }
 0xd02   : >> { %v4450_v41 = vadd.f32 %v4441_v35, %v6810_v22 }
 0xd03   : >> { %v4484_v45 = vmul.f32 %v7033_v40, %v7033_v40 }
 0xd04   : >> { %4465 = vadd.xlane.f32.xlu1 %v4450_v41 }
 0xd05   : >> { %4493 = vadd.xlane.f32.xlu0 %v4484_v45 }
 0xd08   : >> { %v4456_v16 = vpop.xlane.xlu2 %4455 }
 0xd09   : >> { %v4469_v18 = vmul.f32 %v4456_v16, %v6550_v32 }
 0xd0b   : >> { %v7040_v43 = vsub.f32 %v7013_v50, %v4469_v18 }
 0xd0d   : >> { %v4485_v17 = vmul.f32 %v7040_v43, %v7040_v43 }
 0xd0f   : >> { %4495 = vadd.xlane.f32.xlu1 %v4485_v17 }
 0xd29   : >> { %v4458_v12 = vpop.xlane.xlu0 %4457 }
 0xd2a   : >> { %v4470_v49 = vmul.f32 %v4458_v12, %v6550_v32 }
 0xd2c   : >> { %v7045_v54 = vsub.f32 %v4446_v25, %v4470_v49 }
 0xd2e   : >> { %v4486_v22 = vmul.f32 %v7045_v54, %v7045_v54 }
 0xd30   : >> { %4497 = vadd.xlane.f32.xlu2 %v4486_v22 }
 0xd33   : >> { %v4460_v19 = vpop.xlane.xlu1 %4459 }
 0xd34   : >> { %v4471_v33 = vmul.f32 %v4460_v19, %v6550_v32 }
 0xd36   : >> { %v7050_v24 = vsub.f32 %v4447_v62, %v4471_v33 }
 0xd38   : >> { %v4487_v50 = vmul.f32 %v7050_v24, %v7050_v24 }
 0xd3a   : >> { %4499 = vadd.xlane.f32.xlu0 %v4487_v50 }
 0xd3c   : >> { %v4462_v27 = vpop.xlane.xlu2 %4461 }
 0xd3d   : >> { %v4472_v4 = vmul.f32 %v4462_v27, %v6550_v32 }
 0xd3f   : >> { %v7055_v26 = vsub.f32 %v4448_v46, %v4472_v4 }
 0xd41   : >> { %v4488_v37 = vmul.f32 %v7055_v26, %v7055_v26 }
 0xd43   : >> { %4501 = vadd.xlane.f32.xlu1 %v4488_v37 }
 0xd44   : >> { %v4464_v21 = vpop.xlane.xlu0 %4463 }
 0xd45   : >> { %v4473_v6 = vmul.f32 %v4464_v21, %v6550_v32 }
 0xd47   : >> { %v7060_v55 = vsub.f32 %v4449_v29, %v4473_v6 }
 0xd49   : >> { %v4489_v25 = vmul.f32 %v7060_v55, %v7060_v55 }
 0xd4b   : >> { %4503 = vadd.xlane.f32.xlu2 %v4489_v25 }
 0xd6f   : >> { %v4492_v14 = vpop.xlane.xlu2 %4491 }
 0xd70   : >> { %v4507_v23 = vmul.f32 %v4492_v14, %v6550_v32 }
 0xd72   : >> { %v4515_v34 = vadd.f32 1e-06, %v4507_v23 }
 0xd74   : >> { %5305 = vrsqrt.f32 %v4515_v34  ;;  %vm4529_vm0 = vweird.f32 %v4515_v34 }
 0xd77   : >> { %v4466_v3 = vpop.xlane.xlu1 %4465 }
 0xd78   : >> { %v4494_v7 = vpop.xlane.xlu0 %4493  ;;  %v4474_v31 = vmul.f32 %v4466_v3, %v6550_v32 }
 0xd79   : >> { %v4508_v11 = vmul.f32 %v4494_v7, %v6550_v32 }
 0xd7a   : >> { %v5306_v0 = vpop.eup %5305  ;;  %v7067_v62 = vsub.f32 %v4450_v41, %v4474_v31 }
 0xd7b   : >> { %v4524_v42 = vmul.f32 %v5306_v0, %v4515_v34  ;;  %v4516_v13 = vadd.f32 1e-06, %v4508_v11  ;;  %vm4530_vm15 = vweird.f32 %v5306_v0 }
 0xd7c   : >> { %v4490_v38 = vmul.f32 %v7067_v62, %v7067_v62  ;;  %vm4531_vm1 = vmor %vm4529_vm0, %vm4530_vm15 }
 0xd7d   : >> { %v4525_v10 = vmul.f32 %v5306_v0, %v4524_v42  ;;  %5307 = vrsqrt.f32 %v4516_v13  ;;  %vm4539_vm5 = vweird.f32 %v4516_v13 }
 0xd7e   : >> { %4505 = vadd.xlane.f32.xlu0 %v4490_v38 }
 0xd7f   : >> { %v4526_v28 = vmul.f32 0.5, %v4525_v10 }
 0xd81   : >> { %v4527_v59 = vsub.f32 1.5, %v4526_v28 }
 0xd82   : >> { %v4496_v44 = vpop.xlane.xlu1 %4495 }
 0xd83   : >> { %v5308_v8 = vpop.eup %5307  ;;  %v4528_v48 = vmul.f32 %v5306_v0, %v4527_v59  ;;  %v4509_v46 = vmul.f32 %v4496_v44, %v6550_v32 }
 0xd84   : >> { %v4534_v2 = vmul.f32 %v5308_v8, %v4516_v13  ;;  %vm4540_vm4 = vweird.f32 %v5308_v8 }
 0xd85   : >> { %v4532_v51 = vsel %vm4531_vm1, %v5306_v0, %v4528_v48  ;;  %v4517_v47 = vadd.f32 1e-06, %v4509_v46  ;;  %vm4541_vm3 = vmor %vm4539_vm5, %vm4540_vm4 }
 0xd86   : >> { %v4603_v36 = vmul.f32 %v4532_v51, %v7026_v52  ;;  %v4535_v60 = vmul.f32 %v5308_v8, %v4534_v2 }
 0xd87   : >> { %5309 = vrsqrt.f32 %v4517_v47  ;;  %vm4549_vm2 = vweird.f32 %v4517_v47 }
 0xd88   : >> { %4611 = vst [vmem:[#allocation2 + $0x30] sm:$0xff] %v4603_v36  ;;  %v4536_v30 = vmul.f32 0.5, %v4535_v60 }
 0xd8a   : >> { %v4537_v29 = vsub.f32 1.5, %v4536_v30 }
 0xd8c   : >> { %v4538_v5 = vmul.f32 %v5308_v8, %v4537_v29 }
 0xd8d   : >> { %v5310_v20 = vpop.eup %5309 }
 0xd8e   : >> { %v4542_v57 = vsel %vm4541_vm3, %v5308_v8, %v4538_v5  ;;  %v4544_v56 = vmul.f32 %v5310_v20, %v4517_v47  ;;  %vm4550_vm6 = vweird.f32 %v5310_v20 }
 0xd8f   : >> { %v4604_v58 = vmul.f32 %v4542_v57, %v7033_v40  ;;  %vm4551_vm7 = vmor %vm4549_vm2, %vm4550_vm6 }
 0xd90   : >> { %v4545_v63 = vmul.f32 %v5310_v20, %v4544_v56 }
 0xd91   : >> { %4612 = vst [vmem:[#allocation2] sm:$0xff] %v4604_v58 }
 0xd92   : >> { %v4546_v39 = vmul.f32 0.5, %v4545_v63  ;;  %v4639_v63 = vld [vmem:[%s7152_s12 + $0x60] sm:$0xff] (%p622_p8) }
 0xd94   : >> { %v4547_v15 = vsub.f32 1.5, %v4546_v39 }
 0xd96   : >> { %v4548_v52 = vmul.f32 %v5310_v20, %v4547_v15  ;;  %v4638_v15 = vld [vmem:[%s7152_s12 + $0x58] sm:$0xff] (%p622_p8) }
 0xd98   : >> { %v4552_v53 = vsel %vm4551_vm7, %v5310_v20, %v4548_v52  ;;  %v4620_v39 = vld [vmem:[#allocation2] sm:$0xff] (%p622_p8)  ;;  %vm4656_vm7 = vcmask (%p622_p8), 1041409  }
 0xd99   : >> { %v4605_v61 = vmul.f32 %v4552_v53, %v7040_v43  ;;  %v4655_v53 = vrot.slane (%p622_p8), %v4620_v39, 7 }
 0xd9b   : >> { %4613 = vst [vmem:[#allocation2 + $0x18] sm:$0xff] %v4605_v61  ;;  %v4637_v61 = vld [vmem:[%s7152_s12 + $0x50] sm:$0xff] (%p622_p8) }
 0xda2   : > { %v4621_v52 = vld [vmem:[#allocation2 + $0x18] sm:$0xff] (%p622_p8) }
 0xda3   : >> { %v4498_v1 = vpop.xlane.xlu2 %4497 }
 0xda4   : >> { %v4510_v9 = vmul.f32 %v4498_v1, %v6550_v32  ;;  %v4619_v1 = vld [vmem:[#allocation2 + $0x30] sm:$0xff] (%p622_p8) }
 0xda6   : >> { %v4518_v35 = vadd.f32 1e-06, %v4510_v9  ;;  %v4636_v9 = vld [vmem:[%s7152_s12 + $0x48] sm:$0xff] (%p622_p8) }
 0xda8   : >> { %5311 = vrsqrt.f32 %v4518_v35  ;;  %vm4559_vm9 = vweird.f32 %v4518_v35 }
 0xdad   : >> { %v4500_v45 = vpop.xlane.xlu0 %4499 }
 0xdae   : >> { %v5312_v41 = vpop.eup %5311  ;;  %v4511_v16 = vmul.f32 %v4500_v45, %v6550_v32  ;;  %v4657_v45 = vsel (%p622_p8), %vm4656_vm7, %v4655_v53, %v4619_v1 }
 0xdaf   : >> { %v4554_v40 = vmul.f32 %v5312_v41, %v4518_v35  ;;  %vm4560_vm8 = vweird.f32 %v5312_v41 }
 0xdb0   : >> { %v4519_v17 = vadd.f32 1e-06, %v4511_v16  ;;  %vm4561_vm10 = vmor %vm4559_vm9, %vm4560_vm8  ;;  %vm4659_vm8 = vcmask (%p622_p8), 1042434   ;;  %vm4662_vm9 = vcmask (%p622_p8), 1043459  }
 0xdb1   : >> { %v4555_v18 = vmul.f32 %v5312_v41, %v4554_v40  ;;  %v4635_v40 = vld [vmem:[%s7152_s12 + $0x40] sm:$0xff] (%p622_p8) }
 0xdb2   : >> { %5313 = vrsqrt.f32 %v4519_v17  ;;  %vm4569_vm12 = vweird.f32 %v4519_v17 }
 0xdb3   : >> { %v4556_v12 = vmul.f32 0.5, %v4555_v18 }
 0xdb5   : >> { %v4557_v49 = vsub.f32 1.5, %v4556_v12 }
 0xdb6   : >> { %v4502_v43 = vpop.xlane.xlu1 %4501 }
 0xdb7   : >> { %v4558_v22 = vmul.f32 %v5312_v41, %v4557_v49  ;;  %v4512_v19 = vmul.f32 %v4502_v43, %v6550_v32  ;;  %v4633_v49 = vld [vmem:[%s7152_s12 + $0x30] sm:$0xff] (%p622_p8) }
 0xdb8   : >> { %v5314_v33 = vpop.eup %5313 }
 0xdb9   : >> { %v4562_v50 = vsel %vm4561_vm10, %v5312_v41, %v4558_v22  ;;  %v4564_v4 = vmul.f32 %v5314_v33, %v4519_v17  ;;  %v4520_v37 = vadd.f32 1e-06, %v4512_v19  ;;  %vm4570_vm11 = vweird.f32 %v5314_v33  ;;  %v4634_v17 = vld [vmem:[%s7152_s12 + $0x38] sm:$0xff] (%p622_p8) }
 0xdba   : >> { %v4606_v27 = vmul.f32 %v4562_v50, %v7045_v54  ;;  %vm4571_vm13 = vmor %vm4569_vm12, %vm4570_vm11  ;;  %v4658_v41 = vrot.slane (%p622_p8), %v4621_v52, 6  ;;  %vm4665_vm10 = vcmask (%p622_p8), 1044484   ;;  %vm4668_vm11 = vcmask (%p622_p8), 1045509  }
 0xdbb   : >> { %v4565_v21 = vmul.f32 %v5314_v33, %v4564_v4  ;;  %5315 = vrsqrt.f32 %v4520_v37  ;;  %vm4579_vm15 = vweird.f32 %v4520_v37  ;;  %v4631_v4 = vld [vmem:[%s7152_s12 + $0x20] sm:$0xff] (%p622_p8)  ;;  %vm4671_vm12 = vcmask (%p622_p8), 1046534  }
 0xdbc   : >> { %4614 = vst [vmem:[#allocation2 + $0x10] sm:$0xff] %v4606_v27  ;;  %v4660_v12 = vsel (%p622_p8), %vm4659_vm8, %v4658_v41, %v4657_v45 }
 0xdbd   : >> { %v4566_v6 = vmul.f32 0.5, %v4565_v21  ;;  %v4630_v21 = vld [vmem:[%s7152_s12 + $0x18] sm:$0xff] (%p622_p8) }
 0xdbe   : >> { %v4504_v25 = vpop.xlane.xlu2 %4503 }
 0xdbf   : >> { %v4567_v14 = vsub.f32 1.5, %v4566_v6  ;;  %v4513_v23 = vmul.f32 %v4504_v25, %v6550_v32 }
 0xdc1   : >> { %v5316_v34 = vpop.eup %5315  ;;  %v4568_v3 = vmul.f32 %v5314_v33, %v4567_v14  ;;  %v4521_v7 = vadd.f32 1e-06, %v4513_v23  ;;  %v4629_v23 = vld [vmem:[%s7152_s12 + $0x10] sm:$0xff] (%p622_p8) }
 0xdc2   : >> { %v4574_v31 = vmul.f32 %v5316_v34, %v4520_v37  ;;  %vm4580_vm14 = vweird.f32 %v5316_v34 }
 0xdc3   : >> { %v4572_v11 = vsel %vm4571_vm13, %v5314_v33, %v4568_v3  ;;  %5317 = vrsqrt.f32 %v4521_v7  ;;  %vm4581_vm0 = vmor %vm4579_vm15, %vm4580_vm14  ;;  %vm4589_vm4 = vweird.f32 %v4521_v7  ;;  %v4622_v35 = vld [vmem:[#allocation2 + $0x10] sm:$0xff] (%p622_p8)  ;;  %v4632_v33 = vld [vmem:[%s7152_s12 + $0x28] sm:$0xff] (%p622_p8)  ;;  %vm4674_vm13 = vcmask (%p622_p8), 1047559  }
 0xdc4   : >> { %v4607_v54 = vmul.f32 %v4572_v11, %v7050_v24  ;;  %v4575_v0 = vmul.f32 %v5316_v34, %v4574_v31  ;;  %v4661_v18 = vrot.slane (%p622_p8), %v4622_v35, 5  ;;  %v4628_v3 = vld [vmem:[%s7152_s12 + $0x8] sm:$0xff] (%p622_p8)  ;;  %v4627_v31 = vld [vmem:[%s7152_s12] sm:$0xff] (%p622_p8)  ;;  %vm4697_vm14 = vcmask (%p622_p8), 7168  }
 0xdc6   : >> { %4615 = vst [vmem:[#allocation2 + $0x8] sm:$0xff] %v4607_v54  ;;  %v4576_v42 = vmul.f32 0.5, %v4575_v0  ;;  %v4663_v19 = vsel (%p622_p8), %vm4662_vm9, %v4661_v18, %v4660_v12  ;;  %v5329_v54 = vld [vmem:[#allocation3] ss:$0 sm:$0xff] (%p622_p8) }
 0xdc8   : >> { %v4577_v13 = vsub.f32 1.5, %v4576_v42 }
 0xdc9   : >> { %v5318_v38 = vpop.eup %5317 }
 0xdca   : >> { %v4578_v10 = vmul.f32 %v5316_v34, %v4577_v13  ;;  %v4584_v28 = vmul.f32 %v5318_v38, %v4521_v7  ;;  %vm4590_vm1 = vweird.f32 %v5318_v38 }
 0xdcb   : >> { %vm4591_vm5 = vmor %vm4589_vm4, %vm4590_vm1 }
 0xdcc   : >> { %v4582_v59 = vsel %vm4581_vm0, %v5316_v34, %v4578_v10  ;;  %v4585_v44 = vmul.f32 %v5318_v38, %v4584_v28 }
 0xdcd   : >> { %v4608_v8 = vmul.f32 %v4582_v59, %v7055_v26  ;;  %v4623_v16 = vld [vmem:[#allocation2 + $0x8] sm:$0xff] (%p622_p8) }
 0xdce   : >> { %v4586_v48 = vmul.f32 0.5, %v4585_v44  ;;  %v4664_v43 = vrot.slane (%p622_p8), %v4623_v16, 4 }
 0xdcf   : >> { %4616 = vst [vmem:[#allocation2 + $0x20] sm:$0xff] %v4608_v8 }
 0xdd0   : >> { %v4587_v46 = vsub.f32 1.5, %v4586_v48  ;;  %v4666_v37 = vsel (%p622_p8), %vm4665_vm10, %v4664_v43, %v4663_v19 }
 0xdd2   : >> { %v4588_v2 = vmul.f32 %v5318_v38, %v4587_v46 }
 0xdd4   : >> { %v4592_v24 = vsel %vm4591_vm5, %v5318_v38, %v4588_v2 }
 0xdd5   : >> { %v4609_v51 = vmul.f32 %v4592_v24, %v7060_v55  ;;  %v4641_v55 = vld [vmem:[%s7152_s12 + $0x70] sm:$0xff] (%p622_p8) }
 0xdd6   : > { %v4624_v22 = vld [vmem:[#allocation2 + $0x20] sm:$0xff] (%p622_p8) }
 0xdd7   : >> { %4617 = vst [vmem:[#allocation2 + $0x28] sm:$0xff] %v4609_v51  ;;  %v4667_v27 = vrot.slane (%p622_p8), %v4624_v22, 3 }
 0xdd9   : > { %v4669_v14 = vsel (%p622_p8), %vm4668_vm11, %v4667_v27, %v4666_v37 }
 0xdde   : > { %v4625_v50 = vld [vmem:[#allocation2 + $0x28] sm:$0xff] (%p622_p8) }
 0xddf   : > { %v4670_v25 = vrot.slane (%p622_p8), %v4625_v50, 2 }
 0xde1   : > { %v4672_v7 = vsel (%p622_p8), %vm4671_vm12, %v4670_v25, %v4669_v14 }
 0xdf1   : >> { %v4506_v47 = vpop.xlane.xlu0 %4505 }
 0xdf2   : >> { %v4514_v36 = vmul.f32 %v4506_v47, %v6550_v32  ;;  %v4642_v32 = vld [vmem:[%s7152_s12 + $0x78] sm:$0xff] (%p622_p8) }
 0xdf3   : > { %4677 = vmatpush.msra.mxu0 (%p622_p8), %v4642_v32 }
 0xdf4   : >> { %v4522_v60 = vadd.f32 1e-06, %v4514_v36 }
 0xdf5   : > { %4678 = vmatpush.msra.mxu0 (%p622_p8), %v4641_v55 }
 0xdf6   : >> { %5319 = vrsqrt.f32 %v4522_v60  ;;  %vm4599_vm6 = vweird.f32 %v4522_v60 }
 0xdfc   : >> { %v5320_v30 = vpop.eup %5319 }
 0xdfd   : >> { %v4594_v29 = vmul.f32 %v5320_v30, %v4522_v60  ;;  %vm4600_vm3 = vweird.f32 %v5320_v30 }
 0xdfe   : >> { %vm4601_vm2 = vmor %vm4599_vm6, %vm4600_vm3 }
 0xdff   : >> { %v4595_v5 = vmul.f32 %v5320_v30, %v4594_v29 }
 0xe01   : >> { %v4596_v26 = vmul.f32 0.5, %v4595_v5 }
 0xe03   : >> { %v4597_v20 = vsub.f32 1.5, %v4596_v26 }
 0xe05   : >> { %v4598_v57 = vmul.f32 %v5320_v30, %v4597_v20 }
 0xe06   : > { %624 = sbr.rel (!%p622_p8) target bundleno = 180 (0xb4), region = 134 }
 0xe07   : >> { %v4602_v56 = vsel %vm4601_vm2, %v5320_v30, %v4598_v57 }
 0xe08   : >> { %v4610_v58 = vmul.f32 %v4602_v56, %v7067_v62  ;;  %v4640_v62 = vld [vmem:[%s7152_s12 + $0x68] sm:$0xff] (%p622_p8) }
 0xe09   : > { %4679 = vmatpush.msra.mxu0 (%p622_p8), %v4640_v62 }
 0xe0a   : >> { %4618 = vst [vmem:[#allocation2 + $0x38] sm:$0xff] %v4610_v58 }
 0xe0b   : > { %4680 = vmatpush.msra.mxu0 %v4639_v63 }
 0xe0d   : > { %4681 = vmatpush.msra.mxu0 %v4638_v15 }
 0xe0f   : > { %4682 = vmatpush.msra.mxu0 %v4637_v61 }
 0xe11   : > { %4683 = vmatpush.msra.mxu0 %v4636_v9  ;;  %v4626_v6 = vld [vmem:[#allocation2 + $0x38] sm:$0xff] }
 0xe12   : > { %v4673_v34 = vrot.slane %v4626_v6, 1 }
 0xe13   : > { %4684 = vmatpush.msra.mxu0 %v4635_v40 }
 0xe14   : > { %v4675_v11 = vsel %vm4674_vm13, %v4673_v34, %v4672_v7 }
 0xe15   : > { %4685 = vmatpush.msra.mxu0 %v4634_v17 }
 0xe17   : > { %4686 = vmatpush.msra.mxu0 %v4633_v49 }
 0xe19   : > { %4687 = vmatpush.msra.mxu0 %v4632_v33 }
 0xe1b   : > { %4688 = vmatpush.msra.mxu0 %v4631_v4 }
 0xe1d   : > { %4689 = vmatpush.msra.mxu0 %v4630_v21 }
 0xe1f   : > { %4690 = vmatpush.msra.mxu0 %v4629_v23 }
 0xe21   : > { %4691 = vmatpush.msra.mxu0 %v4628_v3 }
 0xe23   : > { %4692 = vmatpush.msra.mxu0 %v4627_v31 }
 0xe24   : > { %4693 = vmatmul.f32.vlgmr.msra.gmra.mxu0 %v4675_v11 }
 0xea1   : > { %v4694_v0 = vpop.f32.mrf.mxu0 }
 0xea2   : > { %v4695_v42 = vadd.f32 %v5329_v54, %v4694_v0 }
 0xea4   : > { %4698 = vst.msk [vmem:[%s5589_s21] sm:$0xff] %vm4697_vm14, %v4695_v42 }
 0xea5 PF: > { %s7177_s25 = sld [smem:[#allocation11_spill]] }
 0xeab   : > { %s28_s15 = sadd.s32 1, %s7177_s25  }
 0xeac   : > { %p25_p9 = scmp.ge.s32.totalorder %s28_s15, 4  }
 0xeae   :  { %27 = sbr.rel (!%p25_p9) target bundleno = 5 (0x5), region = 145 }
 0xeb3   :  { %4718 = vsyncpa [#allocation5], 1 }
 0xeb4   :  { %4720 = vsyncpa [#allocation5 + $0x1], 1 }
 0xeb5   :  { %4721 = vsyncpa [#allocation7], 1 }

</bundles_post_ra>
